<compile_context>
chip_gen: v7x
topology: tpu7x:2x2x1
jax: 0.10.0
libtpu: 0.0.40
codegen_flags: <defaults>
</compile_context>

<pallas_src>
import jax
import jax.numpy as jnp
import numpy as np
from jax.experimental import pallas as pl
from jax.experimental.pallas import tpu as pltpu

HIGHEST = jax.lax.Precision.HIGHEST


# ---------------------------------------------------------------------------
# Fused kernel (single grid step, batch merged into rows):
#   1) hoisted input projection for all T timesteps (one matmul per gate)
#   2) sequential GRU over T (only the recurrent matmuls in the loop)
#   3) DiffConv(k=2) taps via one stacked block-diag matmul + folded decoder
# ---------------------------------------------------------------------------
def fused_kernel(x_ref, wx_ref, c_ref, whh_ref, bhn_ref, pstack_ref,
                 wf_ref, b_ref, o_ref, gi_r_scr, gi_z_scr, gi_n_scr):
    BN = c_ref.shape[1]                  # B*N (merged batch*nodes)
    H = c_ref.shape[2]
    TBN = x_ref.shape[0]
    T = TBN // BN

    x = x_ref[...]                                          # (T*B*N, F)

    # --- hoisted input-gate projection for all timesteps (one matmul / gate)
    gi_r_scr[...] = jnp.dot(x, wx_ref[0], preferred_element_type=jnp.float32)
    gi_z_scr[...] = jnp.dot(x, wx_ref[1], preferred_element_type=jnp.float32)
    gi_n_scr[...] = jnp.dot(x, wx_ref[2], preferred_element_type=jnp.float32)

    c_r, c_z, c_n = c_ref[0], c_ref[1], c_ref[2]            # (BN, H) each
    whh_r, whh_z, whh_n = whh_ref[0], whh_ref[1], whh_ref[2]
    b_hn = bhn_ref[...]                                     # (1, H)

    # --- sequential GRU (only the recurrent (BN,H)x(H,H) matmuls in the loop)
    h = jnp.zeros((BN, H), jnp.float32)
    for t in range(T):                                      # static unroll, T small
        lo = t * BN
        gi_r = gi_r_scr[lo:lo + BN, :] + c_r                # b_hh[r] pre-folded into c_r
        gi_z = gi_z_scr[lo:lo + BN, :] + c_z                # b_hh[z] pre-folded into c_z
        gi_n = gi_n_scr[lo:lo + BN, :] + c_n
        gh_r = jnp.dot(h, whh_r, preferred_element_type=jnp.float32)
        gh_z = jnp.dot(h, whh_z, preferred_element_type=jnp.float32)
        gh_n = jnp.dot(h, whh_n, preferred_element_type=jnp.float32) + b_hn
        r = jax.nn.sigmoid(gi_r + gh_r)
        z = jax.nn.sigmoid(gi_z + gh_z)
        n = jnp.tanh(gi_n + r * gh_n)
        h = (1.0 - z) * n + z * h

    # --- DiffConv k=2: all four taps in ONE matmul against the stacked
    #     block-diagonal [Pf; Pf^2; Pb; Pb^2] matrix, then folded decoder.
    d_all = jnp.dot(pstack_ref[...], h,
                    preferred_element_type=jnp.float32)     # (4*BN, H)
    y = (jnp.dot(h,                    wf_ref[0], preferred_element_type=jnp.float32)
         + jnp.dot(d_all[0 * BN:1 * BN], wf_ref[1], preferred_element_type=jnp.float32)
         + jnp.dot(d_all[1 * BN:2 * BN], wf_ref[2], preferred_element_type=jnp.float32)
         + jnp.dot(d_all[2 * BN:3 * BN], wf_ref[3], preferred_element_type=jnp.float32)
         + jnp.dot(d_all[3 * BN:4 * BN], wf_ref[4], preferred_element_type=jnp.float32)
         + b_ref[...])
    o_ref[...] = y                                          # (BN, O)


def fused_forward(x_flat, wx3, c3b, whh3, b_hn, p_stack, wfd5, bfd):
    TBN, F = x_flat.shape
    _, BN, H = c3b.shape
    O = wfd5.shape[2]
    return pl.pallas_call(
        fused_kernel,
        out_shape=jax.ShapeDtypeStruct((BN, O), jnp.float32),
        grid_spec=pltpu.PrefetchScalarGridSpec(
            num_scalar_prefetch=0,
            grid=(1,),
            in_specs=[
                pl.BlockSpec((TBN, F), lambda i: (0, 0)),        # x (all t, all b)
                pl.BlockSpec((3, F, H), lambda i: (0, 0, 0)),    # Wx per gate
                pl.BlockSpec((3, BN, H), lambda i: (0, 0, 0)),   # C per gate (batched)
                pl.BlockSpec((3, H, H), lambda i: (0, 0, 0)),    # Whh per gate
                pl.BlockSpec((1, H), lambda i: (0, 0)),          # b_hh[n]
                pl.BlockSpec((4 * BN, BN), lambda i: (0, 0)),    # [Pf;Pf^2;Pb;Pb^2] blkdiag
                pl.BlockSpec((5, H, O), lambda i: (0, 0, 0)),    # filter@decoder per tap
                pl.BlockSpec((1, O), lambda i: (0, 0)),          # folded bias
            ],
            out_specs=pl.BlockSpec((BN, O), lambda i: (0, 0)),
            scratch_shapes=[pltpu.VMEM((TBN, H), jnp.float32)] * 3,
        ),
        compiler_params=pltpu.CompilerParams(
            dimension_semantics=("arbitrary",)),
    )(x_flat, wx3, c3b, whh3, b_hn, p_stack, wfd5, bfd)


# ---------------------------------------------------------------------------
# Host-side glue (tiny, one-time per call)
# ---------------------------------------------------------------------------
def dense_transition_matrices(edge_index, edge_weight, n_nodes):
    # TODO(synk): data-dependent scatter-add has no clean BlockSpec form; done in XLA.
    adj = jnp.zeros((n_nodes, n_nodes), jnp.float32)
    adj = adj.at[edge_index[0], edge_index[1]].add(edge_weight)

    def row_norm(m):
        deg = m.sum(axis=1, keepdims=True)
        safe = jnp.where(deg > 0, deg, 1.0)
        return jnp.where(deg > 0, m / safe, 0.0)

    return row_norm(adj), row_norm(adj.T)


def fold_params(params, p_fwd, p_bwd, B, N):
    """Host-side algebra: fold encoder into GRU input projection, fold
    b_hh[r]/b_hh[z] into the constant, fold decoder into the DiffConv filters,
    precompute P^2 and build stacked block-diagonal transition matrices."""
    H = params["w_enc"].shape[1]
    dot = lambda a, b: jnp.dot(a, b, precision=HIGHEST)

    # encoder + node-emb folded into GRU input projection
    w_ih = params["w_ih"]                                   # (H, 3H)
    wx = dot(params["w_enc"], w_ih)                         # (F, 3H)
    c = dot(params["node_emb"] + params["b_enc"], w_ih) + params["b_ih"]  # (N, 3H)

    def split3(m):
        return jnp.stack(jnp.split(m, 3, axis=-1), axis=0)

    wx3 = split3(wx)                          # (3, F, H)
    c3 = split3(c)                            # (3, N, H)
    whh3 = split3(params["w_hh"])             # (3, H, H)
    bhh3 = split3(params["b_hh"])             # (3, 1, H)

    # fold b_hh[r], b_hh[z] (only ever summed into the sigmoid args);
    # b_hh[n] must stay inside r*(W_hn h + b_hn) per torch GRUCell semantics.
    c3 = c3.at[0].add(bhh3[0])
    c3 = c3.at[1].add(bhh3[1])
    b_hn = bhh3[2]                            # (1, H)

    # tile the per-node constant over the merged batch rows (b*N + n ordering)
    c3b = jnp.tile(c3, (1, B, 1))             # (3, B*N, H)

    # block-diagonal transition matrices + precomputed squares, stacked:
    # rows [Pf | Pf^2 | Pb | Pb^2], each (B*N, B*N)
    eye_b = jnp.eye(B, dtype=jnp.float32)
    pf2 = dot(p_fwd, p_fwd)
    pb2 = dot(p_bwd, p_bwd)
    p_stack = jnp.concatenate(
        [jnp.kron(eye_b, m) for m in (p_fwd, pf2, p_bwd, pb2)], axis=0)  # (4BN, BN)

    # decoder folded into DiffConv filters (exact: no nonlinearity between them)
    wf5 = params["w_filt"].reshape(5, H, H)                 # (5, H, H)
    wfd5 = jnp.einsum("khi,io->kho", wf5, params["w_dec"],
                      precision=HIGHEST)                    # (5, H, O)
    bfd = dot(params["b_filt"], params["w_dec"]) + params["b_dec"]  # (1, O)

    return wx3, c3b, whh3, b_hn, p_stack, wfd5, bfd


def time_then_space_forward(params, x, edge_index, edge_weight, horizon):
    B, T, N, F = x.shape
    p_fwd, p_bwd = dense_transition_matrices(edge_index, edge_weight, N)
    folded = fold_params(params, p_fwd, p_bwd, B, N)
    # merge batch into the matmul row dimension: rows ordered (t, b, n)
    x_flat = x.transpose(1, 0, 2, 3).reshape(T * B * N, F)
    y = fused_forward(x_flat, *folded)                      # (B*N, O)
    # rearrange 'b n (t f) -> b t n f'
    return y.reshape(B, N, horizon, F).transpose(0, 2, 1, 3)


# ---------------------------------------------------------------------------
# Pure-JAX reference (unfused), for correctness check
# ---------------------------------------------------------------------------
def reference_forward(params, x, edge_index, edge_weight, horizon):
    B, T, N, F = x.shape
    H = params["w_enc"].shape[1]
    p_fwd, p_bwd = dense_transition_matrices(edge_index, edge_weight, N)
    dot = lambda a, b: jnp.dot(a, b, precision=HIGHEST)

    x_emb = dot(x, params["w_enc"]) + params["b_enc"] + params["node_emb"]
    h = jnp.zeros((B, N, H), jnp.float32)
    for t in range(T):
        gi = dot(x_emb[:, t], params["w_ih"]) + params["b_ih"]
        gh = dot(h, params["w_hh"]) + params["b_hh"]
        r = jax.nn.sigmoid(gi[..., 0:H] + gh[..., 0:H])
        z = jax.nn.sigmoid(gi[..., H:2 * H] + gh[..., H:2 * H])
        n = jnp.tanh(gi[..., 2 * H:] + r * gh[..., 2 * H:])
        h = (1.0 - z) * n + z * h
    d1 = jnp.einsum("ij,bjh->bih", p_fwd, h, precision=HIGHEST)
    d2 = jnp.einsum("ij,bjh->bih", p_fwd, d1, precision=HIGHEST)
    d3 = jnp.einsum("ij,bjh->bih", p_bwd, h, precision=HIGHEST)
    d4 = jnp.einsum("ij,bjh->bih", p_bwd, d3, precision=HIGHEST)
    cat = jnp.concatenate([h, d1, d2, d3, d4], axis=-1)
    zf = dot(cat, params["w_filt"]) + params["b_filt"]
    y = dot(zf, params["w_dec"]) + params["b_dec"]
    return y.reshape(B, N, horizon, F).transpose(0, 2, 1, 3)


def init_params(key, input_size, n_nodes, hidden_size, horizon):
    ks = jax.random.split(key, 10)
    s = 0.1
    H, F = hidden_size, input_size
    return {
        "w_enc": s * jax.random.normal(ks[0], (F, H), jnp.float32),
        "b_enc": s * jax.random.normal(ks[1], (1, H), jnp.float32),
        "node_emb": s * jax.random.normal(ks[2], (n_nodes, H), jnp.float32),
        "w_ih": s * jax.random.normal(ks[3], (H, 3 * H), jnp.float32),
        "w_hh": s * jax.random.normal(ks[4], (H, 3 * H), jnp.float32),
        "b_ih": s * jax.random.normal(ks[5], (1, 3 * H), jnp.float32),
        "b_hh": s * jax.random.normal(ks[6], (1, 3 * H), jnp.float32),
        # DiffConv: n_filters = root(1) + k*2 = 5
        "w_filt": s * jax.random.normal(ks[7], (5 * H, H), jnp.float32),
        "b_filt": s * jax.random.normal(ks[8], (1, H), jnp.float32),
        "w_dec": s * jax.random.normal(ks[9], (H, F * horizon), jnp.float32),
        "b_dec": jnp.zeros((1, F * horizon), jnp.float32),
    }


if __name__ == "__main__":
    B, T, N, F = 2, 8, 16, 3          # batch, time, nodes, features
    H, HORIZON = 32, 4

    key = jax.random.PRNGKey(0)
    k_x, k_p = jax.random.split(key)

    x = jax.random.normal(k_x, (B, T, N, F), jnp.float32)

    # deterministic small directed graph: ring + skip-3 edges
    src = jnp.arange(N, dtype=jnp.int32)
    ring = jnp.stack([src, (src + 1) % N])
    skip = jnp.stack([src, (src + 3) % N])
    edge_index = jnp.concatenate([ring, skip], axis=1)        # (2, 2N)
    edge_weight = jnp.ones((edge_index.shape[1],), jnp.float32)

    params = init_params(k_p, F, N, H, HORIZON)

    fwd = jax.jit(lambda p, xx: time_then_space_forward(
        p, xx, edge_index, edge_weight, HORIZON))
    out = fwd(params, x)
    jax.block_until_ready(out)
    assert out.shape == (B, HORIZON, N, F), out.shape

    ref = reference_forward(params, x, edge_index, edge_weight, HORIZON)
    err = float(jnp.max(jnp.abs(out - ref)))
    assert np.isfinite(err) and err < 5e-3, f"max abs err {err}"

    print("KERNEL_OK")
</pallas_src>

<mosaic_0001>
module attributes {stable_mosaic.version = 11 : i64} {
  func.func @fused_kernel(%arg0: i32, %arg1: memref<256x3xf32, #tpu.memory_space<vmem>>, %arg2: memref<3x3x32xf32, #tpu.memory_space<vmem>>, %arg3: memref<3x32x32xf32, #tpu.memory_space<vmem>>, %arg4: memref<3x32x32xf32, #tpu.memory_space<vmem>>, %arg5: memref<1x32xf32, #tpu.memory_space<vmem>>, %arg6: memref<128x32xf32, #tpu.memory_space<vmem>>, %arg7: memref<5x32x12xf32, #tpu.memory_space<vmem>>, %arg8: memref<1x12xf32, #tpu.memory_space<vmem>>, %arg9: memref<32x12xf32, #tpu.memory_space<vmem>>, %arg10: memref<256x32xf32, #tpu.memory_space<vmem>>, %arg11: memref<256x32xf32, #tpu.memory_space<vmem>>, %arg12: memref<256x32xf32, #tpu.memory_space<vmem>>) attributes {dimension_semantics = [#tpu.dimension_semantics<arbitrary>], iteration_bounds = array<i64: 1>, scalar_prefetch = 0 : i64, scratch_operands = 3 : i64, tpu.core_type = #tpu.core_type<tc>, window_params = [{pipeline_mode = #tpu.pipeline_mode<synchronous>, transform_indices = @transform_0, window_bounds = array<i64: 256, 3>}, {pipeline_mode = #tpu.pipeline_mode<synchronous>, transform_indices = @transform_1, window_bounds = array<i64: 3, 3, 32>}, {pipeline_mode = #tpu.pipeline_mode<synchronous>, transform_indices = @transform_2, window_bounds = array<i64: 3, 32, 32>}, {pipeline_mode = #tpu.pipeline_mode<synchronous>, transform_indices = @transform_3, window_bounds = array<i64: 3, 32, 32>}, {pipeline_mode = #tpu.pipeline_mode<synchronous>, transform_indices = @transform_4, window_bounds = array<i64: 1, 32>}, {pipeline_mode = #tpu.pipeline_mode<synchronous>, transform_indices = @transform_5, window_bounds = array<i64: 128, 32>}, {pipeline_mode = #tpu.pipeline_mode<synchronous>, transform_indices = @transform_6, window_bounds = array<i64: 5, 32, 12>}, {pipeline_mode = #tpu.pipeline_mode<synchronous>, transform_indices = @transform_7, window_bounds = array<i64: 1, 12>}, {pipeline_mode = #tpu.pipeline_mode<synchronous>, transform_indices = @transform_8, window_bounds = array<i64: 32, 12>}]} {
    %c0 = arith.constant 0 : index
    %c0_0 = arith.constant 0 : index
    %0 = vector.load %arg1[%c0, %c0_0] : memref<256x3xf32, #tpu.memory_space<vmem>>, vector<256x3xf32>
    %c0_1 = arith.constant 0 : index
    %c0_2 = arith.constant 0 : index
    %c0_3 = arith.constant 0 : index
    %1 = vector.load %arg2[%c0_1, %c0_2, %c0_3] : memref<3x3x32xf32, #tpu.memory_space<vmem>>, vector<1x3x32xf32>
    %2 = vector.shape_cast %1 : vector<1x3x32xf32> to vector<3x32xf32>
    %cst = arith.constant dense<0.000000e+00> : vector<256x32xf32>
    %3 = tpu.matmul %0, %2, %cst {dimension_numbers = #tpu.dot_dimension_numbers<[1], [0], [0], [1], [0, 0, 1, 1], [], []>} : vector<256x3xf32>, vector<3x32xf32>, vector<256x32xf32> -> vector<256x32xf32>
    %c0_4 = arith.constant 0 : index
    %c0_5 = arith.constant 0 : index
    %4 = vector.load %arg10[%c0_4, %c0_5] : memref<256x32xf32, #tpu.memory_space<vmem>>, vector<256x32xf32>
    tpu.vector_store %arg10[%c0_4, %c0_5], %3 {strides = array<i32>} : memref<256x32xf32, #tpu.memory_space<vmem>>, vector<256x32xf32>,
    %c1 = arith.constant 1 : index
    %c0_6 = arith.constant 0 : index
    %c0_7 = arith.constant 0 : index
    %5 = vector.load %arg2[%c1, %c0_6, %c0_7] : memref<3x3x32xf32, #tpu.memory_space<vmem>>, vector<1x3x32xf32>
    %6 = vector.shape_cast %5 : vector<1x3x32xf32> to vector<3x32xf32>
    %cst_8 = arith.constant dense<0.000000e+00> : vector<256x32xf32>
    %7 = tpu.matmul %0, %6, %cst_8 {dimension_numbers = #tpu.dot_dimension_numbers<[1], [0], [0], [1], [0, 0, 1, 1], [], []>} : vector<256x3xf32>, vector<3x32xf32>, vector<256x32xf32> -> vector<256x32xf32>
    %c0_9 = arith.constant 0 : index
    %c0_10 = arith.constant 0 : index
    %8 = vector.load %arg11[%c0_9, %c0_10] : memref<256x32xf32, #tpu.memory_space<vmem>>, vector<256x32xf32>
    tpu.vector_store %arg11[%c0_9, %c0_10], %7 {strides = array<i32>} : memref<256x32xf32, #tpu.memory_space<vmem>>, vector<256x32xf32>,
    %c2 = arith.constant 2 : index
    %c0_11 = arith.constant 0 : index
    %c0_12 = arith.constant 0 : index
    %9 = vector.load %arg2[%c2, %c0_11, %c0_12] : memref<3x3x32xf32, #tpu.memory_space<vmem>>, vector<1x3x32xf32>
    %10 = vector.shape_cast %9 : vector<1x3x32xf32> to vector<3x32xf32>
    %cst_13 = arith.constant dense<0.000000e+00> : vector<256x32xf32>
    %11 = tpu.matmul %0, %10, %cst_13 {dimension_numbers = #tpu.dot_dimension_numbers<[1], [0], [0], [1], [0, 0, 1, 1], [], []>} : vector<256x3xf32>, vector<3x32xf32>, vector<256x32xf32> -> vector<256x32xf32>
    %c0_14 = arith.constant 0 : index
    %c0_15 = arith.constant 0 : index
    %12 = vector.load %arg12[%c0_14, %c0_15] : memref<256x32xf32, #tpu.memory_space<vmem>>, vector<256x32xf32>
    tpu.vector_store %arg12[%c0_14, %c0_15], %11 {strides = array<i32>} : memref<256x32xf32, #tpu.memory_space<vmem>>, vector<256x32xf32>,
    %c0_16 = arith.constant 0 : index
    %c0_17 = arith.constant 0 : index
    %c0_18 = arith.constant 0 : index
    %13 = vector.load %arg3[%c0_16, %c0_17, %c0_18] : memref<3x32x32xf32, #tpu.memory_space<vmem>>, vector<1x32x32xf32>
    %14 = vector.shape_cast %13 : vector<1x32x32xf32> to vector<32x32xf32>
    %c1_19 = arith.constant 1 : index
    %c0_20 = arith.constant 0 : index
    %c0_21 = arith.constant 0 : index
    %15 = vector.load %arg3[%c1_19, %c0_20, %c0_21] : memref<3x32x32xf32, #tpu.memory_space<vmem>>, vector<1x32x32xf32>
    %16 = vector.shape_cast %15 : vector<1x32x32xf32> to vector<32x32xf32>
    %c2_22 = arith.constant 2 : index
    %c0_23 = arith.constant 0 : index
    %c0_24 = arith.constant 0 : index
    %17 = vector.load %arg3[%c2_22, %c0_23, %c0_24] : memref<3x32x32xf32, #tpu.memory_space<vmem>>, vector<1x32x32xf32>
    %18 = vector.shape_cast %17 : vector<1x32x32xf32> to vector<32x32xf32>
    %c0_25 = arith.constant 0 : index
    %c0_26 = arith.constant 0 : index
    %c0_27 = arith.constant 0 : index
    %19 = vector.load %arg4[%c0_25, %c0_26, %c0_27] : memref<3x32x32xf32, #tpu.memory_space<vmem>>, vector<1x32x32xf32>
    %20 = vector.shape_cast %19 : vector<1x32x32xf32> to vector<32x32xf32>
    %c1_28 = arith.constant 1 : index
    %c0_29 = arith.constant 0 : index
    %c0_30 = arith.constant 0 : index
    %21 = vector.load %arg4[%c1_28, %c0_29, %c0_30] : memref<3x32x32xf32, #tpu.memory_space<vmem>>, vector<1x32x32xf32>
    %22 = vector.shape_cast %21 : vector<1x32x32xf32> to vector<32x32xf32>
    %c2_31 = arith.constant 2 : index
    %c0_32 = arith.constant 0 : index
    %c0_33 = arith.constant 0 : index
    %23 = vector.load %arg4[%c2_31, %c0_32, %c0_33] : memref<3x32x32xf32, #tpu.memory_space<vmem>>, vector<1x32x32xf32>
    %24 = vector.shape_cast %23 : vector<1x32x32xf32> to vector<32x32xf32>
    %c0_34 = arith.constant 0 : index
    %c0_35 = arith.constant 0 : index
    %25 = vector.load %arg5[%c0_34, %c0_35] : memref<1x32xf32, #tpu.memory_space<vmem>>, vector<1x32xf32>
    %cst_36 = arith.constant 0.000000e+00 : f32
    %26 = vector.broadcast %cst_36 : f32 to vector<32x32xf32>
    %c0_37 = arith.constant 0 : index
    %c0_38 = arith.constant 0 : index
    %27 = vector.load %arg10[%c0_37, %c0_38] : memref<256x32xf32, #tpu.memory_space<vmem>>, vector<32x32xf32>
    %28 = arith.addf %27, %14 : vector<32x32xf32>
    %c0_39 = arith.constant 0 : index
    %c0_40 = arith.constant 0 : index
    %29 = vector.load %arg11[%c0_39, %c0_40] : memref<256x32xf32, #tpu.memory_space<vmem>>, vector<32x32xf32>
    %30 = arith.addf %29, %16 : vector<32x32xf32>
    %c0_41 = arith.constant 0 : index
    %c0_42 = arith.constant 0 : index
    %31 = vector.load %arg12[%c0_41, %c0_42] : memref<256x32xf32, #tpu.memory_space<vmem>>, vector<32x32xf32>
    %32 = arith.addf %31, %18 : vector<32x32xf32>
    %cst_43 = arith.constant dense<0.000000e+00> : vector<32x32xf32>
    %33 = tpu.matmul %26, %20, %cst_43 {dimension_numbers = #tpu.dot_dimension_numbers<[1], [0], [0], [1], [0, 0, 1, 1], [], []>} : vector<32x32xf32>, vector<32x32xf32>, vector<32x32xf32> -> vector<32x32xf32>
    %cst_44 = arith.constant dense<0.000000e+00> : vector<32x32xf32>
    %34 = tpu.matmul %26, %22, %cst_44 {dimension_numbers = #tpu.dot_dimension_numbers<[1], [0], [0], [1], [0, 0, 1, 1], [], []>} : vector<32x32xf32>, vector<32x32xf32>, vector<32x32xf32> -> vector<32x32xf32>
    %cst_45 = arith.constant dense<0.000000e+00> : vector<32x32xf32>
    %35 = tpu.matmul %26, %24, %cst_45 {dimension_numbers = #tpu.dot_dimension_numbers<[1], [0], [0], [1], [0, 0, 1, 1], [], []>} : vector<32x32xf32>, vector<32x32xf32>, vector<32x32xf32> -> vector<32x32xf32>
    %36 = vector.broadcast %25 : vector<1x32xf32> to vector<32x32xf32>
    %37 = arith.addf %35, %36 : vector<32x32xf32>
    %38 = arith.addf %28, %33 : vector<32x32xf32>
    %39 = arith.negf %38 : vector<32x32xf32>
    %40 = math.exp %39 : vector<32x32xf32>
    %cst_46 = arith.constant 1.000000e+00 : f32
    %41 = vector.broadcast %cst_46 : f32 to vector<32x32xf32>
    %42 = arith.addf %41, %40 : vector<32x32xf32>
    %43 = arith.divf %41, %42 : vector<32x32xf32>
    %44 = arith.addf %30, %34 : vector<32x32xf32>
    %45 = arith.negf %44 : vector<32x32xf32>
    %46 = math.exp %45 : vector<32x32xf32>
    %cst_47 = arith.constant 1.000000e+00 : f32
    %47 = vector.broadcast %cst_47 : f32 to vector<32x32xf32>
    %48 = arith.addf %47, %46 : vector<32x32xf32>
    %49 = arith.divf %47, %48 : vector<32x32xf32>
    %50 = arith.mulf %43, %37 : vector<32x32xf32>
    %51 = arith.addf %32, %50 : vector<32x32xf32>
    %52 = math.tanh %51 : vector<32x32xf32>
    %cst_48 = arith.constant 1.000000e+00 : f32
    %53 = vector.broadcast %cst_48 : f32 to vector<32x32xf32>
    %54 = arith.subf %53, %49 : vector<32x32xf32>
    %55 = arith.mulf %54, %52 : vector<32x32xf32>
    %56 = arith.mulf %49, %26 : vector<32x32xf32>
    %57 = arith.addf %55, %56 : vector<32x32xf32>
    %c32 = arith.constant 32 : index
    %c0_49 = arith.constant 0 : index
    %58 = vector.load %arg10[%c32, %c0_49] : memref<256x32xf32, #tpu.memory_space<vmem>>, vector<32x32xf32>
    %59 = arith.addf %58, %14 : vector<32x32xf32>
    %c32_50 = arith.constant 32 : index
    %c0_51 = arith.constant 0 : index
    %60 = vector.load %arg11[%c32_50, %c0_51] : memref<256x32xf32, #tpu.memory_space<vmem>>, vector<32x32xf32>
    %61 = arith.addf %60, %16 : vector<32x32xf32>
    %c32_52 = arith.constant 32 : index
    %c0_53 = arith.constant 0 : index
    %62 = vector.load %arg12[%c32_52, %c0_53] : memref<256x32xf32, #tpu.memory_space<vmem>>, vector<32x32xf32>
    %63 = arith.addf %62, %18 : vector<32x32xf32>
    %cst_54 = arith.constant dense<0.000000e+00> : vector<32x32xf32>
    %64 = tpu.matmul %57, %20, %cst_54 {dimension_numbers = #tpu.dot_dimension_numbers<[1], [0], [0], [1], [0, 0, 1, 1], [], []>} : vector<32x32xf32>, vector<32x32xf32>, vector<32x32xf32> -> vector<32x32xf32>
    %cst_55 = arith.constant dense<0.000000e+00> : vector<32x32xf32>
    %65 = tpu.matmul %57, %22, %cst_55 {dimension_numbers = #tpu.dot_dimension_numbers<[1], [0], [0], [1], [0, 0, 1, 1], [], []>} : vector<32x32xf32>, vector<32x32xf32>, vector<32x32xf32> -> vector<32x32xf32>
    %cst_56 = arith.constant dense<0.000000e+00> : vector<32x32xf32>
    %66 = tpu.matmul %57, %24, %cst_56 {dimension_numbers = #tpu.dot_dimension_numbers<[1], [0], [0], [1], [0, 0, 1, 1], [], []>} : vector<32x32xf32>, vector<32x32xf32>, vector<32x32xf32> -> vector<32x32xf32>
    %67 = vector.broadcast %25 : vector<1x32xf32> to vector<32x32xf32>
    %68 = arith.addf %66, %67 : vector<32x32xf32>
    %69 = arith.addf %59, %64 : vector<32x32xf32>
    %70 = arith.negf %69 : vector<32x32xf32>
    %71 = math.exp %70 : vector<32x32xf32>
    %cst_57 = arith.constant 1.000000e+00 : f32
    %72 = vector.broadcast %cst_57 : f32 to vector<32x32xf32>
    %73 = arith.addf %72, %71 : vector<32x32xf32>
    %74 = arith.divf %72, %73 : vector<32x32xf32>
    %75 = arith.addf %61, %65 : vector<32x32xf32>
    %76 = arith.negf %75 : vector<32x32xf32>
    %77 = math.exp %76 : vector<32x32xf32>
    %cst_58 = arith.constant 1.000000e+00 : f32
    %78 = vector.broadcast %cst_58 : f32 to vector<32x32xf32>
    %79 = arith.addf %78, %77 : vector<32x32xf32>
    %80 = arith.divf %78, %79 : vector<32x32xf32>
    %81 = arith.mulf %74, %68 : vector<32x32xf32>
    %82 = arith.addf %63, %81 : vector<32x32xf32>
    %83 = math.tanh %82 : vector<32x32xf32>
    %cst_59 = arith.constant 1.000000e+00 : f32
    %84 = vector.broadcast %cst_59 : f32 to vector<32x32xf32>
    %85 = arith.subf %84, %80 : vector<32x32xf32>
    %86 = arith.mulf %85, %83 : vector<32x32xf32>
    %87 = arith.mulf %80, %57 : vector<32x32xf32>
    %88 = arith.addf %86, %87 : vector<32x32xf32>
    %c64 = arith.constant 64 : index
    %c0_60 = arith.constant 0 : index
    %89 = vector.load %arg10[%c64, %c0_60] : memref<256x32xf32, #tpu.memory_space<vmem>>, vector<32x32xf32>
    %90 = arith.addf %89, %14 : vector<32x32xf32>
    %c64_61 = arith.constant 64 : index
    %c0_62 = arith.constant 0 : index
    %91 = vector.load %arg11[%c64_61, %c0_62] : memref<256x32xf32, #tpu.memory_space<vmem>>, vector<32x32xf32>
    %92 = arith.addf %91, %16 : vector<32x32xf32>
    %c64_63 = arith.constant 64 : index
    %c0_64 = arith.constant 0 : index
    %93 = vector.load %arg12[%c64_63, %c0_64] : memref<256x32xf32, #tpu.memory_space<vmem>>, vector<32x32xf32>
    %94 = arith.addf %93, %18 : vector<32x32xf32>
    %cst_65 = arith.constant dense<0.000000e+00> : vector<32x32xf32>
    %95 = tpu.matmul %88, %20, %cst_65 {dimension_numbers = #tpu.dot_dimension_numbers<[1], [0], [0], [1], [0, 0, 1, 1], [], []>} : vector<32x32xf32>, vector<32x32xf32>, vector<32x32xf32> -> vector<32x32xf32>
    %cst_66 = arith.constant dense<0.000000e+00> : vector<32x32xf32>
    %96 = tpu.matmul %88, %22, %cst_66 {dimension_numbers = #tpu.dot_dimension_numbers<[1], [0], [0], [1], [0, 0, 1, 1], [], []>} : vector<32x32xf32>, vector<32x32xf32>, vector<32x32xf32> -> vector<32x32xf32>
    %cst_67 = arith.constant dense<0.000000e+00> : vector<32x32xf32>
    %97 = tpu.matmul %88, %24, %cst_67 {dimension_numbers = #tpu.dot_dimension_numbers<[1], [0], [0], [1], [0, 0, 1, 1], [], []>} : vector<32x32xf32>, vector<32x32xf32>, vector<32x32xf32> -> vector<32x32xf32>
    %98 = vector.broadcast %25 : vector<1x32xf32> to vector<32x32xf32>
    %99 = arith.addf %97, %98 : vector<32x32xf32>
    %100 = arith.addf %90, %95 : vector<32x32xf32>
    %101 = arith.negf %100 : vector<32x32xf32>
    %102 = math.exp %101 : vector<32x32xf32>
    %cst_68 = arith.constant 1.000000e+00 : f32
    %103 = vector.broadcast %cst_68 : f32 to vector<32x32xf32>
    %104 = arith.addf %103, %102 : vector<32x32xf32>
    %105 = arith.divf %103, %104 : vector<32x32xf32>
    %106 = arith.addf %92, %96 : vector<32x32xf32>
    %107 = arith.negf %106 : vector<32x32xf32>
    %108 = math.exp %107 : vector<32x32xf32>
    %cst_69 = arith.constant 1.000000e+00 : f32
    %109 = vector.broadcast %cst_69 : f32 to vector<32x32xf32>
    %110 = arith.addf %109, %108 : vector<32x32xf32>
    %111 = arith.divf %109, %110 : vector<32x32xf32>
    %112 = arith.mulf %105, %99 : vector<32x32xf32>
    %113 = arith.addf %94, %112 : vector<32x32xf32>
    %114 = math.tanh %113 : vector<32x32xf32>
    %cst_70 = arith.constant 1.000000e+00 : f32
    %115 = vector.broadcast %cst_70 : f32 to vector<32x32xf32>
    %116 = arith.subf %115, %111 : vector<32x32xf32>
    %117 = arith.mulf %116, %114 : vector<32x32xf32>
    %118 = arith.mulf %111, %88 : vector<32x32xf32>
    %119 = arith.addf %117, %118 : vector<32x32xf32>
    %c96 = arith.constant 96 : index
    %c0_71 = arith.constant 0 : index
    %120 = vector.load %arg10[%c96, %c0_71] : memref<256x32xf32, #tpu.memory_space<vmem>>, vector<32x32xf32>
    %121 = arith.addf %120, %14 : vector<32x32xf32>
    %c96_72 = arith.constant 96 : index
    %c0_73 = arith.constant 0 : index
    %122 = vector.load %arg11[%c96_72, %c0_73] : memref<256x32xf32, #tpu.memory_space<vmem>>, vector<32x32xf32>
    %123 = arith.addf %122, %16 : vector<32x32xf32>
    %c96_74 = arith.constant 96 : index
    %c0_75 = arith.constant 0 : index
    %124 = vector.load %arg12[%c96_74, %c0_75] : memref<256x32xf32, #tpu.memory_space<vmem>>, vector<32x32xf32>
    %125 = arith.addf %124, %18 : vector<32x32xf32>
    %cst_76 = arith.constant dense<0.000000e+00> : vector<32x32xf32>
    %126 = tpu.matmul %119, %20, %cst_76 {dimension_numbers = #tpu.dot_dimension_numbers<[1], [0], [0], [1], [0, 0, 1, 1], [], []>} : vector<32x32xf32>, vector<32x32xf32>, vector<32x32xf32> -> vector<32x32xf32>
    %cst_77 = arith.constant dense<0.000000e+00> : vector<32x32xf32>
    %127 = tpu.matmul %119, %22, %cst_77 {dimension_numbers = #tpu.dot_dimension_numbers<[1], [0], [0], [1], [0, 0, 1, 1], [], []>} : vector<32x32xf32>, vector<32x32xf32>, vector<32x32xf32> -> vector<32x32xf32>
    %cst_78 = arith.constant dense<0.000000e+00> : vector<32x32xf32>
    %128 = tpu.matmul %119, %24, %cst_78 {dimension_numbers = #tpu.dot_dimension_numbers<[1], [0], [0], [1], [0, 0, 1, 1], [], []>} : vector<32x32xf32>, vector<32x32xf32>, vector<32x32xf32> -> vector<32x32xf32>
    %129 = vector.broadcast %25 : vector<1x32xf32> to vector<32x32xf32>
    %130 = arith.addf %128, %129 : vector<32x32xf32>
    %131 = arith.addf %121, %126 : vector<32x32xf32>
    %132 = arith.negf %131 : vector<32x32xf32>
    %133 = math.exp %132 : vector<32x32xf32>
    %cst_79 = arith.constant 1.000000e+00 : f32
    %134 = vector.broadcast %cst_79 : f32 to vector<32x32xf32>
    %135 = arith.addf %134, %133 : vector<32x32xf32>
    %136 = arith.divf %134, %135 : vector<32x32xf32>
    %137 = arith.addf %123, %127 : vector<32x32xf32>
    %138 = arith.negf %137 : vector<32x32xf32>
    %139 = math.exp %138 : vector<32x32xf32>
    %cst_80 = arith.constant 1.000000e+00 : f32
    %140 = vector.broadcast %cst_80 : f32 to vector<32x32xf32>
    %141 = arith.addf %140, %139 : vector<32x32xf32>
    %142 = arith.divf %140, %141 : vector<32x32xf32>
    %143 = arith.mulf %136, %130 : vector<32x32xf32>
    %144 = arith.addf %125, %143 : vector<32x32xf32>
    %145 = math.tanh %144 : vector<32x32xf32>
    %cst_81 = arith.constant 1.000000e+00 : f32
    %146 = vector.broadcast %cst_81 : f32 to vector<32x32xf32>
    %147 = arith.subf %146, %142 : vector<32x32xf32>
    %148 = arith.mulf %147, %145 : vector<32x32xf32>
    %149 = arith.mulf %142, %119 : vector<32x32xf32>
    %150 = arith.addf %148, %149 : vector<32x32xf32>
    %c128 = arith.constant 128 : index
    %c0_82 = arith.constant 0 : index
    %151 = vector.load %arg10[%c128, %c0_82] : memref<256x32xf32, #tpu.memory_space<vmem>>, vector<32x32xf32>
    %152 = arith.addf %151, %14 : vector<32x32xf32>
    %c128_83 = arith.constant 128 : index
    %c0_84 = arith.constant 0 : index
    %153 = vector.load %arg11[%c128_83, %c0_84] : memref<256x32xf32, #tpu.memory_space<vmem>>, vector<32x32xf32>
    %154 = arith.addf %153, %16 : vector<32x32xf32>
    %c128_85 = arith.constant 128 : index
    %c0_86 = arith.constant 0 : index
    %155 = vector.load %arg12[%c128_85, %c0_86] : memref<256x32xf32, #tpu.memory_space<vmem>>, vector<32x32xf32>
    %156 = arith.addf %155, %18 : vector<32x32xf32>
    %cst_87 = arith.constant dense<0.000000e+00> : vector<32x32xf32>
    %157 = tpu.matmul %150, %20, %cst_87 {dimension_numbers = #tpu.dot_dimension_numbers<[1], [0], [0], [1], [0, 0, 1, 1], [], []>} : vector<32x32xf32>, vector<32x32xf32>, vector<32x32xf32> -> vector<32x32xf32>
    %cst_88 = arith.constant dense<0.000000e+00> : vector<32x32xf32>
    %158 = tpu.matmul %150, %22, %cst_88 {dimension_numbers = #tpu.dot_dimension_numbers<[1], [0], [0], [1], [0, 0, 1, 1], [], []>} : vector<32x32xf32>, vector<32x32xf32>, vector<32x32xf32> -> vector<32x32xf32>
    %cst_89 = arith.constant dense<0.000000e+00> : vector<32x32xf32>
    %159 = tpu.matmul %150, %24, %cst_89 {dimension_numbers = #tpu.dot_dimension_numbers<[1], [0], [0], [1], [0, 0, 1, 1], [], []>} : vector<32x32xf32>, vector<32x32xf32>, vector<32x32xf32> -> vector<32x32xf32>
    %160 = vector.broadcast %25 : vector<1x32xf32> to vector<32x32xf32>
    %161 = arith.addf %159, %160 : vector<32x32xf32>
    %162 = arith.addf %152, %157 : vector<32x32xf32>
    %163 = arith.negf %162 : vector<32x32xf32>
    %164 = math.exp %163 : vector<32x32xf32>
    %cst_90 = arith.constant 1.000000e+00 : f32
    %165 = vector.broadcast %cst_90 : f32 to vector<32x32xf32>
    %166 = arith.addf %165, %164 : vector<32x32xf32>
    %167 = arith.divf %165, %166 : vector<32x32xf32>
    %168 = arith.addf %154, %158 : vector<32x32xf32>
    %169 = arith.negf %168 : vector<32x32xf32>
    %170 = math.exp %169 : vector<32x32xf32>
    %cst_91 = arith.constant 1.000000e+00 : f32
    %171 = vector.broadcast %cst_91 : f32 to vector<32x32xf32>
    %172 = arith.addf %171, %170 : vector<32x32xf32>
    %173 = arith.divf %171, %172 : vector<32x32xf32>
    %174 = arith.mulf %167, %161 : vector<32x32xf32>
    %175 = arith.addf %156, %174 : vector<32x32xf32>
    %176 = math.tanh %175 : vector<32x32xf32>
    %cst_92 = arith.constant 1.000000e+00 : f32
    %177 = vector.broadcast %cst_92 : f32 to vector<32x32xf32>
    %178 = arith.subf %177, %173 : vector<32x32xf32>
    %179 = arith.mulf %178, %176 : vector<32x32xf32>
    %180 = arith.mulf %173, %150 : vector<32x32xf32>
    %181 = arith.addf %179, %180 : vector<32x32xf32>
    %c160 = arith.constant 160 : index
    %c0_93 = arith.constant 0 : index
    %182 = vector.load %arg10[%c160, %c0_93] : memref<256x32xf32, #tpu.memory_space<vmem>>, vector<32x32xf32>
    %183 = arith.addf %182, %14 : vector<32x32xf32>
    %c160_94 = arith.constant 160 : index
    %c0_95 = arith.constant 0 : index
    %184 = vector.load %arg11[%c160_94, %c0_95] : memref<256x32xf32, #tpu.memory_space<vmem>>, vector<32x32xf32>
    %185 = arith.addf %184, %16 : vector<32x32xf32>
    %c160_96 = arith.constant 160 : index
    %c0_97 = arith.constant 0 : index
    %186 = vector.load %arg12[%c160_96, %c0_97] : memref<256x32xf32, #tpu.memory_space<vmem>>, vector<32x32xf32>
    %187 = arith.addf %186, %18 : vector<32x32xf32>
    %cst_98 = arith.constant dense<0.000000e+00> : vector<32x32xf32>
    %188 = tpu.matmul %181, %20, %cst_98 {dimension_numbers = #tpu.dot_dimension_numbers<[1], [0], [0], [1], [0, 0, 1, 1], [], []>} : vector<32x32xf32>, vector<32x32xf32>, vector<32x32xf32> -> vector<32x32xf32>
    %cst_99 = arith.constant dense<0.000000e+00> : vector<32x32xf32>
    %189 = tpu.matmul %181, %22, %cst_99 {dimension_numbers = #tpu.dot_dimension_numbers<[1], [0], [0], [1], [0, 0, 1, 1], [], []>} : vector<32x32xf32>, vector<32x32xf32>, vector<32x32xf32> -> vector<32x32xf32>
    %cst_100 = arith.constant dense<0.000000e+00> : vector<32x32xf32>
    %190 = tpu.matmul %181, %24, %cst_100 {dimension_numbers = #tpu.dot_dimension_numbers<[1], [0], [0], [1], [0, 0, 1, 1], [], []>} : vector<32x32xf32>, vector<32x32xf32>, vector<32x32xf32> -> vector<32x32xf32>
    %191 = vector.broadcast %25 : vector<1x32xf32> to vector<32x32xf32>
    %192 = arith.addf %190, %191 : vector<32x32xf32>
    %193 = arith.addf %183, %188 : vector<32x32xf32>
    %194 = arith.negf %193 : vector<32x32xf32>
    %195 = math.exp %194 : vector<32x32xf32>
    %cst_101 = arith.constant 1.000000e+00 : f32
    %196 = vector.broadcast %cst_101 : f32 to vector<32x32xf32>
    %197 = arith.addf %196, %195 : vector<32x32xf32>
    %198 = arith.divf %196, %197 : vector<32x32xf32>
    %199 = arith.addf %185, %189 : vector<32x32xf32>
    %200 = arith.negf %199 : vector<32x32xf32>
    %201 = math.exp %200 : vector<32x32xf32>
    %cst_102 = arith.constant 1.000000e+00 : f32
    %202 = vector.broadcast %cst_102 : f32 to vector<32x32xf32>
    %203 = arith.addf %202, %201 : vector<32x32xf32>
    %204 = arith.divf %202, %203 : vector<32x32xf32>
    %205 = arith.mulf %198, %192 : vector<32x32xf32>
    %206 = arith.addf %187, %205 : vector<32x32xf32>
    %207 = math.tanh %206 : vector<32x32xf32>
    %cst_103 = arith.constant 1.000000e+00 : f32
    %208 = vector.broadcast %cst_103 : f32 to vector<32x32xf32>
    %209 = arith.subf %208, %204 : vector<32x32xf32>
    %210 = arith.mulf %209, %207 : vector<32x32xf32>
    %211 = arith.mulf %204, %181 : vector<32x32xf32>
    %212 = arith.addf %210, %211 : vector<32x32xf32>
    %c192 = arith.constant 192 : index
    %c0_104 = arith.constant 0 : index
    %213 = vector.load %arg10[%c192, %c0_104] : memref<256x32xf32, #tpu.memory_space<vmem>>, vector<32x32xf32>
    %214 = arith.addf %213, %14 : vector<32x32xf32>
    %c192_105 = arith.constant 192 : index
    %c0_106 = arith.constant 0 : index
    %215 = vector.load %arg11[%c192_105, %c0_106] : memref<256x32xf32, #tpu.memory_space<vmem>>, vector<32x32xf32>
    %216 = arith.addf %215, %16 : vector<32x32xf32>
    %c192_107 = arith.constant 192 : index
    %c0_108 = arith.constant 0 : index
    %217 = vector.load %arg12[%c192_107, %c0_108] : memref<256x32xf32, #tpu.memory_space<vmem>>, vector<32x32xf32>
    %218 = arith.addf %217, %18 : vector<32x32xf32>
    %cst_109 = arith.constant dense<0.000000e+00> : vector<32x32xf32>
    %219 = tpu.matmul %212, %20, %cst_109 {dimension_numbers = #tpu.dot_dimension_numbers<[1], [0], [0], [1], [0, 0, 1, 1], [], []>} : vector<32x32xf32>, vector<32x32xf32>, vector<32x32xf32> -> vector<32x32xf32>
    %cst_110 = arith.constant dense<0.000000e+00> : vector<32x32xf32>
    %220 = tpu.matmul %212, %22, %cst_110 {dimension_numbers = #tpu.dot_dimension_numbers<[1], [0], [0], [1], [0, 0, 1, 1], [], []>} : vector<32x32xf32>, vector<32x32xf32>, vector<32x32xf32> -> vector<32x32xf32>
    %cst_111 = arith.constant dense<0.000000e+00> : vector<32x32xf32>
    %221 = tpu.matmul %212, %24, %cst_111 {dimension_numbers = #tpu.dot_dimension_numbers<[1], [0], [0], [1], [0, 0, 1, 1], [], []>} : vector<32x32xf32>, vector<32x32xf32>, vector<32x32xf32> -> vector<32x32xf32>
    %222 = vector.broadcast %25 : vector<1x32xf32> to vector<32x32xf32>
    %223 = arith.addf %221, %222 : vector<32x32xf32>
    %224 = arith.addf %214, %219 : vector<32x32xf32>
    %225 = arith.negf %224 : vector<32x32xf32>
    %226 = math.exp %225 : vector<32x32xf32>
    %cst_112 = arith.constant 1.000000e+00 : f32
    %227 = vector.broadcast %cst_112 : f32 to vector<32x32xf32>
    %228 = arith.addf %227, %226 : vector<32x32xf32>
    %229 = arith.divf %227, %228 : vector<32x32xf32>
    %230 = arith.addf %216, %220 : vector<32x32xf32>
    %231 = arith.negf %230 : vector<32x32xf32>
    %232 = math.exp %231 : vector<32x32xf32>
    %cst_113 = arith.constant 1.000000e+00 : f32
    %233 = vector.broadcast %cst_113 : f32 to vector<32x32xf32>
    %234 = arith.addf %233, %232 : vector<32x32xf32>
    %235 = arith.divf %233, %234 : vector<32x32xf32>
    %236 = arith.mulf %229, %223 : vector<32x32xf32>
    %237 = arith.addf %218, %236 : vector<32x32xf32>
    %238 = math.tanh %237 : vector<32x32xf32>
    %cst_114 = arith.constant 1.000000e+00 : f32
    %239 = vector.broadcast %cst_114 : f32 to vector<32x32xf32>
    %240 = arith.subf %239, %235 : vector<32x32xf32>
    %241 = arith.mulf %240, %238 : vector<32x32xf32>
    %242 = arith.mulf %235, %212 : vector<32x32xf32>
    %243 = arith.addf %241, %242 : vector<32x32xf32>
    %c224 = arith.constant 224 : index
    %c0_115 = arith.constant 0 : index
    %244 = vector.load %arg10[%c224, %c0_115] : memref<256x32xf32, #tpu.memory_space<vmem>>, vector<32x32xf32>
    %245 = arith.addf %244, %14 : vector<32x32xf32>
    %c224_116 = arith.constant 224 : index
    %c0_117 = arith.constant 0 : index
    %246 = vector.load %arg11[%c224_116, %c0_117] : memref<256x32xf32, #tpu.memory_space<vmem>>, vector<32x32xf32>
    %247 = arith.addf %246, %16 : vector<32x32xf32>
    %c224_118 = arith.constant 224 : index
    %c0_119 = arith.constant 0 : index
    %248 = vector.load %arg12[%c224_118, %c0_119] : memref<256x32xf32, #tpu.memory_space<vmem>>, vector<32x32xf32>
    %249 = arith.addf %248, %18 : vector<32x32xf32>
    %cst_120 = arith.constant dense<0.000000e+00> : vector<32x32xf32>
    %250 = tpu.matmul %243, %20, %cst_120 {dimension_numbers = #tpu.dot_dimension_numbers<[1], [0], [0], [1], [0, 0, 1, 1], [], []>} : vector<32x32xf32>, vector<32x32xf32>, vector<32x32xf32> -> vector<32x32xf32>
    %cst_121 = arith.constant dense<0.000000e+00> : vector<32x32xf32>
    %251 = tpu.matmul %243, %22, %cst_121 {dimension_numbers = #tpu.dot_dimension_numbers<[1], [0], [0], [1], [0, 0, 1, 1], [], []>} : vector<32x32xf32>, vector<32x32xf32>, vector<32x32xf32> -> vector<32x32xf32>
    %cst_122 = arith.constant dense<0.000000e+00> : vector<32x32xf32>
    %252 = tpu.matmul %243, %24, %cst_122 {dimension_numbers = #tpu.dot_dimension_numbers<[1], [0], [0], [1], [0, 0, 1, 1], [], []>} : vector<32x32xf32>, vector<32x32xf32>, vector<32x32xf32> -> vector<32x32xf32>
    %253 = vector.broadcast %25 : vector<1x32xf32> to vector<32x32xf32>
    %254 = arith.addf %252, %253 : vector<32x32xf32>
    %255 = arith.addf %245, %250 : vector<32x32xf32>
    %256 = arith.negf %255 : vector<32x32xf32>
    %257 = math.exp %256 : vector<32x32xf32>
    %cst_123 = arith.constant 1.000000e+00 : f32
    %258 = vector.broadcast %cst_123 : f32 to vector<32x32xf32>
    %259 = arith.addf %258, %257 : vector<32x32xf32>
    %260 = arith.divf %258, %259 : vector<32x32xf32>
    %261 = arith.addf %247, %251 : vector<32x32xf32>
    %262 = arith.negf %261 : vector<32x32xf32>
    %263 = math.exp %262 : vector<32x32xf32>
    %cst_124 = arith.constant 1.000000e+00 : f32
    %264 = vector.broadcast %cst_124 : f32 to vector<32x32xf32>
    %265 = arith.addf %264, %263 : vector<32x32xf32>
    %266 = arith.divf %264, %265 : vector<32x32xf32>
    %267 = arith.mulf %260, %254 : vector<32x32xf32>
    %268 = arith.addf %249, %267 : vector<32x32xf32>
    %269 = math.tanh %268 : vector<32x32xf32>
    %cst_125 = arith.constant 1.000000e+00 : f32
    %270 = vector.broadcast %cst_125 : f32 to vector<32x32xf32>
    %271 = arith.subf %270, %266 : vector<32x32xf32>
    %272 = arith.mulf %271, %269 : vector<32x32xf32>
    %273 = arith.mulf %266, %243 : vector<32x32xf32>
    %274 = arith.addf %272, %273 : vector<32x32xf32>
    %c0_126 = arith.constant 0 : index
    %c0_127 = arith.constant 0 : index
    %275 = vector.load %arg6[%c0_126, %c0_127] : memref<128x32xf32, #tpu.memory_space<vmem>>, vector<128x32xf32>
    %cst_128 = arith.constant dense<0.000000e+00> : vector<128x32xf32>
    %276 = tpu.matmul %275, %274, %cst_128 {dimension_numbers = #tpu.dot_dimension_numbers<[1], [0], [0], [1], [0, 0, 1, 1], [], []>} : vector<128x32xf32>, vector<32x32xf32>, vector<128x32xf32> -> vector<128x32xf32>
    %c0_129 = arith.constant 0 : index
    %c0_130 = arith.constant 0 : index
    %c0_131 = arith.constant 0 : index
    %277 = vector.load %arg7[%c0_129, %c0_130, %c0_131] : memref<5x32x12xf32, #tpu.memory_space<vmem>>, vector<1x32x12xf32>
    %278 = vector.shape_cast %277 : vector<1x32x12xf32> to vector<32x12xf32>
    %cst_132 = arith.constant dense<0.000000e+00> : vector<32x12xf32>
    %279 = tpu.matmul %274, %278, %cst_132 {dimension_numbers = #tpu.dot_dimension_numbers<[1], [0], [0], [1], [0, 0, 1, 1], [], []>} : vector<32x32xf32>, vector<32x12xf32>, vector<32x12xf32> -> vector<32x12xf32>
    %280 = vector.extract_strided_slice %276 {offsets = [0, 0], sizes = [32, 32], strides = [1, 1]} : vector<128x32xf32> to vector<32x32xf32>
    %c1_133 = arith.constant 1 : index
    %c0_134 = arith.constant 0 : index
    %c0_135 = arith.constant 0 : index
    %281 = vector.load %arg7[%c1_133, %c0_134, %c0_135] : memref<5x32x12xf32, #tpu.memory_space<vmem>>, vector<1x32x12xf32>
    %282 = vector.shape_cast %281 : vector<1x32x12xf32> to vector<32x12xf32>
    %cst_136 = arith.constant dense<0.000000e+00> : vector<32x12xf32>
    %283 = tpu.matmul %280, %282, %cst_136 {dimension_numbers = #tpu.dot_dimension_numbers<[1], [0], [0], [1], [0, 0, 1, 1], [], []>} : vector<32x32xf32>, vector<32x12xf32>, vector<32x12xf32> -> vector<32x12xf32>
    %284 = arith.addf %279, %283 : vector<32x12xf32>
    %285 = vector.extract_strided_slice %276 {offsets = [32, 0], sizes = [32, 32], strides = [1, 1]} : vector<128x32xf32> to vector<32x32xf32>
    %c2_137 = arith.constant 2 : index
    %c0_138 = arith.constant 0 : index
    %c0_139 = arith.constant 0 : index
    %286 = vector.load %arg7[%c2_137, %c0_138, %c0_139] : memref<5x32x12xf32, #tpu.memory_space<vmem>>, vector<1x32x12xf32>
    %287 = vector.shape_cast %286 : vector<1x32x12xf32> to vector<32x12xf32>
    %cst_140 = arith.constant dense<0.000000e+00> : vector<32x12xf32>
    %288 = tpu.matmul %285, %287, %cst_140 {dimension_numbers = #tpu.dot_dimension_numbers<[1], [0], [0], [1], [0, 0, 1, 1], [], []>} : vector<32x32xf32>, vector<32x12xf32>, vector<32x12xf32> -> vector<32x12xf32>
    %289 = arith.addf %284, %288 : vector<32x12xf32>
    %290 = vector.extract_strided_slice %276 {offsets = [64, 0], sizes = [32, 32], strides = [1, 1]} : vector<128x32xf32> to vector<32x32xf32>
    %c3 = arith.constant 3 : index
    %c0_141 = arith.constant 0 : index
    %c0_142 = arith.constant 0 : index
    %291 = vector.load %arg7[%c3, %c0_141, %c0_142] : memref<5x32x12xf32, #tpu.memory_space<vmem>>, vector<1x32x12xf32>
    %292 = vector.shape_cast %291 : vector<1x32x12xf32> to vector<32x12xf32>
    %cst_143 = arith.constant dense<0.000000e+00> : vector<32x12xf32>
    %293 = tpu.matmul %290, %292, %cst_143 {dimension_numbers = #tpu.dot_dimension_numbers<[1], [0], [0], [1], [0, 0, 1, 1], [], []>} : vector<32x32xf32>, vector<32x12xf32>, vector<32x12xf32> -> vector<32x12xf32>
    %294 = arith.addf %289, %293 : vector<32x12xf32>
    %295 = vector.extract_strided_slice %276 {offsets = [96, 0], sizes = [32, 32], strides = [1, 1]} : vector<128x32xf32> to vector<32x32xf32>
    %c4 = arith.constant 4 : index
    %c0_144 = arith.constant 0 : index
    %c0_145 = arith.constant 0 : index
    %296 = vector.load %arg7[%c4, %c0_144, %c0_145] : memref<5x32x12xf32, #tpu.memory_space<vmem>>, vector<1x32x12xf32>
    %297 = vector.shape_cast %296 : vector<1x32x12xf32> to vector<32x12xf32>
    %cst_146 = arith.constant dense<0.000000e+00> : vector<32x12xf32>
    %298 = tpu.matmul %295, %297, %cst_146 {dimension_numbers = #tpu.dot_dimension_numbers<[1], [0], [0], [1], [0, 0, 1, 1], [], []>} : vector<32x32xf32>, vector<32x12xf32>, vector<32x12xf32> -> vector<32x12xf32>
    %299 = arith.addf %294, %298 : vector<32x12xf32>
    %c0_147 = arith.constant 0 : index
    %c0_148 = arith.constant 0 : index
    %300 = vector.load %arg8[%c0_147, %c0_148] : memref<1x12xf32, #tpu.memory_space<vmem>>, vector<1x12xf32>
    %301 = vector.broadcast %300 : vector<1x12xf32> to vector<32x12xf32>
    %302 = arith.addf %299, %301 : vector<32x12xf32>
    %c0_149 = arith.constant 0 : index
    %c0_150 = arith.constant 0 : index
    %303 = vector.load %arg9[%c0_149, %c0_150] : memref<32x12xf32, #tpu.memory_space<vmem>>, vector<32x12xf32>
    tpu.vector_store %arg9[%c0_149, %c0_150], %302 {strides = array<i32>} : memref<32x12xf32, #tpu.memory_space<vmem>>, vector<32x12xf32>,
    return
  }
  func.func @transform_0(%arg0: i32) -> (i32, i32) {
    %c0_i32 = arith.constant 0 : i32
    %c0_i32_0 = arith.constant 0 : i32
    %c0_i32_1 = arith.constant 0 : i32
    return %c0_i32, %c0_i32_0 : i32, i32
  }
  func.func @transform_1(%arg0: i32) -> (i32, i32, i32) {
    %c0_i32 = arith.constant 0 : i32
    %c0_i32_0 = arith.constant 0 : i32
    %c0_i32_1 = arith.constant 0 : i32
    %c0_i32_2 = arith.constant 0 : i32
    return %c0_i32, %c0_i32_0, %c0_i32_1 : i32, i32, i32
  }
  func.func @transform_2(%arg0: i32) -> (i32, i32, i32) {
    %c0_i32 = arith.constant 0 : i32
    %c0_i32_0 = arith.constant 0 : i32
    %c0_i32_1 = arith.constant 0 : i32
    %c0_i32_2 = arith.constant 0 : i32
    return %c0_i32, %c0_i32_0, %c0_i32_1 : i32, i32, i32
  }
  func.func @transform_3(%arg0: i32) -> (i32, i32, i32) {
    %c0_i32 = arith.constant 0 : i32
    %c0_i32_0 = arith.constant 0 : i32
    %c0_i32_1 = arith.constant 0 : i32
    %c0_i32_2 = arith.constant 0 : i32
    return %c0_i32, %c0_i32_0, %c0_i32_1 : i32, i32, i32
  }
  func.func @transform_4(%arg0: i32) -> (i32, i32) {
    %c0_i32 = arith.constant 0 : i32
    %c0_i32_0 = arith.constant 0 : i32
    %c0_i32_1 = arith.constant 0 : i32
    return %c0_i32, %c0_i32_0 : i32, i32
  }
  func.func @transform_5(%arg0: i32) -> (i32, i32) {
    %c0_i32 = arith.constant 0 : i32
    %c0_i32_0 = arith.constant 0 : i32
    %c0_i32_1 = arith.constant 0 : i32
    return %c0_i32, %c0_i32_0 : i32, i32
  }
  func.func @transform_6(%arg0: i32) -> (i32, i32, i32) {
    %c0_i32 = arith.constant 0 : i32
    %c0_i32_0 = arith.constant 0 : i32
    %c0_i32_1 = arith.constant 0 : i32
    %c0_i32_2 = arith.constant 0 : i32
    return %c0_i32, %c0_i32_0, %c0_i32_1 : i32, i32, i32
  }
  func.func @transform_7(%arg0: i32) -> (i32, i32) {
    %c0_i32 = arith.constant 0 : i32
    %c0_i32_0 = arith.constant 0 : i32
    %c0_i32_1 = arith.constant 0 : i32
    return %c0_i32, %c0_i32_0 : i32, i32
  }
  func.func @transform_8(%arg0: i32) -> (i32, i32) {
    %c0_i32 = arith.constant 0 : i32
    %c0_i32_0 = arith.constant 0 : i32
    %c0_i32_1 = arith.constant 0 : i32
    return %c0_i32, %c0_i32_0 : i32, i32
  }
}

</mosaic_0001>

<bundles_post_ra>
// kernel: _lambda_.1
= control target key start
LH: loop header
LB: loop body
LE: loop exit
PB: predicated region body
PF: predicated region fallthrough
CT: control target
= control target key end

     0   :  { %vm159_vm0 = vcmask 1042432   ;;  %vm62_vm1 = vcmask 23552   ;;  %v6582_v46 = vmov 0.0   ;;  %vm388_vm2 = vcmask 261120   ;;  %s7957_s1 = inlined_call_operand.vmem [shape: f32[3,3,32], index: 1, kind: input, shape index: {}]   ;;  %s7958_s0 = inlined_call_operand.vmem [shape: f32[256,3], index: 0, kind: input, shape index: {}]   ;;  %s7959_s3 = inlined_call_operand.vmem [shape: f32[3,32,32], index: 3, kind: input, shape index: {}]   ;;  %s7960_s2 = inlined_call_operand.vmem [shape: f32[3,32,32], index: 2, kind: input, shape index: {}]   ;;  %s7961_s4 = inlined_call_operand.vmem [shape: f32[1,32], index: 4, kind: input, shape index: {}]   ;;  %s7962_s5 = inlined_call_operand.vmem [shape: f32[128,32], index: 5, kind: input, shape index: {}]   ;;  %s7963_s6 = inlined_call_operand.vmem [shape: f32[5,32,12], index: 6, kind: input, shape index: {}]   ;;  %s7964_s7 = inlined_call_operand.vmem [shape: f32[1,12], index: 7, kind: input, shape index: {}]   ;;  %s7965_s8 = inlined_call_operand.vmem [shape: f32[32,12], index: 8, kind: output, shape index: {}]  }
   0x1   :  { %v61_v0 = vld [vmem:[%s7957_s1] sm:$0x7]  ;;  %v4754_v1 = vld [vmem:[%s7957_s1 + $0x4] sm:$0x7]  ;;  %v6644_v3 = vld [vmem:[%s7958_s0 + $0x10] sm:$0xff]  ;;  %vm4712_vm3 = vcmask 97280  }
   0x2   :  { %v6637_v2 = vld [vmem:[%s7958_s0] sm:$0xff]  ;;  %5391 = vmatprep.subr.msk.mxu0 %vm159_vm0, %v61_v0  ;;  %6219 = vmatprep.subr.msk.mxu1 %vm159_vm0, %v4754_v1  ;;  %v6649_v4 = vld [vmem:[%s7958_s0 + $0x8] sm:$0xff]  ;;  %v6657_v5 = vld [vmem:[%s7958_s0 + $0x18] sm:$0xff] }
   0x3   :  { %5392 = vmatpush3.msk.msra.mxu0 %vm159_vm0, %v61_v0  ;;  %5393 = vmatprep.mubr.msk.f32.mxu0 %vm62_vm1, %v6637_v2  ;;  %v959_v6 = vld [vmem:[%s7959_s3] sm:$0xff]  ;;  %v960_v7 = vld [vmem:[%s7959_s3 + $0x8] sm:$0xff]  ;;  %v6695_v11 = vld [vmem:[%s7958_s0 + $0x30] sm:$0xff] }
   0x4   :  { %6220 = vmatpush3.msk.msra.mxu1 %vm159_vm0, %v4754_v1  ;;  %5446 = vmatprep.mubr.msk.f32.mxu1 %vm62_vm1, %v6644_v3  ;;  %v6668_v8 = vpack.c.bf16 %v960_v7, %v959_v6  ;;  %v6676_v9 = vld [vmem:[%s7958_s0 + $0x20] sm:$0xff]  ;;  %v6687_v10 = vld [vmem:[%s7958_s0 + $0x28] sm:$0xff]  ;;  %v961_v12 = vld [vmem:[%s7959_s3 + $0x10] sm:$0xff] }
   0x5   :  { %5394 = vmatmul.mubr.msk.f32.vlgmr.msra.gmra.mrb[0].mxu0 %vm62_vm1, %v6649_v4  ;;  %5441 = vmatprep.subr.msk.mxu0 %vm159_vm0, %v4754_v1  ;;  %v962_v13 = vld [vmem:[%s7959_s3 + $0x18] sm:$0xff]  ;;  %v6721_v16 = vld [vmem:[%s7958_s0 + $0x40] sm:$0xff]  ;;  %v4831_v18 = vld [vmem:[%s7959_s3 + $0x28] sm:$0xff] }
   0x6   :  { %5447 = vmatmul.mubr.msk.f32.vlgmr.msra.gmra.mrb[0].mxu1 %vm62_vm1, %v6657_v5  ;;  %5442 = vmatpush3.msk.msra.mxu0 %vm159_vm0, %v4754_v1  ;;  %v6709_v14 = vpack.c.bf16 %v962_v13, %v961_v12  ;;  %v6716_v15 = vld [vmem:[%s7958_s0 + $0x38] sm:$0xff]  ;;  %v4830_v17 = vld [vmem:[%s7959_s3 + $0x20] sm:$0xff]  ;;  %v6742_v19 = vld [vmem:[%s7958_s0 + $0x48] sm:$0xff] }
   0x7   :  { %5980 = vmatprep.subr.bf16.mxu1 %v6668_v8  ;;  %5396 = vmatprep.mubr.msk.f32.mxu0 %vm62_vm1, %v6644_v3  ;;  %v6744_v20 = vpack.c.bf16 %v4831_v18, %v4830_v17  ;;  %v6749_v21 = vld [vmem:[%s7957_s1 + $0x8] sm:$0x7]  ;;  %v6754_v22 = vld [vmem:[%s7958_s0 + $0x50] sm:$0xff]  ;;  %v6770_v23 = vld [vmem:[%s7958_s0 + $0x58] sm:$0xff] }
   0x8   :  { %5982 = vmatpush3.bf16.msra.mxu1 %v6668_v8  ;;  %5449 = vmatprep.mubr.msk.f32.mxu1 %vm62_vm1, %v6676_v9  ;;  %v6775_v24 = vld [vmem:[%s7958_s0 + $0x60] sm:$0xff]  ;;  %v6788_v25 = vld [vmem:[%s7958_s0 + $0x68] sm:$0xff]  ;;  %v6793_v26 = vld [vmem:[%s7958_s0 + $0x70] sm:$0xff] }
   0x9   :  { %5397 = vmatmul.mubr.msk.f32.gmra.mrb[2].mxu0 %vm62_vm1, %v6657_v5  ;;  %5984 = vmatprep.subr.bf16.mxu1 %v6709_v14  ;;  %v6806_v27 = vld [vmem:[%s7958_s0 + $0x78] sm:$0xff]  ;;  %v6811_v28 = vld [vmem:[%s7958_s0 + $0x80] sm:$0xff]  ;;  %v6824_v29 = vld [vmem:[%s7958_s0 + $0x88] sm:$0xff] }
   0xa   :  { %5450 = vmatmul.mubr.msk.f32.gmra.mrb[2].mxu1 %vm62_vm1, %v6687_v10  ;;  %5399 = vmatprep.mubr.msk.f32.mxu0 %vm62_vm1, %v6676_v9  ;;  %v6829_v30 = vld [vmem:[%s7958_s0 + $0x90] sm:$0xff]  ;;  %v6842_v31 = vld [vmem:[%s7958_s0 + $0x98] sm:$0xff]  ;;  %v6847_v32 = vld [vmem:[%s7958_s0 + $0xa0] sm:$0xff] }
   0xb   :  { %5452 = vmatprep.mubr.msk.f32.mxu1 %vm62_vm1, %v6695_v11  ;;  %5491 = vmatprep.subr.msk.mxu0 %vm159_vm0, %v6749_v21  ;;  %v6860_v33 = vld [vmem:[%s7958_s0 + $0xa8] sm:$0xff]  ;;  %v6865_v34 = vld [vmem:[%s7958_s0 + $0xb0] sm:$0xff]  ;;  %v6878_v35 = vld [vmem:[%s7958_s0 + $0xb8] sm:$0xff] }
   0xc   :  { %5986 = vmatpush3.bf16.msra.mxu1 %v6709_v14  ;;  %v6883_v36 = vld [vmem:[%s7958_s0 + $0xc0] sm:$0xff]  ;;  %v6896_v37 = vld [vmem:[%s7958_s0 + $0xc8] sm:$0xff]  ;;  %v6901_v38 = vld [vmem:[%s7958_s0 + $0xd0] sm:$0xff] }
   0xd   :  { %5400 = vmatmul.mubr.msk.f32.gmra.mrb[4].mxu0 %vm62_vm1, %v6687_v10  ;;  %5988 = vmatprep.subr.bf16.mxu1 %v6744_v20  ;;  %v6914_v39 = vld [vmem:[%s7958_s0 + $0xd8] sm:$0xff]  ;;  %v6919_v40 = vld [vmem:[%s7958_s0 + $0xe0] sm:$0xff]  ;;  %v6932_v41 = vld [vmem:[%s7958_s0 + $0xe8] sm:$0xff] }
   0xe   :  { %5453 = vmatmul.mubr.msk.f32.gmra.mrb[4].mxu1 %vm62_vm1, %v6716_v15  ;;  %5402 = vmatprep.mubr.msk.f32.mxu0 %vm62_vm1, %v6695_v11  ;;  %v6937_v42 = vld [vmem:[%s7958_s0 + $0xf0] sm:$0xff]  ;;  %v6950_v43 = vld [vmem:[%s7958_s0 + $0xf8] sm:$0xff]  ;;  %v4834_v48 = vld [vmem:[%s7959_s3 + $0x40] sm:$0xff] }
   0xf   :  { %5455 = vmatprep.mubr.msk.f32.mxu1 %vm62_vm1, %v6721_v16  ;;  %v4832_v44 = vld [vmem:[%s7959_s3 + $0x30] sm:$0xff]  ;;  %v4833_v45 = vld [vmem:[%s7959_s3 + $0x38] sm:$0xff]  ;;  %v4835_v49 = vld [vmem:[%s7959_s3 + $0x48] sm:$0xff] }
  0x10   :  { %v6964_v47 = vpack.c.bf16 %v4833_v45, %v4832_v44  ;;  %v6978_v50 = vpack.c.bf16 %v4835_v49, %v4834_v48  ;;  %v4836_v51 = vld [vmem:[%s7959_s3 + $0x50] sm:$0xff]  ;;  %v4837_v52 = vld [vmem:[%s7959_s3 + $0x58] sm:$0xff] }
  0x11   :  { %5403 = vmatmul.mubr.msk.f32.gmra.mrb[6].mxu0 %vm62_vm1, %v6716_v15  ;;  %v6994_v53 = vpack.c.bf16 %v4837_v52, %v4836_v51 }
  0x12   :  { %5456 = vmatmul.mubr.msk.f32.gmra.mrb[6].mxu1 %vm62_vm1, %v6742_v19  ;;  %5405 = vmatprep.mubr.msk.f32.mxu0 %vm62_vm1, %v6721_v16 }
  0x13   :  { %5458 = vmatprep.mubr.msk.f32.mxu1 %vm62_vm1, %v6754_v22 }
  0x15   :  { %5406 = vmatmul.mubr.msk.f32.gmra.mrb[8].mxu0 %vm62_vm1, %v6742_v19 }
  0x16   :  { %5459 = vmatmul.mubr.msk.f32.gmra.mrb[8].mxu1 %vm62_vm1, %v6770_v23  ;;  %5408 = vmatprep.mubr.msk.f32.mxu0 %vm62_vm1, %v6754_v22 }
  0x17   :  { %5461 = vmatprep.mubr.msk.f32.mxu1 %vm62_vm1, %v6775_v24 }
  0x19   :  { %5409 = vmatmul.mubr.msk.f32.gmra.mrb[10].mxu0 %vm62_vm1, %v6770_v23 }
  0x1a   :  { %5462 = vmatmul.mubr.msk.f32.gmra.mrb[10].mxu1 %vm62_vm1, %v6788_v25  ;;  %5411 = vmatprep.mubr.msk.f32.mxu0 %vm62_vm1, %v6775_v24 }
  0x1b   :  { %5464 = vmatprep.mubr.msk.f32.mxu1 %vm62_vm1, %v6793_v26 }
  0x1d   :  { %5412 = vmatmul.mubr.msk.f32.gmra.mrb[12].mxu0 %vm62_vm1, %v6788_v25 }
  0x1e   :  { %5465 = vmatmul.mubr.msk.f32.gmra.mrb[12].mxu1 %vm62_vm1, %v6806_v27  ;;  %5414 = vmatprep.mubr.msk.f32.mxu0 %vm62_vm1, %v6793_v26 }
  0x1f   :  { %5467 = vmatprep.mubr.msk.f32.mxu1 %vm62_vm1, %v6811_v28 }
  0x21   :  { %5415 = vmatmul.mubr.msk.f32.gmra.mrb[14].mxu0 %vm62_vm1, %v6806_v27 }
  0x22   :  { %5468 = vmatmul.mubr.msk.f32.gmra.mrb[14].mxu1 %vm62_vm1, %v6824_v29  ;;  %5417 = vmatprep.mubr.msk.f32.mxu0 %vm62_vm1, %v6811_v28 }
  0x23   :  { %5470 = vmatprep.mubr.msk.f32.mxu1 %vm62_vm1, %v6829_v30 }
  0x25   :  { %5418 = vmatmul.mubr.msk.f32.gmra.mrb[16].mxu0 %vm62_vm1, %v6824_v29 }
  0x26   :  { %5471 = vmatmul.mubr.msk.f32.gmra.mrb[16].mxu1 %vm62_vm1, %v6842_v31  ;;  %5420 = vmatprep.mubr.msk.f32.mxu0 %vm62_vm1, %v6829_v30 }
  0x27   :  { %5473 = vmatprep.mubr.msk.f32.mxu1 %vm62_vm1, %v6847_v32 }
  0x29   :  { %5421 = vmatmul.mubr.msk.f32.gmra.mrb[18].mxu0 %vm62_vm1, %v6842_v31 }
  0x2a   :  { %5474 = vmatmul.mubr.msk.f32.gmra.mrb[18].mxu1 %vm62_vm1, %v6860_v33  ;;  %5423 = vmatprep.mubr.msk.f32.mxu0 %vm62_vm1, %v6847_v32 }
  0x2b   :  { %5476 = vmatprep.mubr.msk.f32.mxu1 %vm62_vm1, %v6865_v34 }
  0x2d   :  { %5424 = vmatmul.mubr.msk.f32.gmra.mrb[20].mxu0 %vm62_vm1, %v6860_v33 }
  0x2e   :  { %5477 = vmatmul.mubr.msk.f32.gmra.mrb[20].mxu1 %vm62_vm1, %v6878_v35  ;;  %5426 = vmatprep.mubr.msk.f32.mxu0 %vm62_vm1, %v6865_v34 }
  0x2f   :  { %5479 = vmatprep.mubr.msk.f32.mxu1 %vm62_vm1, %v6883_v36 }
  0x31   :  { %5427 = vmatmul.mubr.msk.f32.gmra.mrb[22].mxu0 %vm62_vm1, %v6878_v35 }
  0x32   :  { %5480 = vmatmul.mubr.msk.f32.gmra.mrb[22].mxu1 %vm62_vm1, %v6896_v37  ;;  %5429 = vmatprep.mubr.msk.f32.mxu0 %vm62_vm1, %v6883_v36 }
  0x33   :  { %5482 = vmatprep.mubr.msk.f32.mxu1 %vm62_vm1, %v6901_v38 }
  0x35   :  { %5430 = vmatmul.mubr.msk.f32.gmra.mrb[24].mxu0 %vm62_vm1, %v6896_v37 }
  0x36   :  { %5483 = vmatmul.mubr.msk.f32.gmra.mrb[24].mxu1 %vm62_vm1, %v6914_v39  ;;  %5432 = vmatprep.mubr.msk.f32.mxu0 %vm62_vm1, %v6901_v38 }
  0x37   :  { %5485 = vmatprep.mubr.msk.f32.mxu1 %vm62_vm1, %v6919_v40 }
  0x39   :  { %5433 = vmatmul.mubr.msk.f32.gmra.mrb[26].mxu0 %vm62_vm1, %v6914_v39 }
  0x3a   :  { %5486 = vmatmul.mubr.msk.f32.gmra.mrb[26].mxu1 %vm62_vm1, %v6932_v41  ;;  %5435 = vmatprep.mubr.msk.f32.mxu0 %vm62_vm1, %v6919_v40 }
  0x3b   :  { %5488 = vmatprep.mubr.msk.f32.mxu1 %vm62_vm1, %v6937_v42 }
  0x3d   :  { %5436 = vmatmul.mubr.msk.f32.gmra.mrb[28].mxu0 %vm62_vm1, %v6932_v41 }
  0x3e   :  { %5489 = vmatmul.mubr.msk.f32.gmra.mrb[28].mxu1 %vm62_vm1, %v6950_v43  ;;  %5438 = vmatprep.mubr.msk.f32.mxu0 %vm62_vm1, %v6937_v42 }
  0x3f   :  { %5549 = vmatprep.mubr.f32.mxu1 %v6582_v46 }
  0x41   :  { %5439 = vmatmul.mubr.msk.f32.gmra.mrb[30].mxu0 %vm62_vm1, %v6950_v43 }
  0x42   :  { %5550 = vmatmul.mubr.f32.vlgmr.msra.gmra.mrb[30].mxu1 %v6582_v46  ;;  %5443 = vmatprep.mubr.msk.f32.mxu0 %vm62_vm1, %v6637_v2 }
  0x43   :  { %5990 = vmatpush3.bf16.msra.mxu1 %v6744_v20  ;;  %5552 = vmatprep.mubr.f32.mxu1 %v6582_v46 }
  0x44   :  { %5992 = vmatprep.subr.bf16.mxu1 %v6964_v47 }
  0x45   :  { %5444 = vmatmul.mubr.msk.f32.vlgmr.msra.gmra.mrb[32].mxu0 %vm62_vm1, %v6649_v4 }
  0x46   :  { %5553 = vmatmul.mubr.f32.gmra.mrb[32].mxu1 %v6582_v46  ;;  %5492 = vmatpush3.msk.msra.mxu0 %vm159_vm0, %v6749_v21 }
  0x47   :  { %5994 = vmatpush3.bf16.msra.mxu1 %v6964_v47  ;;  %5563 = vmatprep.mubr.f32.mxu1 %v6582_v46 }
  0x48   :  { %5996 = vmatprep.subr.bf16.mxu1 %v6978_v50  ;;  %5493 = vmatprep.mubr.msk.f32.mxu0 %vm62_vm1, %v6637_v2 }
  0x49   :  { %5494 = vmatmul.mubr.msk.f32.vlgmr.msra.gmra.mrb[34].mxu0 %vm62_vm1, %v6649_v4  ;;  %6044 = vmatprep.subr.bf16.mxu0 %v6978_v50 }
  0x4a   :  { %5564 = vmatmul.mubr.f32.vlgmr.msra.gmra.mrb[34].mxu1 %v6582_v46  ;;  %5496 = vmatprep.mubr.msk.f32.mxu0 %vm62_vm1, %v6644_v3 }
  0x4b   :  { %5566 = vmatprep.mubr.f32.mxu1 %v6582_v46  ;;  %5998 = vmatpush3.bf16.msra.mxu1 %v6978_v50 }
  0x4c   :  { %6000 = vmatprep.subr.bf16.mxu1 %v6994_v53  ;;  %6046 = vmatpush3.bf16.msra.mxu0 %v6978_v50 }
  0x4d   :  { %5497 = vmatmul.mubr.msk.f32.gmra.mrb[36].mxu0 %vm62_vm1, %v6657_v5  ;;  %6048 = vmatprep.subr.bf16.mxu0 %v6994_v53 }
  0x4e   :  { %5567 = vmatmul.mubr.f32.gmra.mrb[36].mxu1 %v6582_v46  ;;  %5499 = vmatprep.mubr.msk.f32.mxu0 %vm62_vm1, %v6676_v9 }
  0x4f   :  { %6002 = vmatpush3.bf16.msra.mxu1 %v6994_v53  ;;  %5577 = vmatprep.mubr.f32.mxu1 %v6582_v46 }
  0x50   :  { %6004 = vmatprep.subr.bf16.mxu1 %v6668_v8  ;;  %6050 = vmatpush3.bf16.msra.mxu0 %v6994_v53 }
  0x51   :  { %5500 = vmatmul.mubr.msk.f32.gmra.mrb[38].mxu0 %vm62_vm1, %v6687_v10  ;;  %6060 = vmatprep.subr.bf16.mxu0 %v6744_v20 }
  0x52   :  { %5578 = vmatmul.mubr.f32.vlgmr.msra.gmra.mrb[38].mxu1 %v6582_v46  ;;  %5502 = vmatprep.mubr.msk.f32.mxu0 %vm62_vm1, %v6695_v11 }
  0x53   :  { %5580 = vmatprep.mubr.f32.mxu1 %v6582_v46  ;;  %6006 = vmatpush3.bf16.msra.mxu1 %v6668_v8 }
  0x54   :  { %6008 = vmatprep.subr.bf16.mxu1 %v6709_v14 }
  0x55   :  { %5503 = vmatmul.mubr.msk.f32.gmra.mrb[40].mxu0 %vm62_vm1, %v6716_v15 }
  0x56   :  { %5581 = vmatmul.mubr.f32.gmra.mrb[40].mxu1 %v6582_v46  ;;  %5505 = vmatprep.mubr.msk.f32.mxu0 %vm62_vm1, %v6721_v16 }
  0x57   :  { %6010 = vmatpush3.bf16.msra.mxu1 %v6709_v14 }
  0x58   :  { %6012 = vmatprep.subr.bf16.mxu1 %v6744_v20 }
  0x59   :  { %5506 = vmatmul.mubr.msk.f32.gmra.mrb[42].mxu0 %vm62_vm1, %v6742_v19 }
  0x5a   :  { %5508 = vmatprep.mubr.msk.f32.mxu0 %vm62_vm1, %v6754_v22 }
  0x5d   :  { %5509 = vmatmul.mubr.msk.f32.gmra.mrb[44].mxu0 %vm62_vm1, %v6770_v23 }
  0x5e   :  { %5511 = vmatprep.mubr.msk.f32.mxu0 %vm62_vm1, %v6775_v24 }
  0x61   :  { %5512 = vmatmul.mubr.msk.f32.gmra.mrb[46].mxu0 %vm62_vm1, %v6788_v25 }
  0x62   :  { %5514 = vmatprep.mubr.msk.f32.mxu0 %vm62_vm1, %v6793_v26 }
  0x65   :  { %5515 = vmatmul.mubr.msk.f32.gmra.mrb[48].mxu0 %vm62_vm1, %v6806_v27 }
  0x66   :  { %5517 = vmatprep.mubr.msk.f32.mxu0 %vm62_vm1, %v6811_v28 }
  0x69   :  { %5518 = vmatmul.mubr.msk.f32.gmra.mrb[50].mxu0 %vm62_vm1, %v6824_v29 }
  0x6a   :  { %5520 = vmatprep.mubr.msk.f32.mxu0 %vm62_vm1, %v6829_v30 }
  0x6d   :  { %5521 = vmatmul.mubr.msk.f32.gmra.mrb[52].mxu0 %vm62_vm1, %v6842_v31 }
  0x6e   :  { %5523 = vmatprep.mubr.msk.f32.mxu0 %vm62_vm1, %v6847_v32 }
  0x71   :  { %5524 = vmatmul.mubr.msk.f32.gmra.mrb[54].mxu0 %vm62_vm1, %v6860_v33 }
  0x72   :  { %5526 = vmatprep.mubr.msk.f32.mxu0 %vm62_vm1, %v6865_v34 }
  0x75   :  { %5527 = vmatmul.mubr.msk.f32.gmra.mrb[56].mxu0 %vm62_vm1, %v6878_v35 }
  0x76   :  { %5529 = vmatprep.mubr.msk.f32.mxu0 %vm62_vm1, %v6883_v36 }
  0x79   :  { %5530 = vmatmul.mubr.msk.f32.gmra.mrb[58].mxu0 %vm62_vm1, %v6896_v37 }
  0x7a   :  { %5532 = vmatprep.mubr.msk.f32.mxu0 %vm62_vm1, %v6901_v38 }
  0x7d   :  { %5533 = vmatmul.mubr.msk.f32.gmra.mrb[60].mxu0 %vm62_vm1, %v6914_v39 }
  0x7e   :  { %5535 = vmatprep.mubr.msk.f32.mxu0 %vm62_vm1, %v6919_v40 }
  0x81   :  { %5536 = vmatmul.mubr.msk.f32.gmra.mrb[62].mxu0 %vm62_vm1, %v6932_v41 }
  0x82   :  { %5538 = vmatprep.mubr.msk.f32.mxu0 %vm62_vm1, %v6937_v42 }
  0x85   :  { %5539 = vmatmul.mubr.msk.f32.gmra.mrb[64].mxu0 %vm62_vm1, %v6950_v43 }
  0xd8   :  { %v5395_v54 = vpop.f32.mrb[0].mxu0 }
  0xd9   :  { %390 = vst.msk [vmem:[#allocation2 + $0x8] sm:$0xff] %vm388_vm2, %v5395_v54  ;;  %v5448_v55 = vpop.f32.mrb[0].mxu1  ;;  %v229_v56 = vpop.f32.mrb[1].mxu0 }
  0xda   :  { %654 = vst.msk [vmem:[#allocation3 + $0x18] sm:$0xff] %vm388_vm2, %v5448_v55  ;;  %389 = vst.msk [vmem:[#allocation2] sm:$0xff] %vm388_vm2, %v229_v56  ;;  %v502_v57 = vpop.f32.mrb[1].mxu1  ;;  %v7131_v55 = vld [vmem:[%s7960_s2 + $0x8] sm:$0xff] }
  0xdb   :  { %653 = vst.msk [vmem:[#allocation3 + $0x10] sm:$0xff] %vm388_vm2, %v502_v57 }
  0xdc   :  { %v5398_v58 = vpop.f32.mrb[2].mxu0 }
  0xdd   :  { %392 = vst.msk [vmem:[#allocation2 + $0x18] sm:$0xff] %vm388_vm2, %v5398_v58  ;;  %v5451_v59 = vpop.f32.mrb[2].mxu1  ;;  %v239_v60 = vpop.f32.mrb[3].mxu0  ;;  %v7138_v58 = vld [vmem:[%s7960_s2] sm:$0xff] }
  0xde   :  { %656 = vst.msk [vmem:[#allocation3 + $0x28] sm:$0xff] %vm388_vm2, %v5451_v59  ;;  %391 = vst.msk [vmem:[#allocation2 + $0x10] sm:$0xff] %vm388_vm2, %v239_v60  ;;  %v512_v61 = vpop.f32.mrb[3].mxu1 }
  0xdf   :  { %655 = vst.msk [vmem:[#allocation3 + $0x20] sm:$0xff] %vm388_vm2, %v512_v61 }
  0xe0   :  { %v5401_v62 = vpop.f32.mrb[4].mxu0  ;;  %v975_v56 = vld [vmem:[#allocation2 + $0x8] sm:$0xff] }
  0xe1   :  { %394 = vst.msk [vmem:[#allocation2 + $0x28] sm:$0xff] %vm388_vm2, %v5401_v62  ;;  %v5454_v63 = vpop.f32.mrb[4].mxu1  ;;  %v249_v0 = vpop.f32.mrb[5].mxu0  ;;  %v974_v59 = vld [vmem:[#allocation2] sm:$0xff]  ;;  %v979_v61 = vadd.f32 %v975_v56, %v7131_v55 }
  0xe2   :  { %658 = vst.msk [vmem:[#allocation3 + $0x38] sm:$0xff] %vm388_vm2, %v5454_v63  ;;  %393 = vst.msk [vmem:[#allocation2 + $0x20] sm:$0xff] %vm388_vm2, %v249_v0  ;;  %v522_v1 = vpop.f32.mrb[5].mxu1  ;;  %v978_v0 = vadd.f32 %v974_v59, %v7138_v58 }
  0xe3   :  { %657 = vst.msk [vmem:[#allocation3 + $0x30] sm:$0xff] %vm388_vm2, %v522_v1  ;;  %v7147_v1 = vld [vmem:[%s7960_s2 + $0x18] sm:$0xff] }
  0xe4   :  { %v5404_v2 = vpop.f32.mrb[6].mxu0 }
  0xe5   :  { %396 = vst.msk [vmem:[#allocation2 + $0x38] sm:$0xff] %vm388_vm2, %v5404_v2  ;;  %v5457_v3 = vpop.f32.mrb[6].mxu1  ;;  %v259_v4 = vpop.f32.mrb[7].mxu0  ;;  %v977_v2 = vld [vmem:[#allocation2 + $0x18] sm:$0xff] }
  0xe6   :  { %660 = vst.msk [vmem:[#allocation3 + $0x48] sm:$0xff] %vm388_vm2, %v5457_v3  ;;  %395 = vst.msk [vmem:[#allocation2 + $0x30] sm:$0xff] %vm388_vm2, %v259_v4  ;;  %v532_v5 = vpop.f32.mrb[7].mxu1 }
  0xe7   :  { %659 = vst.msk [vmem:[#allocation3 + $0x40] sm:$0xff] %vm388_vm2, %v532_v5  ;;  %v7153_v5 = vld [vmem:[%s7960_s2 + $0x10] sm:$0xff] }
  0xe8   :  { %v5407_v6 = vpop.f32.mrb[8].mxu0 }
  0xe9   :  { %398 = vst.msk [vmem:[#allocation2 + $0x48] sm:$0xff] %vm388_vm2, %v5407_v6  ;;  %v5460_v7 = vpop.f32.mrb[8].mxu1  ;;  %v269_v9 = vpop.f32.mrb[9].mxu0  ;;  %v976_v6 = vld [vmem:[#allocation2 + $0x10] sm:$0xff] }
  0xea   :  { %662 = vst.msk [vmem:[#allocation3 + $0x58] sm:$0xff] %vm388_vm2, %v5460_v7  ;;  %397 = vst.msk [vmem:[#allocation2 + $0x40] sm:$0xff] %vm388_vm2, %v269_v9  ;;  %v542_v10 = vpop.f32.mrb[9].mxu1 }
  0xeb   :  { %661 = vst.msk [vmem:[#allocation3 + $0x50] sm:$0xff] %vm388_vm2, %v542_v10 }
  0xec   :  { %v5410_v11 = vpop.f32.mrb[10].mxu0 }
  0xed   :  { %400 = vst.msk [vmem:[#allocation2 + $0x58] sm:$0xff] %vm388_vm2, %v5410_v11  ;;  %v5463_v12 = vpop.f32.mrb[10].mxu1  ;;  %v279_v13 = vpop.f32.mrb[11].mxu0  ;;  %v981_v11 = vadd.f32 %v977_v2, %v7147_v1 }
  0xee   :  { %664 = vst.msk [vmem:[#allocation3 + $0x68] sm:$0xff] %vm388_vm2, %v5463_v12  ;;  %399 = vst.msk [vmem:[#allocation2 + $0x50] sm:$0xff] %vm388_vm2, %v279_v13  ;;  %v552_v15 = vpop.f32.mrb[11].mxu1 }
  0xef   :  { %663 = vst.msk [vmem:[#allocation3 + $0x60] sm:$0xff] %vm388_vm2, %v552_v15 }
  0xf0   :  { %v5413_v16 = vpop.f32.mrb[12].mxu0 }
  0xf1   :  { %402 = vst.msk [vmem:[#allocation2 + $0x68] sm:$0xff] %vm388_vm2, %v5413_v16  ;;  %v5466_v17 = vpop.f32.mrb[12].mxu1  ;;  %v289_v18 = vpop.f32.mrb[13].mxu0  ;;  %v980_v16 = vadd.f32 %v976_v6, %v7153_v5  ;;  %v7190_v6 = vld [vmem:[%s7961_s4] ss:$0 sm:$0xff] }
  0xf2   :  { %666 = vst.msk [vmem:[#allocation3 + $0x78] sm:$0xff] %vm388_vm2, %v5466_v17  ;;  %401 = vst.msk [vmem:[#allocation2 + $0x60] sm:$0xff] %vm388_vm2, %v289_v18  ;;  %v562_v19 = vpop.f32.mrb[13].mxu1 }
  0xf3   :  { %665 = vst.msk [vmem:[#allocation3 + $0x70] sm:$0xff] %vm388_vm2, %v562_v19 }
  0xf4   :  { %v5416_v21 = vpop.f32.mrb[14].mxu0 }
  0xf5   :  { %404 = vst.msk [vmem:[#allocation2 + $0x78] sm:$0xff] %vm388_vm2, %v5416_v21  ;;  %v5469_v22 = vpop.f32.mrb[14].mxu1  ;;  %v299_v23 = vpop.f32.mrb[15].mxu0 }
  0xf6   :  { %668 = vst.msk [vmem:[#allocation3 + $0x88] sm:$0xff] %vm388_vm2, %v5469_v22  ;;  %403 = vst.msk [vmem:[#allocation2 + $0x70] sm:$0xff] %vm388_vm2, %v299_v23  ;;  %v572_v24 = vpop.f32.mrb[15].mxu1 }
  0xf7   :  { %667 = vst.msk [vmem:[#allocation3 + $0x80] sm:$0xff] %vm388_vm2, %v572_v24 }
  0xf8   :  { %v5419_v25 = vpop.f32.mrb[16].mxu0 }
  0xf9   :  { %406 = vst.msk [vmem:[#allocation2 + $0x88] sm:$0xff] %vm388_vm2, %v5419_v25  ;;  %v5472_v26 = vpop.f32.mrb[16].mxu1  ;;  %v309_v27 = vpop.f32.mrb[17].mxu0  ;;  %v7162_v25 = vld [vmem:[%s7960_s2 + $0x38] sm:$0xff] }
  0xfa   :  { %670 = vst.msk [vmem:[#allocation3 + $0x98] sm:$0xff] %vm388_vm2, %v5472_v26  ;;  %405 = vst.msk [vmem:[#allocation2 + $0x80] sm:$0xff] %vm388_vm2, %v309_v27  ;;  %v582_v28 = vpop.f32.mrb[17].mxu1  ;;  %v985_v26 = vld [vmem:[#allocation3 + $0x18] sm:$0xff] }
  0xfb   :  { %669 = vst.msk [vmem:[#allocation3 + $0x90] sm:$0xff] %vm388_vm2, %v582_v28 }
  0xfc   :  { %v5422_v29 = vpop.f32.mrb[18].mxu0 }
  0xfd   :  { %408 = vst.msk [vmem:[#allocation2 + $0x98] sm:$0xff] %vm388_vm2, %v5422_v29  ;;  %v5475_v30 = vpop.f32.mrb[18].mxu1  ;;  %v319_v31 = vpop.f32.mrb[19].mxu0  ;;  %v7169_v29 = vld [vmem:[%s7960_s2 + $0x30] sm:$0xff] }
  0xfe   :  { %672 = vst.msk [vmem:[#allocation3 + $0xa8] sm:$0xff] %vm388_vm2, %v5475_v30  ;;  %407 = vst.msk [vmem:[#allocation2 + $0x90] sm:$0xff] %vm388_vm2, %v319_v31  ;;  %v592_v32 = vpop.f32.mrb[19].mxu1  ;;  %v7174_v30 = vld [vmem:[%s7960_s2 + $0x28] sm:$0xff] }
  0xff   :  { %671 = vst.msk [vmem:[#allocation3 + $0xa0] sm:$0xff] %vm388_vm2, %v592_v32  ;;  %v989_v32 = vadd.f32 %v7162_v25, %v985_v26 }
 0x100   :  { %v5425_v33 = vpop.f32.mrb[20].mxu0 }
 0x101   :  { %410 = vst.msk [vmem:[#allocation2 + $0xa8] sm:$0xff] %vm388_vm2, %v5425_v33  ;;  %v5478_v34 = vpop.f32.mrb[20].mxu1  ;;  %v329_v35 = vpop.f32.mrb[21].mxu0  ;;  %v984_v33 = vld [vmem:[#allocation3 + $0x10] sm:$0xff] }
 0x102   :  { %674 = vst.msk [vmem:[#allocation3 + $0xb8] sm:$0xff] %vm388_vm2, %v5478_v34  ;;  %409 = vst.msk [vmem:[#allocation2 + $0xa0] sm:$0xff] %vm388_vm2, %v329_v35  ;;  %v602_v36 = vpop.f32.mrb[21].mxu1 }
 0x103   :  { %673 = vst.msk [vmem:[#allocation3 + $0xb0] sm:$0xff] %vm388_vm2, %v602_v36  ;;  %v7181_v36 = vld [vmem:[%s7960_s2 + $0x20] sm:$0xff] }
 0x104   :  { %v5428_v37 = vpop.f32.mrb[22].mxu0 }
 0x105   :  { %412 = vst.msk [vmem:[#allocation2 + $0xb8] sm:$0xff] %vm388_vm2, %v5428_v37  ;;  %v5481_v38 = vpop.f32.mrb[22].mxu1  ;;  %v339_v39 = vpop.f32.mrb[23].mxu0 }
 0x106   :  { %676 = vst.msk [vmem:[#allocation3 + $0xc8] sm:$0xff] %vm388_vm2, %v5481_v38  ;;  %411 = vst.msk [vmem:[#allocation2 + $0xb0] sm:$0xff] %vm388_vm2, %v339_v39  ;;  %v612_v40 = vpop.f32.mrb[23].mxu1 }
 0x107   :  { %675 = vst.msk [vmem:[#allocation3 + $0xc0] sm:$0xff] %vm388_vm2, %v612_v40 }
 0x108   :  { %v5431_v41 = vpop.f32.mrb[24].mxu0 }
 0x109   :  { %414 = vst.msk [vmem:[#allocation2 + $0xc8] sm:$0xff] %vm388_vm2, %v5431_v41  ;;  %v5484_v42 = vpop.f32.mrb[24].mxu1  ;;  %v349_v43 = vpop.f32.mrb[25].mxu0 }
 0x10a   :  { %678 = vst.msk [vmem:[#allocation3 + $0xd8] sm:$0xff] %vm388_vm2, %v5484_v42  ;;  %413 = vst.msk [vmem:[#allocation2 + $0xc0] sm:$0xff] %vm388_vm2, %v349_v43  ;;  %v622_v44 = vpop.f32.mrb[25].mxu1 }
 0x10b   :  { %677 = vst.msk [vmem:[#allocation3 + $0xd0] sm:$0xff] %vm388_vm2, %v622_v44  ;;  %v988_v44 = vadd.f32 %v7169_v29, %v984_v33 }
 0x10c   :  { %v5434_v45 = vpop.f32.mrb[26].mxu0 }
 0x10d   :  { %416 = vst.msk [vmem:[#allocation2 + $0xd8] sm:$0xff] %vm388_vm2, %v5434_v45  ;;  %v5487_v46 = vpop.f32.mrb[26].mxu1  ;;  %v359_v48 = vpop.f32.mrb[27].mxu0 }
 0x10e   :  { %680 = vst.msk [vmem:[#allocation3 + $0xe8] sm:$0xff] %vm388_vm2, %v5487_v46  ;;  %415 = vst.msk [vmem:[#allocation2 + $0xd0] sm:$0xff] %vm388_vm2, %v359_v48  ;;  %v632_v49 = vpop.f32.mrb[27].mxu1 }
 0x10f   :  { %679 = vst.msk [vmem:[#allocation3 + $0xe0] sm:$0xff] %vm388_vm2, %v632_v49 }
 0x110   :  { %v5437_v51 = vpop.f32.mrb[28].mxu0 }
 0x111   :  { %418 = vst.msk [vmem:[#allocation2 + $0xe8] sm:$0xff] %vm388_vm2, %v5437_v51  ;;  %v5490_v52 = vpop.f32.mrb[28].mxu1  ;;  %v369_v54 = vpop.f32.mrb[29].mxu0 }
 0x112   :  { %682 = vst.msk [vmem:[#allocation3 + $0xf8] sm:$0xff] %vm388_vm2, %v5490_v52  ;;  %417 = vst.msk [vmem:[#allocation2 + $0xe0] sm:$0xff] %vm388_vm2, %v369_v54  ;;  %v642_v57 = vpop.f32.mrb[29].mxu1 }
 0x113   :  { %681 = vst.msk [vmem:[#allocation3 + $0xf0] sm:$0xff] %vm388_vm2, %v642_v57 }
 0x114   :  { %v5440_v60 = vpop.f32.mrb[30].mxu0 }
 0x115   :  { %420 = vst.msk [vmem:[#allocation2 + $0xf8] sm:$0xff] %vm388_vm2, %v5440_v60  ;;  %v5551_v62 = vpop.f32.mrb[30].mxu1  ;;  %v379_v63 = vpop.f32.mrb[31].mxu0 }
 0x116   :  { %v1263_v3 = vadd.f32 %v5551_v62, %v979_v61  ;;  %419 = vst.msk [vmem:[#allocation2 + $0xf0] sm:$0xff] %vm388_vm2, %v379_v63  ;;  %v1067_v4 = vpop.f32.mrb[31].mxu1 }
 0x117   :  { %v1262_v7 = vadd.f32 %v1067_v4, %v978_v0 }
 0x118   :  { %v4840_v9 = vmul.f32 -1.442695, %v1263_v3  ;;  %v5445_v10 = vpop.f32.mrb[32].mxu0 }
 0x119   :  { %v4839_v12 = vmul.f32 -1.442695, %v1262_v7  ;;  %652 = vst.msk [vmem:[#allocation3 + $0x8] sm:$0xff] %vm388_vm2, %v5445_v10  ;;  %v5554_v13 = vpop.f32.mrb[32].mxu1  ;;  %v492_v15 = vpop.f32.mrb[33].mxu0  ;;  %v7195_v7 = vld [vmem:[%s7960_s2 + $0x48] sm:$0xff] }
 0x11a   :  { %6238 = vpow2.f32 %v4840_v9  ;;  %v1265_v17 = vadd.f32 %v5554_v13, %v981_v11  ;;  %651 = vst.msk [vmem:[#allocation3] sm:$0xff] %vm388_vm2, %v492_v15  ;;  %v1077_v18 = vpop.f32.mrb[33].mxu1  ;;  %v7201_v11 = vld [vmem:[%s7960_s2 + $0x40] sm:$0xff] }
 0x11b   :  { %6240 = vpow2.f32 %v4839_v12  ;;  %v1264_v19 = vadd.f32 %v1077_v18, %v980_v16 }
 0x11c   :  { %v4842_v21 = vmul.f32 -1.442695, %v1265_v17  ;;  %v5495_v22 = vpop.f32.mrb[34].mxu0 }
 0x11d   :  { %v4841_v23 = vmul.f32 -1.442695, %v1264_v19  ;;  %v5565_v24 = vpop.f32.mrb[34].mxu1  ;;  %914 = vst.msk [vmem:[#allocation4 + $0x8] sm:$0xff] %vm388_vm2, %v5495_v22  ;;  %v754_v27 = vpop.f32.mrb[35].mxu0 }
 0x11e   :  { %6242 = vpow2.f32 %v4842_v21  ;;  %v1152_v28 = vpop.f32.mrb[35].mxu1  ;;  %913 = vst.msk [vmem:[#allocation4] sm:$0xff] %vm388_vm2, %v754_v27  ;;  %v7209_v21 = vld [vmem:[%s7960_s2 + $0x58] sm:$0xff]  ;;  %v7215_v27 = vld [vmem:[%s7960_s2 + $0x50] sm:$0xff] }
 0x11f   :  { %6244 = vpow2.f32 %v4841_v23 }
 0x120   :  { %v983_v31 = vld [vmem:[#allocation3 + $0x8] sm:$0xff]  ;;  %v5498_v34 = vpop.f32.mrb[36].mxu0 }
 0x121   :  { %v987_v35 = vadd.f32 %v7174_v30, %v983_v31  ;;  %v982_v37 = vld [vmem:[#allocation3] sm:$0xff]  ;;  %v5568_v38 = vpop.f32.mrb[36].mxu1  ;;  %916 = vst.msk [vmem:[#allocation4 + $0x18] sm:$0xff] %vm388_vm2, %v5498_v34  ;;  %v764_v39 = vpop.f32.mrb[37].mxu0 }
 0x122   :  { %v986_v40 = vadd.f32 %v7181_v36, %v982_v37  ;;  %v1293_v41 = vadd.f32 %v5568_v38, %v989_v32  ;;  %v1162_v42 = vpop.f32.mrb[37].mxu1  ;;  %915 = vst.msk [vmem:[#allocation4 + $0x10] sm:$0xff] %vm388_vm2, %v764_v39 }
 0x123   :  { %v1291_v43 = vadd.f32 %v5565_v24, %v987_v35  ;;  %v1292_v54 = vadd.f32 %v1162_v42, %v988_v44 }
 0x124   :  { %v6239_v45 = vpop.eup %6238  ;;  %v1290_v46 = vadd.f32 %v1152_v28, %v986_v40  ;;  %v4846_v48 = vmul.f32 -1.442695, %v1293_v41  ;;  %v991_v9 = vld [vmem:[#allocation4 + $0x8] sm:$0xff] }
 0x125   :  { %v6241_v49 = vpop.eup %6240  ;;  %v1279_v51 = vadd.f32 1.0, %v6239_v45  ;;  %v4844_v52 = vmul.f32 -1.442695, %v1291_v43  ;;  %v5579_v56 = vpop.f32.mrb[38].mxu1  ;;  %v4845_v0 = vmul.f32 -1.442695, %v1292_v54  ;;  %v995_v16 = vadd.f32 %v7195_v7, %v991_v9 }
 0x126   :  { %v1278_v57 = vadd.f32 1.0, %v6241_v49  ;;  %v4843_v59 = vmul.f32 -1.442695, %v1290_v46  ;;  %6246 = vpow2.f32 %v4846_v48  ;;  %v1243_v60 = vpop.f32.mrb[39].mxu1  ;;  %v1249_v10 = vadd.f32 %v5579_v56, %v7190_v6  ;;  %v990_v12 = vld [vmem:[#allocation4] sm:$0xff] }
 0x127   :  { %6248 = vrcp.f32 %v1279_v51  ;;  %v1244_v13 = vadd.f32 %v7190_v6, %v1243_v60  ;;  %v994_v19 = vadd.f32 %v7201_v11, %v990_v12 }
 0x128   :  { %v6243_v61 = vpop.eup %6242  ;;  %6250 = vrcp.f32 %v1278_v57  ;;  %v993_v22 = vld [vmem:[#allocation4 + $0x18] sm:$0xff] }
 0x129   :  { %v6245_v62 = vpop.eup %6244  ;;  %v1281_v63 = vadd.f32 1.0, %v6243_v61  ;;  %6252 = vpow2.f32 %v4844_v52  ;;  %v5582_v2 = vpop.f32.mrb[40].mxu1  ;;  %v992_v28 = vld [vmem:[#allocation4 + $0x10] sm:$0xff]  ;;  %v997_v38 = vadd.f32 %v7209_v21, %v993_v22 }
 0x12a   :  { %v1280_v3 = vadd.f32 1.0, %v6245_v62  ;;  %6254 = vpow2.f32 %v4843_v59  ;;  %v1253_v4 = vpop.f32.mrb[41].mxu1  ;;  %v1259_v26 = vadd.f32 %v5582_v2, %v7190_v6  ;;  %v996_v42 = vadd.f32 %v7215_v27, %v992_v28 }
 0x12b   :  { %6256 = vrcp.f32 %v1281_v63  ;;  %v1254_v33 = vadd.f32 %v7190_v6, %v1253_v4 }
 0x12c   :  { %6258 = vrcp.f32 %v1280_v3 }
 0x12d   :  { %6260 = vpow2.f32 %v4845_v0 }
 0x130   :  { %v6247_v15 = vpop.eup %6246 }
 0x131   :  { %v6249_v17 = vpop.eup %6248  ;;  %v1309_v18 = vadd.f32 1.0, %v6247_v15 }
 0x132   :  { %v6251_v23 = vpop.eup %6250  ;;  %v1319_v24 = vmul.f32 %v6249_v17, %v1249_v10 }
 0x133   :  { %v6253_v31 = vpop.eup %6252  ;;  %v1318_v32 = vmul.f32 %v6251_v23, %v1244_v13  ;;  %6262 = vrcp.f32 %v1309_v18 }
 0x134   :  { %v6255_v34 = vpop.eup %6254  ;;  %v1307_v35 = vadd.f32 1.0, %v6253_v31  ;;  %v1323_v37 = vadd.f32 %v1319_v24, %v995_v16  ;;  %v5501_v24 = vpop.f32.mrb[38].mxu0 }
 0x135   :  { %v6257_v39 = vpop.eup %6256  ;;  %v1306_v40 = vadd.f32 1.0, %v6255_v34  ;;  %v1322_v41 = vadd.f32 %v1318_v32, %v994_v19  ;;  %918 = vst.msk [vmem:[#allocation4 + $0x28] sm:$0xff] %vm388_vm2, %v5501_v24 }
 0x136   :  { %v6259_v43 = vpop.eup %6258  ;;  %6264 = vrcp.f32 %v1307_v35  ;;  %v1321_v44 = vmul.f32 %v6257_v39, %v1259_v26  ;;  %v774_v26 = vpop.f32.mrb[39].mxu0 }
 0x137   :  { %v6261_v45 = vpop.eup %6260  ;;  %6266 = vrcp.f32 %v1306_v40  ;;  %v1320_v46 = vmul.f32 %v6259_v43, %v1254_v33  ;;  %917 = vst.msk [vmem:[#allocation4 + $0x20] sm:$0xff] %vm388_vm2, %v774_v26  ;;  %v5504_v28 = vpop.f32.mrb[40].mxu0 }
 0x138   :  { %v1308_v48 = vadd.f32 1.0, %v6261_v45  ;;  %6268 = vtanh.f32 %v1323_v37  ;;  %v1325_v49 = vadd.f32 %v1321_v44, %v997_v38  ;;  %920 = vst.msk [vmem:[#allocation4 + $0x38] sm:$0xff] %vm388_vm2, %v5504_v28  ;;  %v784_v31 = vpop.f32.mrb[41].mxu0  ;;  %v1355_v28 = vld [vmem:[#allocation3 + $0x28] sm:$0xff] }
 0x139   :  { %6270 = vtanh.f32 %v1322_v41  ;;  %v1324_v51 = vadd.f32 %v1320_v46, %v996_v42  ;;  %919 = vst.msk [vmem:[#allocation4 + $0x30] sm:$0xff] %vm388_vm2, %v784_v31  ;;  %v5507_v32 = vpop.f32.mrb[42].mxu0 }
 0x13a   :  { %6272 = vrcp.f32 %v1308_v48  ;;  %922 = vst.msk [vmem:[#allocation4 + $0x48] sm:$0xff] %vm388_vm2, %v5507_v32  ;;  %v794_v33 = vpop.f32.mrb[43].mxu0 }
 0x13b   :  { %6274 = vtanh.f32 %v1325_v49  ;;  %921 = vst.msk [vmem:[#allocation4 + $0x40] sm:$0xff] %vm388_vm2, %v794_v33  ;;  %v5510_v34 = vpop.f32.mrb[44].mxu0  ;;  %v1354_v33 = vld [vmem:[#allocation3 + $0x20] sm:$0xff] }
 0x13c   :  { %6276 = vtanh.f32 %v1324_v51  ;;  %924 = vst.msk [vmem:[#allocation4 + $0x58] sm:$0xff] %vm388_vm2, %v5510_v34  ;;  %v804_v35 = vpop.f32.mrb[45].mxu0 }
 0x13d   :  { %v6263_v52 = vpop.eup %6262  ;;  %923 = vst.msk [vmem:[#allocation4 + $0x50] sm:$0xff] %vm388_vm2, %v804_v35  ;;  %v5513_v37 = vpop.f32.mrb[46].mxu0 }
 0x13e   :  { %v1333_v4 = vsub.f32 1.0, %v6263_v52  ;;  %v1341_v17 = vmul.f32 0.0, %v6263_v52  ;;  %926 = vst.msk [vmem:[#allocation4 + $0x68] sm:$0xff] %vm388_vm2, %v5513_v37  ;;  %v814_v38 = vpop.f32.mrb[47].mxu0  ;;  %v1359_v37 = vadd.f32 %v7174_v30, %v1355_v28 }
 0x13f   :  { %925 = vst.msk [vmem:[#allocation4 + $0x60] sm:$0xff] %vm388_vm2, %v814_v38  ;;  %v5516_v39 = vpop.f32.mrb[48].mxu0 }
 0x140   :  { %v6265_v54 = vpop.eup %6264  ;;  %928 = vst.msk [vmem:[#allocation4 + $0x78] sm:$0xff] %vm388_vm2, %v5516_v39  ;;  %v824_v40 = vpop.f32.mrb[49].mxu0 }
 0x141   :  { %v6267_v56 = vpop.eup %6266  ;;  %v1331_v57 = vsub.f32 1.0, %v6265_v54  ;;  %v1339_v62 = vmul.f32 0.0, %v6265_v54  ;;  %927 = vst.msk [vmem:[#allocation4 + $0x70] sm:$0xff] %vm388_vm2, %v824_v40  ;;  %v5519_v41 = vpop.f32.mrb[50].mxu0  ;;  %v1358_v40 = vadd.f32 %v7181_v36, %v1354_v33 }
 0x142   :  { %v6269_v59 = vpop.eup %6268  ;;  %v1330_v60 = vsub.f32 1.0, %v6267_v56  ;;  %v1338_v3 = vmul.f32 0.0, %v6267_v56  ;;  %930 = vst.msk [vmem:[#allocation4 + $0x88] sm:$0xff] %vm388_vm2, %v5519_v41  ;;  %v834_v42 = vpop.f32.mrb[51].mxu0  ;;  %v1357_v41 = vld [vmem:[#allocation3 + $0x38] sm:$0xff] }
 0x143   :  { %v6271_v61 = vpop.eup %6270  ;;  %v1335_v63 = vmul.f32 %v6269_v59, %v1331_v57  ;;  %929 = vst.msk [vmem:[#allocation4 + $0x80] sm:$0xff] %vm388_vm2, %v834_v42  ;;  %v5522_v43 = vpop.f32.mrb[52].mxu0 }
 0x144   :  { %v6273_v0 = vpop.eup %6272  ;;  %v1334_v2 = vmul.f32 %v6271_v61, %v1330_v60  ;;  %932 = vst.msk [vmem:[#allocation4 + $0x98] sm:$0xff] %vm388_vm2, %v5522_v43  ;;  %v844_v44 = vpop.f32.mrb[53].mxu0 }
 0x145   :  { %v6275_v9 = vpop.eup %6274  ;;  %v7220_v10 = vadd.f32 %v1339_v62, %v1335_v63  ;;  %v1332_v12 = vsub.f32 1.0, %v6273_v0  ;;  %v1340_v19 = vmul.f32 0.0, %v6273_v0  ;;  %931 = vst.msk [vmem:[#allocation4 + $0x90] sm:$0xff] %vm388_vm2, %v844_v44  ;;  %v5525_v45 = vpop.f32.mrb[54].mxu0  ;;  %v1347_v62 = vld [vmem:[#allocation2 + $0x28] sm:$0xff]  ;;  %v1346_v63 = vld [vmem:[#allocation2 + $0x20] sm:$0xff] }
 0x146   :  { %v6277_v13 = vpop.eup %6276  ;;  %v7222_v15 = vadd.f32 %v1338_v3, %v1334_v2  ;;  %v1337_v16 = vmul.f32 %v6275_v9, %v1333_v4  ;;  %934 = vst.msk [vmem:[#allocation4 + $0xa8] sm:$0xff] %vm388_vm2, %v5525_v45  ;;  %v854_v46 = vpop.f32.mrb[55].mxu0  ;;  %v1351_v0 = vadd.f32 %v1347_v62, %v7131_v55  ;;  %v1350_v3 = vadd.f32 %v1346_v63, %v7138_v58  ;;  %v1349_v4 = vld [vmem:[#allocation2 + $0x38] sm:$0xff]  ;;  %v1356_v44 = vld [vmem:[#allocation3 + $0x30] sm:$0xff] }
 0x147   :  { %v1336_v18 = vmul.f32 %v6277_v13, %v1332_v12  ;;  %933 = vst.msk [vmem:[#allocation4 + $0xa0] sm:$0xff] %vm388_vm2, %v854_v46  ;;  %v1348_v13 = vld [vmem:[#allocation2 + $0x30] sm:$0xff] }
 0x148   :  { %5591 = vmatprep.mubr.msk.f32.mxu1 %vm388_vm2, %v7222_v15  ;;  %v7226_v22 = vadd.f32 %v1341_v17, %v1337_v16  ;;  %v5528_v48 = vpop.f32.mrb[56].mxu0  ;;  %v1352_v26 = vadd.f32 %v1348_v13, %v7153_v5 }
 0x149   :  { %5592 = vmatmul.mubr.msk.f32.vlgmr.msra.gmra.mrb[42].mxu1 %vm388_vm2, %v7220_v10  ;;  %v7230_v23 = vadd.f32 %v1340_v19, %v1336_v18  ;;  %936 = vst.msk [vmem:[#allocation4 + $0xb8] sm:$0xff] %vm388_vm2, %v5528_v48  ;;  %v864_v49 = vpop.f32.mrb[57].mxu0  ;;  %v1353_v18 = vadd.f32 %v1349_v4, %v7147_v1  ;;  %v1361_v48 = vadd.f32 %v7162_v25, %v1357_v41 }
 0x14a   :  { %6014 = vmatpush3.bf16.msra.mxu1 %v6744_v20  ;;  %935 = vst.msk [vmem:[#allocation4 + $0xb0] sm:$0xff] %vm388_vm2, %v864_v49 }
 0x14b   :  { %5594 = vmatprep.mubr.msk.f32.mxu1 %vm388_vm2, %v7230_v23  ;;  %6016 = vmatprep.subr.bf16.mxu1 %v6964_v47 }
 0x14c   :  { %v5531_v51 = vpop.f32.mrb[58].mxu0 }
 0x14d   :  { %5595 = vmatmul.mubr.msk.f32.gmra.mrb[44].mxu1 %vm388_vm2, %v7226_v22  ;;  %938 = vst.msk [vmem:[#allocation4 + $0xc8] sm:$0xff] %vm388_vm2, %v5531_v51  ;;  %v874_v52 = vpop.f32.mrb[59].mxu0 }
 0x14e   :  { %6018 = vmatpush3.bf16.msra.mxu1 %v6964_v47  ;;  %5605 = vmatprep.mubr.msk.f32.mxu1 %vm388_vm2, %v7222_v15  ;;  %937 = vst.msk [vmem:[#allocation4 + $0xc0] sm:$0xff] %vm388_vm2, %v874_v52  ;;  %v1360_v52 = vadd.f32 %v7169_v29, %v1356_v44 }
 0x14f   :  { %6020 = vmatprep.subr.bf16.mxu1 %v6978_v50 }
 0x150   :  { %v5534_v54 = vpop.f32.mrb[60].mxu0 }
 0x151   :  { %5606 = vmatmul.mubr.msk.f32.vlgmr.msra.gmra.mrb[46].mxu1 %vm388_vm2, %v7220_v10  ;;  %940 = vst.msk [vmem:[#allocation4 + $0xd8] sm:$0xff] %vm388_vm2, %v5534_v54  ;;  %v884_v56 = vpop.f32.mrb[61].mxu0 }
 0x152   :  { %5608 = vmatprep.mubr.msk.f32.mxu1 %vm388_vm2, %v7230_v23  ;;  %6022 = vmatpush3.bf16.msra.mxu1 %v6978_v50  ;;  %939 = vst.msk [vmem:[#allocation4 + $0xd0] sm:$0xff] %vm388_vm2, %v884_v56 }
 0x153   :  { %6024 = vmatprep.subr.bf16.mxu1 %v6994_v53 }
 0x154   :  { %v5537_v57 = vpop.f32.mrb[62].mxu0 }
 0x155   :  { %5609 = vmatmul.mubr.msk.f32.gmra.mrb[48].mxu1 %vm388_vm2, %v7226_v22  ;;  %942 = vst.msk [vmem:[#allocation4 + $0xe8] sm:$0xff] %vm388_vm2, %v5537_v57  ;;  %v894_v59 = vpop.f32.mrb[63].mxu0 }
 0x156   :  { %6026 = vmatpush3.bf16.msra.mxu1 %v6994_v53  ;;  %5619 = vmatprep.mubr.msk.f32.mxu1 %vm388_vm2, %v7222_v15  ;;  %941 = vst.msk [vmem:[#allocation4 + $0xe0] sm:$0xff] %vm388_vm2, %v894_v59 }
 0x157   :  { %6028 = vmatprep.subr.bf16.mxu1 %v6668_v8 }
 0x158   :  { %v5540_v60 = vpop.f32.mrb[64].mxu0 }
 0x159   :  { %5620 = vmatmul.mubr.msk.f32.vlgmr.msra.gmra.mrb[50].mxu1 %vm388_vm2, %v7220_v10  ;;  %944 = vst.msk [vmem:[#allocation4 + $0xf8] sm:$0xff] %vm388_vm2, %v5540_v60  ;;  %v904_v61 = vpop.f32.mrb[65].mxu0 }
 0x15a   :  { %5622 = vmatprep.mubr.msk.f32.mxu1 %vm388_vm2, %v7230_v23  ;;  %6030 = vmatpush3.bf16.msra.mxu1 %v6668_v8  ;;  %943 = vst.msk [vmem:[#allocation4 + $0xf0] sm:$0xff] %vm388_vm2, %v904_v61 }
 0x15b   :  { %6032 = vmatprep.subr.bf16.mxu1 %v6709_v14 }
 0x15d   :  { %5623 = vmatmul.mubr.msk.f32.gmra.mrb[52].mxu1 %vm388_vm2, %v7226_v22 }
 0x15e   :  { %6034 = vmatpush3.bf16.msra.mxu1 %v6709_v14 }
 0x15f   :  { %6036 = vmatprep.subr.bf16.mxu1 %v6744_v20 }
 0x21c   :  { %v5593_v2 = vpop.f32.mrb[42].mxu1 }
 0x21d   :  { %v1638_v9 = vadd.f32 %v5593_v2, %v1351_v0  ;;  %v1448_v12 = vpop.f32.mrb[43].mxu1 }
 0x21e   :  { %v1637_v16 = vadd.f32 %v1448_v12, %v1350_v3 }
 0x21f   :  { %v4860_v17 = vmul.f32 -1.442695, %v1638_v9 }
 0x220   :  { %v4859_v19 = vmul.f32 -1.442695, %v1637_v16  ;;  %v5596_v24 = vpop.f32.mrb[44].mxu1 }
 0x221   :  { %6278 = vpow2.f32 %v4860_v17  ;;  %v1640_v31 = vadd.f32 %v5596_v24, %v1353_v18  ;;  %v1458_v32 = vpop.f32.mrb[45].mxu1  ;;  %v1363_v24 = vld [vmem:[#allocation4 + $0x28] sm:$0xff] }
 0x222   :  { %6280 = vpow2.f32 %v4859_v19  ;;  %v1639_v34 = vadd.f32 %v1458_v32, %v1352_v26  ;;  %v1362_v26 = vld [vmem:[#allocation4 + $0x20] sm:$0xff] }
 0x223   :  { %v4862_v35 = vmul.f32 -1.442695, %v1640_v31 }
 0x224   :  { %v4861_v38 = vmul.f32 -1.442695, %v1639_v34  ;;  %v5607_v39 = vpop.f32.mrb[46].mxu1  ;;  %v1367_v34 = vadd.f32 %v7195_v7, %v1363_v24 }
 0x225   :  { %6282 = vpow2.f32 %v4862_v35  ;;  %v1666_v42 = vadd.f32 %v5607_v39, %v1359_v37  ;;  %v1533_v43 = vpop.f32.mrb[47].mxu1  ;;  %v1365_v35 = vld [vmem:[#allocation4 + $0x38] sm:$0xff] }
 0x226   :  { %6284 = vpow2.f32 %v4861_v38  ;;  %v1665_v45 = vadd.f32 %v1533_v43, %v1358_v40  ;;  %v1366_v40 = vadd.f32 %v7201_v11, %v1362_v26  ;;  %v1364_v43 = vld [vmem:[#allocation4 + $0x30] sm:$0xff] }
 0x227   :  { %v4864_v46 = vmul.f32 -1.442695, %v1666_v42 }
 0x228   :  { %v4863_v49 = vmul.f32 -1.442695, %v1665_v45  ;;  %v5610_v51 = vpop.f32.mrb[48].mxu1 }
 0x229   :  { %6286 = vpow2.f32 %v4864_v46  ;;  %v1668_v54 = vadd.f32 %v5610_v51, %v1361_v48  ;;  %v1543_v56 = vpop.f32.mrb[49].mxu1  ;;  %v1369_v46 = vadd.f32 %v7209_v21, %v1365_v35 }
 0x22a   :  { %6288 = vpow2.f32 %v4863_v49  ;;  %v1667_v57 = vadd.f32 %v1543_v56, %v1360_v52 }
 0x22b   :  { %v6279_v59 = vpop.eup %6278  ;;  %v4866_v60 = vmul.f32 -1.442695, %v1668_v54 }
 0x22c   :  { %v6281_v61 = vpop.eup %6280  ;;  %v1654_v62 = vadd.f32 1.0, %v6279_v59  ;;  %v4865_v63 = vmul.f32 -1.442695, %v1667_v57  ;;  %v5621_v0 = vpop.f32.mrb[50].mxu1  ;;  %v1368_v57 = vadd.f32 %v7215_v27, %v1364_v43 }
 0x22d   :  { %v1653_v2 = vadd.f32 1.0, %v6281_v61  ;;  %6290 = vpow2.f32 %v4866_v60  ;;  %v1618_v3 = vpop.f32.mrb[51].mxu1  ;;  %v1624_v33 = vadd.f32 %v5621_v0, %v7190_v6 }
 0x22e   :  { %6292 = vrcp.f32 %v1654_v62  ;;  %v1619_v39 = vadd.f32 %v7190_v6, %v1618_v3 }
 0x22f   :  { %v6283_v4 = vpop.eup %6282  ;;  %6294 = vrcp.f32 %v1653_v2 }
 0x230   :  { %v6285_v9 = vpop.eup %6284  ;;  %v1656_v12 = vadd.f32 1.0, %v6283_v4  ;;  %6296 = vpow2.f32 %v4865_v63  ;;  %v5624_v13 = vpop.f32.mrb[52].mxu1 }
 0x231   :  { %v1655_v16 = vadd.f32 1.0, %v6285_v9  ;;  %v1628_v17 = vpop.f32.mrb[53].mxu1  ;;  %v1634_v49 = vadd.f32 %v5624_v13, %v7190_v6 }
 0x232   :  { %6298 = vrcp.f32 %v1656_v12  ;;  %v1629_v54 = vadd.f32 %v7190_v6, %v1628_v17 }
 0x233   :  { %v6287_v18 = vpop.eup %6286  ;;  %6300 = vrcp.f32 %v1655_v16 }
 0x234   :  { %v6289_v19 = vpop.eup %6288  ;;  %v1682_v32 = vadd.f32 1.0, %v6287_v18 }
 0x235   :  { %v1681_v28 = vadd.f32 1.0, %v6289_v19 }
 0x237   :  { %v6291_v31 = vpop.eup %6290  ;;  %6302 = vrcp.f32 %v1681_v28 }
 0x238   :  { %v6293_v37 = vpop.eup %6292  ;;  %v1684_v38 = vadd.f32 1.0, %v6291_v31  ;;  %6304 = vrcp.f32 %v1682_v32 }
 0x239   :  { %v6295_v41 = vpop.eup %6294  ;;  %v1694_v42 = vmul.f32 %v6293_v37, %v1624_v33 }
 0x23a   :  { %v6297_v44 = vpop.eup %6296  ;;  %v1693_v45 = vmul.f32 %v6295_v41, %v1619_v39  ;;  %6306 = vrcp.f32 %v1684_v38  ;;  %v1721_v39 = vld [vmem:[#allocation2 + $0x40] sm:$0xff] }
 0x23b   :  { %v1683_v48 = vadd.f32 1.0, %v6297_v44  ;;  %v1698_v51 = vadd.f32 %v1694_v42, %v1367_v34  ;;  %v1725_v43 = vadd.f32 %v1721_v39, %v7138_v58  ;;  %v1724_v44 = vld [vmem:[#allocation2 + $0x58] sm:$0xff] }
 0x23c   :  { %v6299_v52 = vpop.eup %6298  ;;  %v1697_v56 = vadd.f32 %v1693_v45, %v1366_v40 }
 0x23d   :  { %v6301_v59 = vpop.eup %6300  ;;  %6308 = vrcp.f32 %v1683_v48  ;;  %v1696_v60 = vmul.f32 %v6299_v52, %v1634_v49  ;;  %v1723_v49 = vld [vmem:[#allocation2 + $0x50] sm:$0xff] }
 0x23e   :  { %v1695_v61 = vmul.f32 %v6301_v59, %v1629_v54  ;;  %6310 = vtanh.f32 %v1697_v56  ;;  %v1728_v54 = vadd.f32 %v1724_v44, %v7147_v1 }
 0x23f   :  { %6312 = vtanh.f32 %v1698_v51  ;;  %v1700_v62 = vadd.f32 %v1696_v60, %v1369_v46  ;;  %v1730_v60 = vld [vmem:[#allocation3 + $0x48] sm:$0xff] }
 0x240   :  { %v1699_v63 = vadd.f32 %v1695_v61, %v1368_v57 }
 0x241   :  { %6314 = vtanh.f32 %v1700_v62  ;;  %v6303_v0 = vpop.eup %6302 }
 0x242   :  { %6316 = vtanh.f32 %v1699_v63  ;;  %v6305_v2 = vpop.eup %6304  ;;  %v1705_v9 = vsub.f32 1.0, %v6303_v0  ;;  %v1713_v18 = vmul.f32 %v6303_v0, %v7222_v15  ;;  %v1729_v63 = vld [vmem:[#allocation3 + $0x40] sm:$0xff] }
 0x243   :  { %v1706_v13 = vsub.f32 1.0, %v6305_v2  ;;  %v1714_v19 = vmul.f32 %v6305_v2, %v7220_v10 }
 0x244   :  { %v6307_v3 = vpop.eup %6306 }
 0x245   :  { %v1708_v26 = vsub.f32 1.0, %v6307_v3  ;;  %v1716_v37 = vmul.f32 %v6307_v3, %v7226_v22  ;;  %v1734_v3 = vadd.f32 %v7174_v30, %v1730_v60 }
 0x247   :  { %v6309_v4 = vpop.eup %6308 }
 0x248   :  { %v6311_v12 = vpop.eup %6310  ;;  %v1707_v32 = vsub.f32 1.0, %v6309_v4  ;;  %v1715_v10 = vmul.f32 %v6309_v4, %v7230_v23  ;;  %v1722_v23 = vld [vmem:[#allocation2 + $0x48] sm:$0xff] }
 0x249   :  { %v6313_v16 = vpop.eup %6312  ;;  %v1709_v17 = vmul.f32 %v6311_v12, %v1705_v9  ;;  %v1726_v40 = vadd.f32 %v1722_v23, %v7131_v55  ;;  %v1727_v55 = vadd.f32 %v1723_v49, %v7153_v5  ;;  %v1733_v9 = vadd.f32 %v7181_v36, %v1729_v63  ;;  %v1732_v12 = vld [vmem:[#allocation3 + $0x58] sm:$0xff]  ;;  %v1738_v49 = vld [vmem:[#allocation4 + $0x48] sm:$0xff] }
 0x24a   :  { %v1710_v24 = vmul.f32 %v6313_v16, %v1706_v13  ;;  %v1731_v16 = vld [vmem:[#allocation3 + $0x50] sm:$0xff] }
 0x24b   :  { %v6315_v28 = vpop.eup %6314  ;;  %v7310_v31 = vadd.f32 %v1713_v18, %v1709_v17 }
 0x24c   :  { %v6317_v33 = vpop.eup %6316  ;;  %v7312_v34 = vadd.f32 %v1714_v19, %v1710_v24  ;;  %v1712_v35 = vmul.f32 %v6315_v28, %v1708_v26  ;;  %v1736_v19 = vadd.f32 %v7162_v25, %v1732_v12  ;;  %v1735_v28 = vadd.f32 %v7169_v29, %v1731_v16 }
 0x24d   :  { %5633 = vmatprep.mubr.msk.f32.mxu1 %vm388_vm2, %v7310_v31  ;;  %5661 = vmatprep.mubr.msk.f32.mxu0 %vm388_vm2, %v7310_v31  ;;  %v1711_v15 = vmul.f32 %v6317_v33, %v1707_v32 }
 0x24e   :  { %5634 = vmatmul.mubr.msk.f32.vlgmr.msra.gmra.mrb[54].mxu1 %vm388_vm2, %v7312_v34  ;;  %5662 = vmatmul.mubr.msk.f32.vlgmr.msra.gmra.mrb[66].mxu0 %vm388_vm2, %v7312_v34  ;;  %v7324_v38 = vadd.f32 %v1716_v37, %v1712_v35 }
 0x24f   :  { %6038 = vmatpush3.bf16.msra.mxu1 %v6744_v20  ;;  %v7327_v22 = vadd.f32 %v1715_v10, %v1711_v15  ;;  %6062 = vmatpush3.bf16.msra.mxu0 %v6744_v20 }
 0x250   :  { %6040 = vmatprep.subr.bf16.mxu1 %v6964_v47  ;;  %6064 = vmatprep.subr.bf16.mxu0 %v6964_v47 }
 0x251   :  { %5636 = vmatprep.mubr.msk.f32.mxu1 %vm388_vm2, %v7327_v22  ;;  %5664 = vmatprep.mubr.msk.f32.mxu0 %vm388_vm2, %v7327_v22 }
 0x252   :  { %5637 = vmatmul.mubr.msk.f32.gmra.mrb[56].mxu1 %vm388_vm2, %v7324_v38  ;;  %5665 = vmatmul.mubr.msk.f32.gmra.mrb[68].mxu0 %vm388_vm2, %v7324_v38 }
 0x253   :  { %6042 = vmatpush3.bf16.msra.mxu1 %v6964_v47  ;;  %5647 = vmatprep.mubr.msk.f32.mxu1 %vm388_vm2, %v7310_v31 }
 0x254   :  { %6052 = vmatprep.subr.bf16.mxu1 %v6668_v8  ;;  %6066 = vmatpush3.bf16.msra.mxu0 %v6964_v47 }
 0x255   :  { %6076 = vmatprep.subr.bf16.mxu0 %v6668_v8 }
 0x256   :  { %5648 = vmatmul.mubr.msk.f32.vlgmr.msra.gmra.mrb[58].mxu1 %vm388_vm2, %v7312_v34 }
 0x257   :  { %5650 = vmatprep.mubr.msk.f32.mxu1 %vm388_vm2, %v7327_v22  ;;  %6054 = vmatpush3.bf16.msra.mxu1 %v6668_v8 }
 0x258   :  { %6056 = vmatprep.subr.bf16.mxu1 %v6709_v14 }
 0x25a   :  { %5651 = vmatmul.mubr.msk.f32.gmra.mrb[60].mxu1 %vm388_vm2, %v7324_v38 }
 0x25b   :  { %6058 = vmatpush3.bf16.msra.mxu1 %v6709_v14 }
 0x25c   :  { %6068 = vmatprep.subr.bf16.mxu1 %v6978_v50 }
 0x321   :  { %v5635_v41 = vpop.f32.mrb[54].mxu1  ;;  %v7357_v42 = vpop.f32.mrb[66].mxu0 }
 0x322   :  { %v2013_v45 = vadd.f32 %v5635_v41, %v1726_v40  ;;  %v1823_v46 = vpop.f32.mrb[55].mxu1  ;;  %v7360_v48 = vpop.f32.mrb[67].mxu0 }
 0x323   :  { %v2012_v51 = vadd.f32 %v1823_v46, %v1725_v43 }
 0x324   :  { %v4880_v52 = vmul.f32 -1.442695, %v2013_v45 }
 0x325   :  { %v4879_v56 = vmul.f32 -1.442695, %v2012_v51  ;;  %v5638_v57 = vpop.f32.mrb[56].mxu1  ;;  %v7363_v59 = vpop.f32.mrb[68].mxu0 }
 0x326   :  { %6318 = vpow2.f32 %v4880_v52  ;;  %v2015_v61 = vadd.f32 %v5638_v57, %v1728_v54  ;;  %v1833_v58 = vpop.f32.mrb[57].mxu1  ;;  %v7366_v62 = vpop.f32.mrb[69].mxu0  ;;  %v1999_v54 = vadd.f32 %v7357_v42, %v7190_v6  ;;  %v2009_v42 = vadd.f32 %v7363_v59, %v7190_v6 }
 0x327   :  { %6320 = vpow2.f32 %v4879_v56  ;;  %v2014_v0 = vadd.f32 %v1833_v58, %v1727_v55  ;;  %v1737_v56 = vld [vmem:[#allocation4 + $0x40] sm:$0xff]  ;;  %v1994_v55 = vadd.f32 %v7190_v6, %v7360_v48  ;;  %v1742_v58 = vadd.f32 %v7195_v7, %v1738_v49 }
 0x328   :  { %v4882_v2 = vmul.f32 -1.442695, %v2015_v61  ;;  %v2104_v49 = vld [vmem:[#allocation3 + $0x60] sm:$0xff] }
 0x329   :  { %v4881_v4 = vmul.f32 -1.442695, %v2014_v0  ;;  %v5649_v1 = vpop.f32.mrb[58].mxu1 }
 0x32a   :  { %6322 = vpow2.f32 %v4882_v2  ;;  %v2041_v13 = vadd.f32 %v5649_v1, %v1734_v3  ;;  %v1908_v5 = vpop.f32.mrb[59].mxu1  ;;  %v1741_v2 = vadd.f32 %v7201_v11, %v1737_v56 }
 0x32b   :  { %6324 = vpow2.f32 %v4881_v4  ;;  %v2040_v17 = vadd.f32 %v1908_v5, %v1733_v9  ;;  %v1740_v4 = vld [vmem:[#allocation4 + $0x58] sm:$0xff]  ;;  %v1739_v9 = vld [vmem:[#allocation4 + $0x50] sm:$0xff]  ;;  %v2004_v5 = vadd.f32 %v7190_v6, %v7366_v62 }
 0x32c   :  { %v4884_v18 = vmul.f32 -1.442695, %v2041_v13  ;;  %v1744_v16 = vadd.f32 %v7209_v21, %v1740_v4 }
 0x32d   :  { %v4883_v24 = vmul.f32 -1.442695, %v2040_v17  ;;  %v5652_v26 = vpop.f32.mrb[60].mxu1  ;;  %v1743_v17 = vadd.f32 %v7215_v27, %v1739_v9 }
 0x32e   :  { %6326 = vpow2.f32 %v4884_v18  ;;  %v2043_v32 = vadd.f32 %v5652_v26, %v1736_v19  ;;  %v1918_v33 = vpop.f32.mrb[61].mxu1 }
 0x32f   :  { %6328 = vpow2.f32 %v4883_v24  ;;  %v2042_v35 = vadd.f32 %v1918_v33, %v1735_v28 }
 0x330   :  { %v6319_v37 = vpop.eup %6318  ;;  %v4886_v15 = vmul.f32 -1.442695, %v2043_v32 }
 0x331   :  { %v6321_v10 = vpop.eup %6320  ;;  %v2029_v23 = vadd.f32 1.0, %v6319_v37  ;;  %v4885_v39 = vmul.f32 -1.442695, %v2042_v35 }
 0x332   :  { %v2028_v40 = vadd.f32 1.0, %v6321_v10  ;;  %6330 = vpow2.f32 %v4886_v15 }
 0x333   :  { %6332 = vrcp.f32 %v2029_v23 }
 0x334   :  { %v6323_v41 = vpop.eup %6322  ;;  %6334 = vrcp.f32 %v2028_v40 }
 0x335   :  { %v6325_v25 = vpop.eup %6324  ;;  %v2031_v43 = vadd.f32 1.0, %v6323_v41  ;;  %6336 = vpow2.f32 %v4885_v39 }
 0x336   :  { %v2030_v44 = vadd.f32 1.0, %v6325_v25 }
 0x337   :  { %6338 = vrcp.f32 %v2031_v43 }
 0x338   :  { %v6327_v29 = vpop.eup %6326  ;;  %6340 = vrcp.f32 %v2030_v44 }
 0x339   :  { %v6329_v45 = vpop.eup %6328  ;;  %v2057_v46 = vadd.f32 1.0, %v6327_v29 }
 0x33a   :  { %v2056_v51 = vadd.f32 1.0, %v6329_v45  ;;  %v2105_v45 = vld [vmem:[#allocation3 + $0x68] sm:$0xff] }
 0x33b   :  { %6342 = vrcp.f32 %v2057_v46  ;;  %v2096_v46 = vld [vmem:[#allocation2 + $0x60] sm:$0xff] }
 0x33c   :  { %v6331_v52 = vpop.eup %6330  ;;  %6344 = vrcp.f32 %v2056_v51  ;;  %v7435_v51 = vld [vmem:[%s7960_s2 + $0x8] sm:$0xff] }
 0x33d   :  { %v6333_v57 = vpop.eup %6332  ;;  %v2059_v60 = vadd.f32 1.0, %v6331_v52 }
 0x33e   :  { %v6335_v61 = vpop.eup %6334  ;;  %v2069_v63 = vmul.f32 %v6333_v57, %v1999_v54  ;;  %v2109_v54 = vadd.f32 %v7174_v30, %v2105_v45 }
 0x33f   :  { %v6337_v0 = vpop.eup %6336  ;;  %v2068_v3 = vmul.f32 %v6335_v61, %v1994_v55  ;;  %6346 = vrcp.f32 %v2059_v60  ;;  %v7442_v55 = vld [vmem:[%s7960_s2] sm:$0xff]  ;;  %v2108_v61 = vadd.f32 %v7181_v36, %v2104_v49  ;;  %v7455_v36 = vld [vmem:[%s7960_s2 + $0x38] sm:$0xff] }
 0x340   :  { %v2073_v1 = vadd.f32 %v2069_v63, %v1742_v58  ;;  %v2058_v12 = vadd.f32 1.0, %v6337_v0  ;;  %v2100_v60 = vadd.f32 %v7442_v55, %v2096_v46  ;;  %v2099_v58 = vld [vmem:[#allocation2 + $0x78] sm:$0xff] }
 0x341   :  { %v6339_v13 = vpop.eup %6338  ;;  %v2072_v48 = vadd.f32 %v2068_v3, %v1741_v2  ;;  %v2107_v63 = vld [vmem:[#allocation3 + $0x78] sm:$0xff] }
 0x342   :  { %v6341_v7 = vpop.eup %6340  ;;  %6348 = vtanh.f32 %v2073_v1  ;;  %v2071_v11 = vmul.f32 %v6339_v13, %v2009_v42  ;;  %v2098_v1 = vld [vmem:[#allocation2 + $0x70] sm:$0xff]  ;;  %v7449_v13 = vld [vmem:[%s7960_s2 + $0x18] sm:$0xff] }
 0x343   :  { %6350 = vtanh.f32 %v2072_v48  ;;  %v2070_v18 = vmul.f32 %v6341_v7, %v2004_v5  ;;  %v2106_v42 = vld [vmem:[#allocation3 + $0x70] sm:$0xff]  ;;  %v2103_v48 = vadd.f32 %v7449_v13, %v2099_v58  ;;  %v2111_v5 = vadd.f32 %v7455_v36, %v2107_v63  ;;  %v7473_v63 = vld [vmem:[%s7961_s4] ss:$0 sm:$0xff] }
 0x344   :  { %v2075_v19 = vadd.f32 %v2071_v11, %v1744_v16  ;;  %6352 = vrcp.f32 %v2058_v12 }
 0x345   :  { %v2074_v59 = vadd.f32 %v2070_v18, %v1743_v17  ;;  %v6343_v24 = vpop.eup %6342  ;;  %v7461_v17 = vld [vmem:[%s7960_s2 + $0x10] sm:$0xff] }
 0x346   :  { %6354 = vtanh.f32 %v2075_v19  ;;  %v6345_v26 = vpop.eup %6344  ;;  %v2081_v32 = vsub.f32 1.0, %v6343_v24  ;;  %v2089_v21 = vmul.f32 %v6343_v24, %v7312_v34  ;;  %v2102_v18 = vadd.f32 %v7461_v17, %v2098_v1  ;;  %v7467_v19 = vld [vmem:[%s7960_s2 + $0x30] sm:$0xff]  ;;  %v7479_v1 = vld [vmem:[%s7960_s2 + $0x48] sm:$0xff] }
 0x347   :  { %6356 = vtanh.f32 %v2074_v59  ;;  %v2080_v62 = vsub.f32 1.0, %v6345_v26  ;;  %v2088_v27 = vmul.f32 %v6345_v26, %v7310_v31  ;;  %v2110_v59 = vadd.f32 %v7467_v19, %v2106_v42 }
 0x349   :  { %v6347_v28 = vpop.eup %6346 }
 0x34a   :  { %v2083_v23 = vsub.f32 1.0, %v6347_v28  ;;  %v2091_v44 = vmul.f32 %v6347_v28, %v7324_v38 }
 0x34c   :  { %v6349_v6 = vpop.eup %6348 }
 0x34d   :  { %v6351_v33 = vpop.eup %6350  ;;  %v2085_v35 = vmul.f32 %v6349_v6, %v2081_v32 }
 0x34e   :  { %v6353_v37 = vpop.eup %6352  ;;  %v2084_v15 = vmul.f32 %v6351_v33, %v2080_v62 }
 0x34f   :  { %v7386_v10 = vadd.f32 %v2089_v21, %v2085_v35  ;;  %v2082_v41 = vsub.f32 1.0, %v6353_v37  ;;  %v2090_v31 = vmul.f32 %v6353_v37, %v7327_v22  ;;  %v2097_v22 = vld [vmem:[#allocation2 + $0x68] sm:$0xff] }
 0x350   :  { %v6355_v39 = vpop.eup %6354  ;;  %v7388_v40 = vadd.f32 %v2088_v27, %v2084_v15  ;;  %v2101_v52 = vadd.f32 %v7435_v51, %v2097_v22 }
 0x351   :  { %v6357_v25 = vpop.eup %6356  ;;  %v2087_v43 = vmul.f32 %v6355_v39, %v2083_v23 }
 0x352   :  { %5675 = vmatprep.mubr.msk.f32.mxu1 %vm388_vm2, %v7388_v40  ;;  %5689 = vmatprep.mubr.msk.f32.mxu0 %vm388_vm2, %v7388_v40  ;;  %v2086_v34 = vmul.f32 %v6357_v25, %v2082_v41 }
 0x353   :  { %5676 = vmatmul.mubr.msk.f32.vlgmr.msra.gmra.mrb[62].mxu1 %vm388_vm2, %v7386_v10  ;;  %5690 = vmatmul.mubr.msk.f32.vlgmr.msra.gmra.mrb[70].mxu0 %vm388_vm2, %v7386_v10  ;;  %v7400_v29 = vadd.f32 %v2091_v44, %v2087_v43 }
 0x354   :  { %6070 = vmatpush3.bf16.msra.mxu1 %v6978_v50  ;;  %v7403_v38 = vadd.f32 %v2090_v31, %v2086_v34  ;;  %6078 = vmatpush3.bf16.msra.mxu0 %v6668_v8 }
 0x355   :  { %6072 = vmatprep.subr.bf16.mxu1 %v6994_v53  ;;  %6080 = vmatprep.subr.bf16.mxu0 %v6709_v14 }
 0x356   :  { %5678 = vmatprep.mubr.msk.f32.mxu1 %vm388_vm2, %v7403_v38  ;;  %5692 = vmatprep.mubr.msk.f32.mxu0 %vm388_vm2, %v7403_v38 }
 0x357   :  { %5679 = vmatmul.mubr.msk.f32.gmra.mrb[64].mxu1 %vm388_vm2, %v7400_v29  ;;  %5693 = vmatmul.mubr.msk.f32.gmra.mrb[72].mxu0 %vm388_vm2, %v7400_v29 }
 0x358   :  { %6074 = vmatpush3.bf16.msra.mxu1 %v6994_v53  ;;  %5703 = vmatprep.mubr.msk.f32.mxu1 %vm388_vm2, %v7388_v40 }
 0x359   :  { %6084 = vmatprep.subr.bf16.mxu1 %v6744_v20  ;;  %6082 = vmatpush3.bf16.msra.mxu0 %v6709_v14 }
 0x35a   :  { %6092 = vmatprep.subr.bf16.mxu0 %v6978_v50 }
 0x35b   :  { %5704 = vmatmul.mubr.msk.f32.vlgmr.msra.gmra.mrb[66].mxu1 %vm388_vm2, %v7386_v10 }
 0x35c   :  { %5706 = vmatprep.mubr.msk.f32.mxu1 %vm388_vm2, %v7403_v38  ;;  %6086 = vmatpush3.bf16.msra.mxu1 %v6744_v20 }
 0x35d   :  { %6088 = vmatprep.subr.bf16.mxu1 %v6964_v47 }
 0x35f   :  { %5707 = vmatmul.mubr.msk.f32.gmra.mrb[68].mxu1 %vm388_vm2, %v7400_v29 }
 0x360   :  { %6090 = vmatpush3.bf16.msra.mxu1 %v6964_v47 }
 0x361   :  { %6100 = vmatprep.subr.bf16.mxu1 %v6668_v8 }
 0x426   :  { %v5677_v56 = vpop.f32.mrb[62].mxu1  ;;  %v5691_v57 = vpop.f32.mrb[70].mxu0 }
 0x427   :  { %v2388_v0 = vadd.f32 %v5677_v56, %v2101_v52  ;;  %v2416_v2 = vadd.f32 %v5691_v57, %v2109_v54  ;;  %v2198_v3 = vpop.f32.mrb[63].mxu1  ;;  %v2283_v4 = vpop.f32.mrb[71].mxu0 }
 0x428   :  { %v2387_v30 = vadd.f32 %v2198_v3, %v2100_v60  ;;  %v2415_v9 = vadd.f32 %v2283_v4, %v2108_v61  ;;  %v2113_v60 = vld [vmem:[#allocation4 + $0x68] sm:$0xff] }
 0x429   :  { %v4900_v12 = vmul.f32 -1.442695, %v2388_v0  ;;  %v4904_v35 = vmul.f32 -1.442695, %v2416_v2  ;;  %v2112_v2 = vld [vmem:[#allocation4 + $0x60] sm:$0xff]  ;;  %v2117_v42 = vadd.f32 %v7479_v1, %v2113_v60 }
 0x42a   :  { %v4899_v7 = vmul.f32 -1.442695, %v2387_v30  ;;  %v5680_v16 = vpop.f32.mrb[64].mxu1  ;;  %v5694_v11 = vpop.f32.mrb[72].mxu0  ;;  %v4903_v27 = vmul.f32 -1.442695, %v2415_v9 }
 0x42b   :  { %6358 = vpow2.f32 %v4900_v12  ;;  %v2390_v24 = vadd.f32 %v5680_v16, %v2103_v48  ;;  %v2418_v26 = vadd.f32 %v5694_v11, %v2111_v5  ;;  %v2208_v28 = vpop.f32.mrb[65].mxu1  ;;  %v2293_v32 = vpop.f32.mrb[73].mxu0  ;;  %v2115_v12 = vld [vmem:[#allocation4 + $0x78] sm:$0xff] }
 0x42c   :  { %v2389_v6 = vadd.f32 %v2208_v28, %v2102_v18  ;;  %v2417_v62 = vadd.f32 %v2293_v32, %v2110_v59  ;;  %6360 = vpow2.f32 %v4899_v7  ;;  %v7486_v7 = vld [vmem:[%s7960_s2 + $0x40] sm:$0xff]  ;;  %v2114_v32 = vld [vmem:[#allocation4 + $0x70] sm:$0xff] }
 0x42d   :  { %v4902_v33 = vmul.f32 -1.442695, %v2390_v24  ;;  %v4906_v23 = vmul.f32 -1.442695, %v2418_v26  ;;  %v2116_v16 = vadd.f32 %v7486_v7, %v2112_v2  ;;  %v7493_v26 = vld [vmem:[%s7960_s2 + $0x58] sm:$0xff] }
 0x42e   :  { %v4901_v21 = vmul.f32 -1.442695, %v2389_v6  ;;  %v5705_v37 = vpop.f32.mrb[66].mxu1  ;;  %v4905_v41 = vmul.f32 -1.442695, %v2417_v62  ;;  %v2119_v28 = vadd.f32 %v7493_v26, %v2115_v12  ;;  %v7555_v12 = vld [vmem:[%s7960_s2 + $0x28] sm:$0xff] }
 0x42f   :  { %6362 = vpow2.f32 %v4902_v33  ;;  %v2368_v15 = vpop.f32.mrb[67].mxu1  ;;  %v2374_v0 = vadd.f32 %v7473_v63, %v5705_v37  ;;  %v7500_v37 = vld [vmem:[%s7960_s2 + $0x50] sm:$0xff] }
 0x430   :  { %6364 = vpow2.f32 %v4901_v21  ;;  %v2369_v9 = vadd.f32 %v7473_v63, %v2368_v15  ;;  %v2118_v15 = vadd.f32 %v7500_v37, %v2114_v32 }
 0x431   :  { %6366 = vpow2.f32 %v4904_v35 }
 0x432   :  { %v5708_v39 = vpop.f32.mrb[68].mxu1  ;;  %6368 = vpow2.f32 %v4903_v27 }
 0x433   :  { %v2378_v25 = vpop.f32.mrb[69].mxu1  ;;  %6370 = vpow2.f32 %v4906_v23  ;;  %v2384_v59 = vadd.f32 %v7473_v63, %v5708_v39 }
 0x434   :  { %6372 = vpow2.f32 %v4905_v41  ;;  %v2379_v33 = vadd.f32 %v7473_v63, %v2378_v25 }
 0x435   :  { %v6359_v43 = vpop.eup %6358 }
 0x436   :  { %v2404_v44 = vadd.f32 1.0, %v6359_v43  ;;  %v6361_v34 = vpop.eup %6360 }
 0x437   :  { %v2403_v31 = vadd.f32 1.0, %v6361_v34 }
 0x438   :  { %6374 = vrcp.f32 %v2404_v44 }
 0x439   :  { %v6363_v22 = vpop.eup %6362  ;;  %6376 = vrcp.f32 %v2403_v31 }
 0x43a   :  { %v2406_v45 = vadd.f32 1.0, %v6363_v22  ;;  %v6365_v46 = vpop.eup %6364 }
 0x43b   :  { %v6367_v49 = vpop.eup %6366  ;;  %v2405_v52 = vadd.f32 1.0, %v6365_v46 }
 0x43c   :  { %6378 = vrcp.f32 %v2406_v45  ;;  %v6369_v54 = vpop.eup %6368  ;;  %v2432_v57 = vadd.f32 1.0, %v6367_v49 }
 0x43d   :  { %6380 = vrcp.f32 %v2405_v52  ;;  %v6371_v56 = vpop.eup %6370  ;;  %v2431_v58 = vadd.f32 1.0, %v6369_v54 }
 0x43e   :  { %v6373_v61 = vpop.eup %6372  ;;  %v2434_v4 = vadd.f32 1.0, %v6371_v56  ;;  %6382 = vrcp.f32 %v2432_v57 }
 0x43f   :  { %v2433_v5 = vadd.f32 1.0, %v6373_v61  ;;  %6384 = vrcp.f32 %v2431_v58 }
 0x440   :  { %6386 = vrcp.f32 %v2434_v4  ;;  %v2480_v4 = vld [vmem:[#allocation3 + $0x88] sm:$0xff] }
 0x442   :  { %v6375_v3 = vpop.eup %6374 }
 0x443   :  { %v2444_v30 = vmul.f32 %v6375_v3, %v2374_v0  ;;  %v6377_v48 = vpop.eup %6376 }
 0x444   :  { %v2443_v18 = vmul.f32 %v6377_v48, %v2369_v9  ;;  %v2484_v48 = vadd.f32 %v7555_v12, %v2480_v4 }
 0x445   :  { %v2448_v11 = vadd.f32 %v2444_v30, %v2117_v42  ;;  %v2471_v42 = vld [vmem:[#allocation2 + $0x80] sm:$0xff] }
 0x446   :  { %v6379_v24 = vpop.eup %6378  ;;  %v2447_v6 = vadd.f32 %v2443_v18, %v2116_v16  ;;  %v2479_v30 = vld [vmem:[#allocation3 + $0x80] sm:$0xff] }
 0x447   :  { %6388 = vtanh.f32 %v2448_v11  ;;  %v2446_v62 = vmul.f32 %v6379_v24, %v2384_v59  ;;  %v6381_v35 = vpop.eup %6380  ;;  %v2475_v11 = vadd.f32 %v7442_v55, %v2471_v42  ;;  %v7562_v18 = vld [vmem:[%s7960_s2 + $0x20] sm:$0xff]  ;;  %v2474_v24 = vld [vmem:[#allocation2 + $0x98] sm:$0xff] }
 0x448   :  { %6390 = vrcp.f32 %v2433_v5  ;;  %v2445_v27 = vmul.f32 %v6381_v35, %v2379_v33  ;;  %v6383_v39 = vpop.eup %6382  ;;  %v2483_v59 = vadd.f32 %v7562_v18, %v2479_v30  ;;  %v2473_v35 = vld [vmem:[#allocation2 + $0x90] sm:$0xff] }
 0x449   :  { %6392 = vtanh.f32 %v2447_v6  ;;  %v2450_v21 = vadd.f32 %v2446_v62, %v2119_v28  ;;  %v6385_v41 = vpop.eup %6384  ;;  %v2456_v44 = vsub.f32 1.0, %v6383_v39  ;;  %v2464_v31 = vmul.f32 %v6383_v39, %v7386_v10  ;;  %v2482_v28 = vld [vmem:[#allocation3 + $0x98] sm:$0xff] }
 0x44a   :  { %v2449_v23 = vadd.f32 %v2445_v27, %v2118_v15  ;;  %v6387_v43 = vpop.eup %6386  ;;  %v2455_v45 = vsub.f32 1.0, %v6385_v41  ;;  %v2463_v52 = vmul.f32 %v6385_v41, %v7388_v40  ;;  %v2478_v39 = vadd.f32 %v7449_v13, %v2474_v24 }
 0x44b   :  { %6394 = vtanh.f32 %v2450_v21  ;;  %v2458_v56 = vsub.f32 1.0, %v6387_v43  ;;  %v2466_v0 = vmul.f32 %v6387_v43, %v7400_v29  ;;  %v2481_v21 = vld [vmem:[#allocation3 + $0x90] sm:$0xff]  ;;  %v2486_v41 = vadd.f32 %v7455_v36, %v2482_v28 }
 0x44c   :  { %6396 = vtanh.f32 %v2449_v23 }
 0x451   :  { %v6389_v25 = vpop.eup %6388 }
 0x452   :  { %v6391_v34 = vpop.eup %6390  ;;  %v2460_v22 = vmul.f32 %v6389_v25, %v2456_v44 }
 0x453   :  { %v6393_v46 = vpop.eup %6392  ;;  %v2457_v61 = vsub.f32 1.0, %v6391_v34  ;;  %v2465_v40 = vmul.f32 %v6391_v34, %v7403_v38  ;;  %v2472_v38 = vld [vmem:[#allocation2 + $0x88] sm:$0xff]  ;;  %v2477_v34 = vadd.f32 %v7461_v17, %v2473_v35 }
 0x454   :  { %v2459_v49 = vmul.f32 %v6393_v46, %v2455_v45  ;;  %v7505_v54 = vadd.f32 %v2464_v31, %v2460_v22  ;;  %v2476_v9 = vadd.f32 %v7435_v51, %v2472_v38  ;;  %v2485_v31 = vadd.f32 %v7467_v19, %v2481_v21 }
 0x455   :  { %v6395_v57 = vpop.eup %6394 }
 0x456   :  { %v7507_v60 = vadd.f32 %v2463_v52, %v2459_v49  ;;  %v2462_v58 = vmul.f32 %v6395_v57, %v2458_v56  ;;  %v6397_v2 = vpop.eup %6396 }
 0x457   :  { %v2461_v10 = vmul.f32 %v6397_v2, %v2457_v61 }
 0x458   :  { %5717 = vmatprep.mubr.msk.f32.mxu0 %vm388_vm2, %v7507_v60  ;;  %5731 = vmatprep.mubr.msk.f32.mxu1 %vm388_vm2, %v7507_v60  ;;  %v7515_v3 = vadd.f32 %v2466_v0, %v2462_v58 }
 0x459   :  { %5718 = vmatmul.mubr.msk.f32.vlgmr.msra.gmra.mrb[74].mxu0 %vm388_vm2, %v7505_v54  ;;  %5732 = vmatmul.mubr.msk.f32.vlgmr.msra.gmra.mrb[70].mxu1 %vm388_vm2, %v7505_v54  ;;  %v7522_v29 = vadd.f32 %v2465_v40, %v2461_v10 }
 0x45a   :  { %6094 = vmatpush3.bf16.msra.mxu0 %v6978_v50  ;;  %6102 = vmatpush3.bf16.msra.mxu1 %v6668_v8 }
 0x45b   :  { %6096 = vmatprep.subr.bf16.mxu0 %v6994_v53  ;;  %6104 = vmatprep.subr.bf16.mxu1 %v6709_v14 }
 0x45c   :  { %5720 = vmatprep.mubr.msk.f32.mxu0 %vm388_vm2, %v7522_v29  ;;  %5734 = vmatprep.mubr.msk.f32.mxu1 %vm388_vm2, %v7522_v29 }
 0x45d   :  { %5721 = vmatmul.mubr.msk.f32.gmra.mrb[76].mxu0 %vm388_vm2, %v7515_v3  ;;  %5735 = vmatmul.mubr.msk.f32.gmra.mrb[72].mxu1 %vm388_vm2, %v7515_v3 }
 0x45e   :  { %6098 = vmatpush3.bf16.msra.mxu0 %v6994_v53  ;;  %5745 = vmatprep.mubr.msk.f32.mxu0 %vm388_vm2, %v7507_v60 }
 0x45f   :  { %6108 = vmatprep.subr.bf16.mxu0 %v6744_v20  ;;  %6106 = vmatpush3.bf16.msra.mxu1 %v6709_v14 }
 0x460   :  { %6116 = vmatprep.subr.bf16.mxu1 %v6978_v50 }
 0x461   :  { %5746 = vmatmul.mubr.msk.f32.vlgmr.msra.gmra.mrb[78].mxu0 %vm388_vm2, %v7505_v54 }
 0x462   :  { %5748 = vmatprep.mubr.msk.f32.mxu0 %vm388_vm2, %v7522_v29  ;;  %6110 = vmatpush3.bf16.msra.mxu0 %v6744_v20 }
 0x463   :  { %6112 = vmatprep.subr.bf16.mxu0 %v6964_v47 }
 0x465   :  { %5749 = vmatmul.mubr.msk.f32.gmra.mrb[80].mxu0 %vm388_vm2, %v7515_v3 }
 0x466   :  { %6114 = vmatpush3.bf16.msra.mxu0 %v6964_v47 }
 0x467   :  { %6124 = vmatprep.subr.bf16.mxu0 %v6668_v8 }
 0x52c   :  { %v5719_v5 = vpop.f32.mrb[74].mxu0  ;;  %v5733_v16 = vpop.f32.mrb[70].mxu1 }
 0x52d   :  { %v2763_v32 = vadd.f32 %v5719_v5, %v2476_v9  ;;  %v2791_v6 = vadd.f32 %v5733_v16, %v2484_v48  ;;  %v2573_v62 = vpop.f32.mrb[75].mxu0  ;;  %v2658_v33 = vpop.f32.mrb[71].mxu1 }
 0x52e   :  { %v2762_v15 = vadd.f32 %v2573_v62, %v2475_v11  ;;  %v2790_v27 = vadd.f32 %v2658_v33, %v2483_v59  ;;  %v2488_v33 = vld [vmem:[#allocation4 + $0x88] sm:$0xff] }
 0x52f   :  { %v4920_v23 = vmul.f32 -1.442695, %v2763_v32  ;;  %v4924_v61 = vmul.f32 -1.442695, %v2791_v6 }
 0x530   :  { %v4919_v43 = vmul.f32 -1.442695, %v2762_v15  ;;  %v5722_v44 = vpop.f32.mrb[76].mxu0  ;;  %v5736_v25 = vpop.f32.mrb[72].mxu1  ;;  %v4923_v10 = vmul.f32 -1.442695, %v2790_v27 }
 0x531   :  { %6398 = vpow2.f32 %v4920_v23  ;;  %v2765_v22 = vadd.f32 %v5722_v44, %v2478_v39  ;;  %v2793_v45 = vadd.f32 %v5736_v25, %v2486_v41  ;;  %v2583_v46 = vpop.f32.mrb[77].mxu0  ;;  %v2668_v49 = vpop.f32.mrb[73].mxu1  ;;  %v2487_v27 = vld [vmem:[#allocation4 + $0x80] sm:$0xff]  ;;  %v2492_v41 = vadd.f32 %v7479_v1, %v2488_v33  ;;  %v2490_v25 = vld [vmem:[#allocation4 + $0x98] sm:$0xff] }
 0x532   :  { %v2764_v52 = vadd.f32 %v2583_v46, %v2477_v34  ;;  %v2792_v56 = vadd.f32 %v2668_v49, %v2485_v31  ;;  %6400 = vpow2.f32 %v4919_v43 }
 0x533   :  { %v4922_v57 = vmul.f32 -1.442695, %v2765_v22  ;;  %v4926_v40 = vmul.f32 -1.442695, %v2793_v45  ;;  %v2491_v22 = vadd.f32 %v7486_v7, %v2487_v27 }
 0x534   :  { %v4921_v58 = vmul.f32 -1.442695, %v2764_v52  ;;  %v5747_v0 = vpop.f32.mrb[78].mxu0  ;;  %v4925_v4 = vmul.f32 -1.442695, %v2792_v56  ;;  %v2494_v56 = vadd.f32 %v7493_v26, %v2490_v25  ;;  %v2854_v25 = vld [vmem:[#allocation3 + $0xa0] sm:$0xff] }
 0x535   :  { %6402 = vpow2.f32 %v4922_v57  ;;  %v2743_v2 = vpop.f32.mrb[79].mxu0  ;;  %v2749_v15 = vadd.f32 %v7473_v63, %v5747_v0  ;;  %v2489_v57 = vld [vmem:[#allocation4 + $0x90] sm:$0xff] }
 0x536   :  { %6404 = vpow2.f32 %v4921_v58  ;;  %v2744_v44 = vadd.f32 %v7473_v63, %v2743_v2 }
 0x537   :  { %6406 = vpow2.f32 %v4924_v61 }
 0x538   :  { %v5750_v38 = vpop.f32.mrb[80].mxu0  ;;  %6408 = vpow2.f32 %v4923_v10 }
 0x539   :  { %v2753_v42 = vpop.f32.mrb[81].mxu0  ;;  %6410 = vpow2.f32 %v4926_v40  ;;  %v2759_v49 = vadd.f32 %v7473_v63, %v5750_v38  ;;  %v2493_v40 = vadd.f32 %v7500_v37, %v2489_v57 }
 0x53a   :  { %6412 = vpow2.f32 %v4925_v4  ;;  %v2754_v0 = vadd.f32 %v7473_v63, %v2753_v42 }
 0x53b   :  { %v6399_v30 = vpop.eup %6398 }
 0x53c   :  { %v2779_v9 = vadd.f32 1.0, %v6399_v30  ;;  %v6401_v48 = vpop.eup %6400 }
 0x53d   :  { %v2778_v5 = vadd.f32 1.0, %v6401_v48 }
 0x53e   :  { %6414 = vrcp.f32 %v2779_v9 }
 0x53f   :  { %v6403_v16 = vpop.eup %6402  ;;  %6416 = vrcp.f32 %v2778_v5 }
 0x540   :  { %v2781_v11 = vadd.f32 1.0, %v6403_v16  ;;  %v6405_v59 = vpop.eup %6404 }
 0x541   :  { %v6407_v24 = vpop.eup %6406  ;;  %v2780_v28 = vadd.f32 1.0, %v6405_v59 }
 0x542   :  { %6418 = vrcp.f32 %v2781_v11  ;;  %v6409_v32 = vpop.eup %6408  ;;  %v2807_v62 = vadd.f32 1.0, %v6407_v24 }
 0x543   :  { %6420 = vrcp.f32 %v2780_v28  ;;  %v6411_v6 = vpop.eup %6410  ;;  %v2806_v21 = vadd.f32 1.0, %v6409_v32 }
 0x544   :  { %v6413_v35 = vpop.eup %6412  ;;  %v2809_v39 = vadd.f32 1.0, %v6411_v6  ;;  %6422 = vrcp.f32 %v2807_v62 }
 0x545   :  { %v2808_v31 = vadd.f32 1.0, %v6413_v35  ;;  %6424 = vrcp.f32 %v2806_v21 }
 0x546   :  { %6426 = vrcp.f32 %v2809_v39 }
 0x548   :  { %v6415_v23 = vpop.eup %6414 }
 0x549   :  { %v2819_v43 = vmul.f32 %v6415_v23, %v2749_v15  ;;  %v6417_v34 = vpop.eup %6416 }
 0x54a   :  { %v2818_v46 = vmul.f32 %v6417_v34, %v2744_v44  ;;  %v2846_v44 = vld [vmem:[#allocation2 + $0xa0] sm:$0xff] }
 0x54b   :  { %v2823_v45 = vadd.f32 %v2819_v43, %v2492_v41  ;;  %v2855_v43 = vld [vmem:[#allocation3 + $0xa8] sm:$0xff] }
 0x54c   :  { %v6419_v52 = vpop.eup %6418  ;;  %v2822_v61 = vadd.f32 %v2818_v46, %v2491_v22  ;;  %v2850_v46 = vadd.f32 %v7442_v55, %v2846_v44 }
 0x54d   :  { %6428 = vtanh.f32 %v2823_v45  ;;  %v2821_v58 = vmul.f32 %v6419_v52, %v2759_v49  ;;  %v6421_v2 = vpop.eup %6420  ;;  %v2858_v49 = vadd.f32 %v7562_v18, %v2854_v25  ;;  %v2849_v52 = vld [vmem:[#allocation2 + $0xb8] sm:$0xff] }
 0x54e   :  { %6430 = vrcp.f32 %v2808_v31  ;;  %v2820_v4 = vmul.f32 %v6421_v2, %v2754_v0  ;;  %v6423_v38 = vpop.eup %6422  ;;  %v2859_v31 = vadd.f32 %v7555_v12, %v2855_v43  ;;  %v2848_v2 = vld [vmem:[#allocation2 + $0xb0] sm:$0xff] }
 0x54f   :  { %6432 = vtanh.f32 %v2822_v61  ;;  %v2825_v10 = vadd.f32 %v2821_v58, %v2494_v56  ;;  %v6425_v9 = vpop.eup %6424  ;;  %v2831_v5 = vsub.f32 1.0, %v6423_v38  ;;  %v2839_v59 = vmul.f32 %v6423_v38, %v7505_v54  ;;  %v2857_v56 = vld [vmem:[#allocation3 + $0xb8] sm:$0xff] }
 0x550   :  { %v2824_v30 = vadd.f32 %v2820_v4, %v2493_v40  ;;  %v6427_v48 = vpop.eup %6426  ;;  %v2830_v42 = vsub.f32 1.0, %v6425_v9  ;;  %v2838_v6 = vmul.f32 %v6425_v9, %v7507_v60  ;;  %v2853_v38 = vadd.f32 %v7449_v13, %v2849_v52 }
 0x551   :  { %6434 = vtanh.f32 %v2825_v10  ;;  %v2833_v33 = vsub.f32 1.0, %v6427_v48  ;;  %v2841_v23 = vmul.f32 %v6427_v48, %v7515_v3  ;;  %v2856_v10 = vld [vmem:[#allocation3 + $0xb0] sm:$0xff]  ;;  %v2861_v9 = vadd.f32 %v7455_v36, %v2857_v56 }
 0x552   :  { %6436 = vtanh.f32 %v2824_v30 }
 0x557   :  { %v6429_v16 = vpop.eup %6428 }
 0x558   :  { %v6431_v11 = vpop.eup %6430  ;;  %v2835_v24 = vmul.f32 %v6429_v16, %v2831_v5 }
 0x559   :  { %v6433_v28 = vpop.eup %6432  ;;  %v2832_v15 = vsub.f32 1.0, %v6431_v11  ;;  %v2840_v60 = vmul.f32 %v6431_v11, %v7522_v29  ;;  %v2847_v29 = vld [vmem:[#allocation2 + $0xa8] sm:$0xff]  ;;  %v2852_v11 = vadd.f32 %v7461_v17, %v2848_v2 }
 0x55a   :  { %v2834_v32 = vmul.f32 %v6433_v28, %v2830_v42  ;;  %v7579_v62 = vadd.f32 %v2839_v59, %v2835_v24  ;;  %v2851_v34 = vadd.f32 %v7435_v51, %v2847_v29  ;;  %v2860_v59 = vadd.f32 %v7467_v19, %v2856_v10 }
 0x55b   :  { %v6435_v35 = vpop.eup %6434 }
 0x55c   :  { %v7581_v21 = vadd.f32 %v2838_v6, %v2834_v32  ;;  %v2837_v27 = vmul.f32 %v6435_v35, %v2833_v33  ;;  %v6437_v39 = vpop.eup %6436 }
 0x55d   :  { %v2836_v54 = vmul.f32 %v6437_v39, %v2832_v15 }
 0x55e   :  { %5759 = vmatprep.mubr.msk.f32.mxu1 %vm388_vm2, %v7581_v21  ;;  %5773 = vmatprep.mubr.msk.f32.mxu0 %vm388_vm2, %v7581_v21  ;;  %v7589_v41 = vadd.f32 %v2841_v23, %v2837_v27 }
 0x55f   :  { %5760 = vmatmul.mubr.msk.f32.vlgmr.msra.gmra.mrb[74].mxu1 %vm388_vm2, %v7579_v62  ;;  %5774 = vmatmul.mubr.msk.f32.vlgmr.msra.gmra.mrb[82].mxu0 %vm388_vm2, %v7579_v62  ;;  %v7596_v3 = vadd.f32 %v2840_v60, %v2836_v54 }
 0x560   :  { %6118 = vmatpush3.bf16.msra.mxu1 %v6978_v50  ;;  %6126 = vmatpush3.bf16.msra.mxu0 %v6668_v8 }
 0x561   :  { %6120 = vmatprep.subr.bf16.mxu1 %v6994_v53  ;;  %6128 = vmatprep.subr.bf16.mxu0 %v6709_v14 }
 0x562   :  { %5762 = vmatprep.mubr.msk.f32.mxu1 %vm388_vm2, %v7596_v3  ;;  %5776 = vmatprep.mubr.msk.f32.mxu0 %vm388_vm2, %v7596_v3 }
 0x563   :  { %5763 = vmatmul.mubr.msk.f32.gmra.mrb[76].mxu1 %vm388_vm2, %v7589_v41  ;;  %5777 = vmatmul.mubr.msk.f32.gmra.mrb[84].mxu0 %vm388_vm2, %v7589_v41 }
 0x564   :  { %6122 = vmatpush3.bf16.msra.mxu1 %v6994_v53  ;;  %5787 = vmatprep.mubr.msk.f32.mxu1 %vm388_vm2, %v7581_v21 }
 0x565   :  { %6132 = vmatprep.subr.bf16.mxu1 %v6744_v20  ;;  %6130 = vmatpush3.bf16.msra.mxu0 %v6709_v14 }
 0x566   :  { %6140 = vmatprep.subr.bf16.mxu0 %v6978_v50 }
 0x567   :  { %5788 = vmatmul.mubr.msk.f32.vlgmr.msra.gmra.mrb[78].mxu1 %vm388_vm2, %v7579_v62 }
 0x568   :  { %5790 = vmatprep.mubr.msk.f32.mxu1 %vm388_vm2, %v7596_v3  ;;  %6134 = vmatpush3.bf16.msra.mxu1 %v6744_v20 }
 0x569   :  { %6136 = vmatprep.subr.bf16.mxu1 %v6964_v47 }
 0x56b   :  { %5791 = vmatmul.mubr.msk.f32.gmra.mrb[80].mxu1 %vm388_vm2, %v7589_v41 }
 0x56c   :  { %6138 = vmatpush3.bf16.msra.mxu1 %v6964_v47 }
 0x56d   :  { %6148 = vmatprep.subr.bf16.mxu1 %v6668_v8 }
 0x632   :  { %v5761_v22 = vpop.f32.mrb[74].mxu1  ;;  %v5775_v45 = vpop.f32.mrb[82].mxu0 }
 0x633   :  { %v3138_v57 = vadd.f32 %v5761_v22, %v2851_v34  ;;  %v3166_v61 = vadd.f32 %v5775_v45, %v2859_v31  ;;  %v2948_v58 = vpop.f32.mrb[75].mxu1  ;;  %v3033_v0 = vpop.f32.mrb[83].mxu0 }
 0x634   :  { %v3137_v40 = vadd.f32 %v2948_v58, %v2850_v46  ;;  %v3165_v4 = vadd.f32 %v3033_v0, %v2858_v49  ;;  %v2863_v0 = vld [vmem:[#allocation4 + $0xa8] sm:$0xff] }
 0x635   :  { %v4940_v30 = vmul.f32 -1.442695, %v3138_v57  ;;  %v4944_v15 = vmul.f32 -1.442695, %v3166_v61 }
 0x636   :  { %v4939_v48 = vmul.f32 -1.442695, %v3137_v40  ;;  %v5764_v5 = vpop.f32.mrb[76].mxu1  ;;  %v5778_v16 = vpop.f32.mrb[84].mxu0  ;;  %v4943_v54 = vmul.f32 -1.442695, %v3165_v4 }
 0x637   :  { %6438 = vpow2.f32 %v4940_v30  ;;  %v3140_v24 = vadd.f32 %v5764_v5, %v2853_v38  ;;  %v3168_v42 = vadd.f32 %v5778_v16, %v2861_v9  ;;  %v2958_v28 = vpop.f32.mrb[77].mxu1  ;;  %v3043_v32 = vpop.f32.mrb[85].mxu0  ;;  %v2862_v4 = vld [vmem:[#allocation4 + $0xa0] sm:$0xff]  ;;  %v2867_v9 = vadd.f32 %v7479_v1, %v2863_v0  ;;  %v2865_v16 = vld [vmem:[#allocation4 + $0xb8] sm:$0xff] }
 0x638   :  { %v3139_v6 = vadd.f32 %v2958_v28, %v2852_v11  ;;  %v3167_v33 = vadd.f32 %v3043_v32, %v2860_v59  ;;  %6440 = vpow2.f32 %v4939_v48 }
 0x639   :  { %v4942_v35 = vmul.f32 -1.442695, %v3140_v24  ;;  %v4946_v60 = vmul.f32 -1.442695, %v3168_v42  ;;  %v2866_v24 = vadd.f32 %v7486_v7, %v2862_v4 }
 0x63a   :  { %v4941_v27 = vmul.f32 -1.442695, %v3139_v6  ;;  %v5789_v23 = vpop.f32.mrb[78].mxu1  ;;  %v4945_v43 = vmul.f32 -1.442695, %v3167_v33  ;;  %v2869_v33 = vadd.f32 %v7493_v26, %v2865_v16 }
 0x63b   :  { %6442 = vpow2.f32 %v4942_v35  ;;  %v3118_v39 = vpop.f32.mrb[79].mxu1  ;;  %v3124_v40 = vadd.f32 %v7473_v63, %v5789_v23  ;;  %v2864_v35 = vld [vmem:[#allocation4 + $0xb0] sm:$0xff] }
 0x63c   :  { %6444 = vpow2.f32 %v4941_v27  ;;  %v3119_v5 = vadd.f32 %v7473_v63, %v3118_v39 }
 0x63d   :  { %6446 = vpow2.f32 %v4944_v15 }
 0x63e   :  { %v5792_v29 = vpop.f32.mrb[80].mxu1  ;;  %6448 = vpow2.f32 %v4943_v54 }
 0x63f   :  { %v3128_v44 = vpop.f32.mrb[81].mxu1  ;;  %6450 = vpow2.f32 %v4946_v60  ;;  %v3134_v32 = vadd.f32 %v7473_v63, %v5792_v29  ;;  %v2868_v60 = vadd.f32 %v7500_v37, %v2864_v35  ;;  %v3223_v35 = vld [vmem:[#allocation2 + $0xd0] sm:$0xff] }
 0x640   :  { %6452 = vpow2.f32 %v4945_v43  ;;  %v3129_v23 = vadd.f32 %v7473_v63, %v3128_v44 }
 0x641   :  { %v6439_v25 = vpop.eup %6438 }
 0x642   :  { %v3154_v34 = vadd.f32 1.0, %v6439_v25  ;;  %v6441_v31 = vpop.eup %6440 }
 0x643   :  { %v3153_v22 = vadd.f32 1.0, %v6441_v31 }
 0x644   :  { %6454 = vrcp.f32 %v3154_v34 }
 0x645   :  { %v6443_v45 = vpop.eup %6442  ;;  %6456 = vrcp.f32 %v3153_v22 }
 0x646   :  { %v3156_v46 = vadd.f32 1.0, %v6443_v45  ;;  %v6445_v49 = vpop.eup %6444 }
 0x647   :  { %v6447_v52 = vpop.eup %6446  ;;  %v3155_v56 = vadd.f32 1.0, %v6445_v49 }
 0x648   :  { %6458 = vrcp.f32 %v3156_v46  ;;  %v6449_v57 = vpop.eup %6448  ;;  %v3182_v58 = vadd.f32 1.0, %v6447_v52 }
 0x649   :  { %6460 = vrcp.f32 %v3155_v56  ;;  %v6451_v61 = vpop.eup %6450  ;;  %v3181_v10 = vadd.f32 1.0, %v6449_v57 }
 0x64a   :  { %v6453_v2 = vpop.eup %6452  ;;  %v3184_v38 = vadd.f32 1.0, %v6451_v61  ;;  %6462 = vrcp.f32 %v3182_v58 }
 0x64b   :  { %v3183_v59 = vadd.f32 1.0, %v6453_v2  ;;  %6464 = vrcp.f32 %v3181_v10 }
 0x64c   :  { %6466 = vrcp.f32 %v3184_v38 }
 0x64e   :  { %v6455_v30 = vpop.eup %6454 }
 0x64f   :  { %v3194_v48 = vmul.f32 %v6455_v30, %v3124_v40  ;;  %v6457_v11 = vpop.eup %6456 }
 0x650   :  { %v3193_v28 = vmul.f32 %v6457_v11, %v3119_v5 }
 0x651   :  { %v3198_v42 = vadd.f32 %v3194_v48, %v2867_v9  ;;  %v3229_v48 = vld [vmem:[#allocation3 + $0xc0] sm:$0xff] }
 0x652   :  { %v6459_v6 = vpop.eup %6458  ;;  %v3197_v15 = vadd.f32 %v3193_v28, %v2866_v24  ;;  %v3232_v28 = vld [vmem:[#allocation3 + $0xd8] sm:$0xff] }
 0x653   :  { %6468 = vtanh.f32 %v3198_v42  ;;  %v3196_v27 = vmul.f32 %v6459_v6, %v3134_v32  ;;  %v6461_v39 = vpop.eup %6460  ;;  %v3224_v42 = vld [vmem:[#allocation2 + $0xd8] sm:$0xff] }
 0x654   :  { %6470 = vrcp.f32 %v3183_v59  ;;  %v3195_v43 = vmul.f32 %v6461_v39, %v3129_v23  ;;  %v6463_v29 = vpop.eup %6462 }
 0x655   :  { %6472 = vtanh.f32 %v3197_v15  ;;  %v3200_v54 = vadd.f32 %v3196_v27, %v2869_v33  ;;  %v6465_v34 = vpop.eup %6464  ;;  %v3206_v22 = vsub.f32 1.0, %v6463_v29  ;;  %v3214_v49 = vmul.f32 %v6463_v29, %v7579_v62  ;;  %v3231_v15 = vld [vmem:[#allocation3 + $0xd0] sm:$0xff] }
 0x656   :  { %v3199_v25 = vadd.f32 %v3195_v43, %v2868_v60  ;;  %v6467_v31 = vpop.eup %6466  ;;  %v3205_v44 = vsub.f32 1.0, %v6465_v34  ;;  %v3213_v61 = vmul.f32 %v6465_v34, %v7581_v21  ;;  %v3235_v29 = vadd.f32 %v7467_v19, %v3231_v15 }
 0x657   :  { %6474 = vtanh.f32 %v3200_v54  ;;  %v3208_v0 = vsub.f32 1.0, %v6467_v31  ;;  %v3216_v30 = vmul.f32 %v6467_v31, %v7589_v41  ;;  %v3236_v54 = vadd.f32 %v7455_v36, %v3232_v28 }
 0x658   :  { %6476 = vtanh.f32 %v3199_v25  ;;  %v3227_v25 = vadd.f32 %v7461_v17, %v3223_v35 }
 0x65d   :  { %v6469_v45 = vpop.eup %6468 }
 0x65e   :  { %v6471_v46 = vpop.eup %6470  ;;  %v3210_v52 = vmul.f32 %v6469_v45, %v3206_v22 }
 0x65f   :  { %v6473_v56 = vpop.eup %6472  ;;  %v3207_v40 = vsub.f32 1.0, %v6471_v46  ;;  %v3215_v21 = vmul.f32 %v6471_v46, %v7596_v3  ;;  %v3230_v3 = vld [vmem:[#allocation3 + $0xc8] sm:$0xff] }
 0x660   :  { %v3209_v57 = vmul.f32 %v6473_v56, %v3205_v44  ;;  %v7643_v58 = vadd.f32 %v3214_v49, %v3210_v52  ;;  %v3234_v16 = vadd.f32 %v7555_v12, %v3230_v3 }
 0x661   :  { %v6475_v2 = vpop.eup %6474 }
 0x662   :  { %v7645_v10 = vadd.f32 %v3213_v61, %v3209_v57  ;;  %v3212_v4 = vmul.f32 %v6475_v2, %v3208_v0  ;;  %v6477_v38 = vpop.eup %6476 }
 0x663   :  { %v3211_v62 = vmul.f32 %v6477_v38, %v3207_v40 }
 0x664   :  { %5801 = vmatprep.mubr.msk.f32.mxu0 %vm388_vm2, %v7645_v10  ;;  %5815 = vmatprep.mubr.msk.f32.mxu1 %vm388_vm2, %v7645_v10  ;;  %v7653_v9 = vadd.f32 %v3216_v30, %v3212_v4 }
 0x665   :  { %5802 = vmatmul.mubr.msk.f32.vlgmr.msra.gmra.mrb[86].mxu0 %vm388_vm2, %v7643_v58  ;;  %5816 = vmatmul.mubr.msk.f32.vlgmr.msra.gmra.mrb[82].mxu1 %vm388_vm2, %v7643_v58  ;;  %v7660_v41 = vadd.f32 %v3215_v21, %v3211_v62 }
 0x666   :  { %6142 = vmatpush3.bf16.msra.mxu0 %v6978_v50  ;;  %6150 = vmatpush3.bf16.msra.mxu1 %v6668_v8  ;;  %v3222_v8 = vld [vmem:[#allocation2 + $0xc8] sm:$0xff] }
 0x667   :  { %6144 = vmatprep.subr.bf16.mxu0 %v6994_v53  ;;  %6152 = vmatprep.subr.bf16.mxu1 %v6709_v14  ;;  %v3226_v5 = vadd.f32 %v7435_v51, %v3222_v8  ;;  %v3228_v51 = vadd.f32 %v7449_v13, %v3224_v42 }
 0x668   :  { %5804 = vmatprep.mubr.msk.f32.mxu0 %vm388_vm2, %v7660_v41  ;;  %5818 = vmatprep.mubr.msk.f32.mxu1 %vm388_vm2, %v7660_v41 }
 0x669   :  { %5805 = vmatmul.mubr.msk.f32.gmra.mrb[88].mxu0 %vm388_vm2, %v7653_v9  ;;  %5819 = vmatmul.mubr.msk.f32.gmra.mrb[84].mxu1 %vm388_vm2, %v7653_v9 }
 0x66a   :  { %6146 = vmatpush3.bf16.msra.mxu0 %v6994_v53  ;;  %5829 = vmatprep.mubr.msk.f32.mxu0 %vm388_vm2, %v7645_v10 }
 0x66b   :  { %6156 = vmatprep.subr.bf16.mxu0 %v6744_v20  ;;  %6154 = vmatpush3.bf16.msra.mxu1 %v6709_v14  ;;  %v3221_v14 = vld [vmem:[#allocation2 + $0xc0] sm:$0xff] }
 0x66c   :  { %6164 = vmatprep.subr.bf16.mxu1 %v6978_v50  ;;  %v3225_v24 = vadd.f32 %v7442_v55, %v3221_v14 }
 0x66d   :  { %5830 = vmatmul.mubr.msk.f32.vlgmr.msra.gmra.mrb[90].mxu0 %vm388_vm2, %v7643_v58 }
 0x66e   :  { %5832 = vmatprep.mubr.msk.f32.mxu0 %vm388_vm2, %v7660_v41  ;;  %6158 = vmatpush3.bf16.msra.mxu0 %v6744_v20  ;;  %v3233_v20 = vadd.f32 %v7562_v18, %v3229_v48 }
 0x66f   :  { %6160 = vmatprep.subr.bf16.mxu0 %v6964_v47 }
 0x671   :  { %5833 = vmatmul.mubr.msk.f32.gmra.mrb[92].mxu0 %vm388_vm2, %v7653_v9 }
 0x672   :  { %6162 = vmatpush3.bf16.msra.mxu0 %v6964_v47 }
 0x738   :  { %v5803_v11 = vpop.f32.mrb[86].mxu0  ;;  %v5817_v59 = vpop.f32.mrb[82].mxu1 }
 0x739   :  { %v3513_v32 = vadd.f32 %v5803_v11, %v3226_v5  ;;  %v3541_v6 = vadd.f32 %v5817_v59, %v3234_v16  ;;  %v3323_v33 = vpop.f32.mrb[87].mxu0  ;;  %v3408_v47 = vpop.f32.mrb[83].mxu1  ;;  %v3238_v16 = vld [vmem:[#allocation4 + $0xc8] sm:$0xff] }
 0x73a   :  { %v3512_v27 = vadd.f32 %v3323_v33, %v3225_v24  ;;  %v3540_v23 = vadd.f32 %v3408_v47, %v3233_v20  ;;  %v3237_v20 = vld [vmem:[#allocation4 + $0xc0] sm:$0xff]  ;;  %v3240_v47 = vld [vmem:[#allocation4 + $0xd8] sm:$0xff] }
 0x73b   :  { %v4960_v39 = vmul.f32 -1.442695, %v3513_v32  ;;  %v4964_v44 = vmul.f32 -1.442695, %v3541_v6  ;;  %v3242_v32 = vadd.f32 %v7479_v1, %v3238_v16  ;;  %v3604_v16 = vld [vmem:[#allocation3 + $0xe0] sm:$0xff] }
 0x73c   :  { %v4959_v60 = vmul.f32 -1.442695, %v3512_v27  ;;  %v5806_v43 = vpop.f32.mrb[88].mxu0  ;;  %v5820_v55 = vpop.f32.mrb[84].mxu1  ;;  %v4963_v57 = vmul.f32 -1.442695, %v3540_v23  ;;  %v3241_v27 = vadd.f32 %v7486_v7, %v3237_v20 }
 0x73d   :  { %6478 = vpow2.f32 %v4960_v39  ;;  %v3515_v34 = vadd.f32 %v5806_v43, %v3228_v51  ;;  %v3543_v31 = vadd.f32 %v5820_v55, %v3236_v54  ;;  %v3333_v22 = vpop.f32.mrb[89].mxu0  ;;  %v3418_v45 = vpop.f32.mrb[85].mxu1  ;;  %v3239_v43 = vld [vmem:[#allocation4 + $0xd0] sm:$0xff] }
 0x73e   :  { %v3514_v46 = vadd.f32 %v3333_v22, %v3227_v25  ;;  %v3542_v49 = vadd.f32 %v3418_v45, %v3235_v29  ;;  %6480 = vpow2.f32 %v4959_v60  ;;  %v3244_v60 = vadd.f32 %v7493_v26, %v3240_v47  ;;  %v3607_v47 = vld [vmem:[#allocation3 + $0xf8] sm:$0xff] }
 0x73f   :  { %v4962_v52 = vmul.f32 -1.442695, %v3515_v34  ;;  %v4966_v61 = vmul.f32 -1.442695, %v3543_v31  ;;  %v3243_v7 = vadd.f32 %v7500_v37, %v3239_v43  ;;  %v6573_v43 = vld [vmem:[%s7960_s2 + $0x18] sm:$0xff] }
 0x740   :  { %v4961_v13 = vmul.f32 -1.442695, %v3514_v46  ;;  %v5831_v56 = vpop.f32.mrb[90].mxu0  ;;  %v4965_v19 = vmul.f32 -1.442695, %v3542_v49 }
 0x741   :  { %6482 = vpow2.f32 %v4962_v52  ;;  %v3493_v36 = vpop.f32.mrb[91].mxu0  ;;  %v3499_v24 = vadd.f32 %v7473_v63, %v5831_v56 }
 0x742   :  { %6484 = vpow2.f32 %v4961_v13  ;;  %v3494_v33 = vadd.f32 %v7473_v63, %v3493_v36 }
 0x743   :  { %6486 = vpow2.f32 %v4964_v44 }
 0x744   :  { %v5834_v17 = vpop.f32.mrb[92].mxu0  ;;  %6488 = vpow2.f32 %v4963_v57 }
 0x745   :  { %v3503_v0 = vpop.f32.mrb[93].mxu0  ;;  %6490 = vpow2.f32 %v4966_v61  ;;  %v3509_v51 = vadd.f32 %v7473_v63, %v5834_v17 }
 0x746   :  { %6492 = vpow2.f32 %v4965_v19  ;;  %v3504_v25 = vadd.f32 %v7473_v63, %v3503_v0 }
 0x747   :  { %v6479_v2 = vpop.eup %6478 }
 0x748   :  { %v3529_v40 = vadd.f32 1.0, %v6479_v2  ;;  %v6481_v4 = vpop.eup %6480 }
 0x749   :  { %v3528_v30 = vadd.f32 1.0, %v6481_v4 }
 0x74a   :  { %6494 = vrcp.f32 %v3529_v40 }
 0x74b   :  { %v6483_v38 = vpop.eup %6482  ;;  %6496 = vrcp.f32 %v3528_v30 }
 0x74c   :  { %v3531_v62 = vadd.f32 1.0, %v6483_v38  ;;  %v6485_v21 = vpop.eup %6484 }
 0x74d   :  { %v6487_v8 = vpop.eup %6486  ;;  %v3530_v3 = vadd.f32 1.0, %v6485_v21 }
 0x74e   :  { %6498 = vrcp.f32 %v3531_v62  ;;  %v6489_v14 = vpop.eup %6488  ;;  %v3557_v5 = vadd.f32 1.0, %v6487_v8  ;;  %v5005_v62 = vld [vmem:[%s7963_s6 + $0x30] sm:$0xff]  ;;  %v5006_v8 = vld [vmem:[%s7963_s6 + $0x38] sm:$0xff] }
 0x74f   :  { %6500 = vrcp.f32 %v3530_v3  ;;  %v6491_v48 = vpop.eup %6490  ;;  %v3556_v59 = vadd.f32 1.0, %v6489_v14  ;;  %v6183_v3 = vpack.c.bf16 %v5006_v8, %v5005_v62  ;;  %v3597_v14 = vld [vmem:[#allocation2 + $0xe8] sm:$0xff] }
 0x750   :  { %v6493_v11 = vpop.eup %6492  ;;  %v3559_v28 = vadd.f32 1.0, %v6491_v48  ;;  %6502 = vrcp.f32 %v3557_v5  ;;  %v3605_v48 = vld [vmem:[#allocation3 + $0xe8] sm:$0xff]  ;;  %v3596_v5 = vld [vmem:[#allocation2 + $0xe0] sm:$0xff] }
 0x751   :  { %v3558_v15 = vadd.f32 1.0, %v6493_v11  ;;  %6504 = vrcp.f32 %v3556_v59  ;;  %v6571_v11 = vld [vmem:[%s7960_s2 + $0x8] sm:$0xff] }
 0x752   :  { %6506 = vrcp.f32 %v3559_v28  ;;  %v3601_v59 = vadd.f32 %v6571_v11, %v3597_v14  ;;  %v6572_v28 = vld [vmem:[%s7960_s2] sm:$0xff] }
 0x754   :  { %v6495_v42 = vpop.eup %6494 }
 0x755   :  { %v3569_v6 = vmul.f32 %v6495_v42, %v3499_v24  ;;  %v6497_v35 = vpop.eup %6496  ;;  %v3609_v24 = vadd.f32 %v7555_v12, %v3605_v48 }
 0x756   :  { %v3568_v39 = vmul.f32 %v6497_v35, %v3494_v33  ;;  %v3599_v33 = vld [vmem:[#allocation2 + $0xf8] sm:$0xff] }
 0x757   :  { %v3573_v23 = vadd.f32 %v3569_v6, %v3242_v32  ;;  %v3600_v32 = vadd.f32 %v6572_v28, %v3596_v5  ;;  %v3608_v6 = vadd.f32 %v7562_v18, %v3604_v16  ;;  %v6574_v18 = vld [vmem:[%s7960_s2 + $0x38] sm:$0xff]  ;;  %v3613_v5 = vld [vmem:[#allocation4 + $0xe8] sm:$0xff] }
 0x758   :  { %v6499_v54 = vpop.eup %6498  ;;  %v3572_v1 = vadd.f32 %v3568_v39, %v3241_v27  ;;  %v3598_v39 = vld [vmem:[#allocation2 + $0xf0] sm:$0xff] }
 0x759   :  { %6508 = vtanh.f32 %v3573_v23  ;;  %v3571_v55 = vmul.f32 %v6499_v54, %v3509_v51  ;;  %v6501_v29 = vpop.eup %6500  ;;  %v3606_v51 = vld [vmem:[#allocation3 + $0xf0] sm:$0xff] }
 0x75a   :  { %6510 = vrcp.f32 %v3558_v15  ;;  %v3570_v31 = vmul.f32 %v6501_v29, %v3504_v25  ;;  %v6503_v45 = vpop.eup %6502 }
 0x75b   :  { %6512 = vtanh.f32 %v3572_v1  ;;  %v3575_v34 = vadd.f32 %v3571_v55, %v3244_v60  ;;  %v6505_v46 = vpop.eup %6504  ;;  %v3581_v26 = vsub.f32 1.0, %v6503_v45  ;;  %v3589_v13 = vmul.f32 %v6503_v45, %v7643_v58 }
 0x75c   :  { %v3574_v22 = vadd.f32 %v3570_v31, %v3243_v7  ;;  %v6507_v49 = vpop.eup %6506  ;;  %v3580_v63 = vsub.f32 1.0, %v6505_v46  ;;  %v3588_v61 = vmul.f32 %v6505_v46, %v7645_v10  ;;  %v3603_v1 = vadd.f32 %v6573_v43, %v3599_v33  ;;  %v6575_v7 = vld [vmem:[%s7960_s2 + $0x10] sm:$0xff]  ;;  %v6580_v43 = vld [vmem:[%s7960_s2 + $0x58] sm:$0xff] }
 0x75d   :  { %6514 = vtanh.f32 %v3575_v34  ;;  %v3583_v37 = vsub.f32 1.0, %v6507_v49  ;;  %v3591_v4 = vmul.f32 %v6507_v49, %v7653_v9  ;;  %v3611_v55 = vadd.f32 %v6574_v18, %v3607_v47  ;;  %v3614_v18 = vld [vmem:[#allocation4 + $0xf0] sm:$0xff] }
 0x75e   :  { %6516 = vtanh.f32 %v3574_v22  ;;  %v3602_v31 = vadd.f32 %v6575_v7, %v3598_v39  ;;  %v6576_v22 = vld [vmem:[%s7960_s2 + $0x30] sm:$0xff] }
 0x75f   :  { %v3610_v45 = vadd.f32 %v6576_v22, %v3606_v51 }
 0x763   :  { %v6509_v52 = vpop.eup %6508 }
 0x764   :  { %v6511_v44 = vpop.eup %6510  ;;  %v3585_v56 = vmul.f32 %v6509_v52, %v3581_v26 }
 0x765   :  { %v6513_v36 = vpop.eup %6512  ;;  %v3582_v2 = vsub.f32 1.0, %v6511_v44  ;;  %v3590_v10 = vmul.f32 %v6511_v44, %v7660_v41  ;;  %v5004_v41 = vld [vmem:[%s7963_s6 + $0x28] sm:$0xff] }
 0x766   :  { %v3584_v57 = vmul.f32 %v6513_v36, %v3580_v63  ;;  %v7706_v17 = vadd.f32 %v3589_v13, %v3585_v56 }
 0x767   :  { %v6515_v19 = vpop.eup %6514 }
 0x768   :  { %v7708_v0 = vadd.f32 %v3588_v61, %v3584_v57  ;;  %v3587_v40 = vmul.f32 %v6515_v19, %v3583_v37  ;;  %v6517_v30 = vpop.eup %6516 }
 0x769   :  { %v3586_v58 = vmul.f32 %v6517_v30, %v3582_v2 }
 0x76a   :  { %5843 = vmatprep.mubr.msk.f32.mxu1 %vm388_vm2, %v7708_v0  ;;  %5857 = vmatprep.mubr.msk.f32.mxu0 %vm388_vm2, %v7708_v0  ;;  %v7716_v38 = vadd.f32 %v3591_v4, %v3587_v40 }
 0x76b   :  { %5844 = vmatmul.mubr.msk.f32.vlgmr.msra.gmra.mrb[86].mxu1 %vm388_vm2, %v7706_v17  ;;  %5858 = vmatmul.mubr.msk.f32.vlgmr.msra.gmra.mrb[94].mxu0 %vm388_vm2, %v7706_v17  ;;  %v7723_v9 = vadd.f32 %v3590_v10, %v3586_v58 }
 0x76c   :  { %6166 = vmatpush3.bf16.msra.mxu1 %v6978_v50  ;;  %v3971_v50 = vld [vmem:[%s7962_s5] sm:$0xff] }
 0x76d   :  { %6168 = vmatprep.subr.bf16.mxu1 %v6994_v53  ;;  %5846 = vmatprep.mubr.msk.f32.mxu1 %vm388_vm2, %v7723_v9 }
 0x76e   :  { %5860 = vmatprep.mubr.msk.f32.mxu0 %vm388_vm2, %v7723_v9 }
 0x76f   :  { %5847 = vmatmul.mubr.msk.f32.gmra.mrb[88].mxu1 %vm388_vm2, %v7716_v38  ;;  %5861 = vmatmul.mubr.msk.f32.gmra.mrb[96].mxu0 %vm388_vm2, %v7716_v38 }
 0x770   :  { %6170 = vmatpush3.bf16.msra.mxu1 %v6994_v53  ;;  %5871 = vmatprep.mubr.msk.f32.mxu1 %vm388_vm2, %v7708_v0  ;;  %v5003_v53 = vld [vmem:[%s7963_s6 + $0x20] sm:$0xff] }
 0x771   :  { %5885 = vmatprep.mubr.msk.f32.mxu0 %vm388_vm2, %v3971_v50  ;;  %v6179_v21 = vpack.c.bf16 %v5004_v41, %v5003_v53 }
 0x773   :  { %5872 = vmatmul.mubr.msk.f32.vlgmr.msra.gmra.mrb[90].mxu1 %vm388_vm2, %v7706_v17  ;;  %6180 = vmatprep.subr.bf16.mxu1 %v6179_v21 }
 0x774   :  { %5874 = vmatprep.mubr.msk.f32.mxu1 %vm388_vm2, %v7723_v9  ;;  %6182 = vmatpush3.bf16.msra.mxu1 %v6179_v21 }
 0x775   :  { %6184 = vmatprep.subr.bf16.mxu1 %v6183_v3 }
 0x777   :  { %5875 = vmatmul.mubr.msk.f32.gmra.mrb[92].mxu1 %vm388_vm2, %v7716_v38 }
 0x778   :  { %6186 = vmatpush3.bf16.msra.mxu1 %v6183_v3 }
 0x83e   :  { %v5845_v20 = vpop.f32.mrb[86].mxu1  ;;  %v5859_v42 = vpop.f32.mrb[94].mxu0 }
 0x83f   :  { %v3888_v35 = vadd.f32 %v5845_v20, %v3601_v59  ;;  %v3916_v15 = vadd.f32 %v5859_v42, %v3609_v24  ;;  %v3698_v27 = vpop.f32.mrb[87].mxu1  ;;  %v3783_v23 = vpop.f32.mrb[95].mxu0  ;;  %v6577_v59 = vld [vmem:[%s7961_s4] ss:$0 sm:$0xff] }
 0x840   :  { %v3887_v54 = vadd.f32 %v3698_v27, %v3600_v32  ;;  %v3915_v60 = vadd.f32 %v3783_v23, %v3608_v6  ;;  %v3612_v20 = vld [vmem:[#allocation4 + $0xe0] sm:$0xff]  ;;  %v6578_v32 = vld [vmem:[%s7960_s2 + $0x48] sm:$0xff] }
 0x841   :  { %v4980_v12 = vmul.f32 -1.442695, %v3888_v35  ;;  %v4984_v63 = vmul.f32 -1.442695, %v3916_v15  ;;  %v3617_v6 = vadd.f32 %v6578_v32, %v3613_v5  ;;  %v3615_v35 = vld [vmem:[#allocation4 + $0xf8] sm:$0xff]  ;;  %v6579_v23 = vld [vmem:[%s7960_s2 + $0x40] sm:$0xff] }
 0x842   :  { %v4979_v25 = vmul.f32 -1.442695, %v3887_v54  ;;  %v5848_v29 = vpop.f32.mrb[88].mxu1  ;;  %v5862_v34 = vpop.f32.mrb[96].mxu0  ;;  %v4983_v37 = vmul.f32 -1.442695, %v3915_v60  ;;  %v3616_v39 = vadd.f32 %v6579_v23, %v3612_v20 }
 0x843   :  { %6518 = vpow2.f32 %v4980_v12  ;;  %v3890_v46 = vadd.f32 %v5848_v29, %v3603_v1  ;;  %v3918_v49 = vadd.f32 %v5862_v34, %v3611_v55  ;;  %v3708_v26 = vpop.f32.mrb[89].mxu1  ;;  %v3793_v52 = vpop.f32.mrb[97].mxu0  ;;  %v3619_v1 = vadd.f32 %v6580_v43, %v3615_v35  ;;  %v3977_v5 = vld [vmem:[%s7962_s5 + $0x30] sm:$0xff]  ;;  %v3982_v20 = vld [vmem:[%s7962_s5 + $0x58] sm:$0xff] }
 0x844   :  { %v3889_v44 = vadd.f32 %v3708_v26, %v3602_v31  ;;  %v3917_v13 = vadd.f32 %v3793_v52, %v3610_v45  ;;  %6520 = vpow2.f32 %v4979_v25  ;;  %v6581_v31 = vld [vmem:[%s7960_s2 + $0x50] sm:$0xff] }
 0x845   :  { %v4982_v56 = vmul.f32 -1.442695, %v3890_v46  ;;  %v4986_v19 = vmul.f32 -1.442695, %v3918_v49  ;;  %v3618_v22 = vadd.f32 %v6581_v31, %v3614_v18  ;;  %v3985_v32 = vld [vmem:[%s7962_s5 + $0x70] sm:$0xff]  ;;  %v5024_v31 = vld [vmem:[%s7963_s6 + $0x68] sm:$0xff] }
 0x846   :  { %v4981_v36 = vmul.f32 -1.442695, %v3889_v44  ;;  %v5873_v57 = vpop.f32.mrb[90].mxu1  ;;  %v4985_v40 = vmul.f32 -1.442695, %v3917_v13  ;;  %v5017_v18 = vld [vmem:[%s7963_s6 + $0x50] sm:$0xff] }
 0x847   :  { %6522 = vpow2.f32 %v4982_v56  ;;  %v3868_v61 = vpop.f32.mrb[91].mxu1  ;;  %v3874_v24 = vadd.f32 %v6577_v59, %v5873_v57 }
 0x848   :  { %6524 = vpow2.f32 %v4981_v36  ;;  %v3869_v47 = vadd.f32 %v6577_v59, %v3868_v61 }
 0x849   :  { %6526 = vpow2.f32 %v4984_v63 }
 0x84a   :  { %v5876_v2 = vpop.f32.mrb[92].mxu1  ;;  %6528 = vpow2.f32 %v4983_v37 }
 0x84b   :  { %v3878_v4 = vpop.f32.mrb[93].mxu1  ;;  %6530 = vpow2.f32 %v4986_v19  ;;  %v3884_v60 = vadd.f32 %v6577_v59, %v5876_v2 }
 0x84c   :  { %6532 = vpow2.f32 %v4985_v40  ;;  %v3879_v29 = vadd.f32 %v6577_v59, %v3878_v4  ;;  %v3980_v59 = vld [vmem:[%s7962_s5 + $0x48] sm:$0xff] }
 0x84d   :  { %v6519_v30 = vpop.eup %6518 }
 0x84e   :  { %v3904_v58 = vadd.f32 1.0, %v6519_v30  ;;  %v6521_v10 = vpop.eup %6520 }
 0x84f   :  { %v3903_v50 = vadd.f32 1.0, %v6521_v10 }
 0x850   :  { %6534 = vrcp.f32 %v3904_v58 }
 0x851   :  { %v6523_v53 = vpop.eup %6522  ;;  %6536 = vrcp.f32 %v3903_v50 }
 0x852   :  { %v3906_v41 = vadd.f32 1.0, %v6523_v53  ;;  %v6525_v62 = vpop.eup %6524 }
 0x853   :  { %v6527_v21 = vpop.eup %6526  ;;  %v3905_v8 = vadd.f32 1.0, %v6525_v62 }
 0x854   :  { %6538 = vrcp.f32 %v3906_v41  ;;  %v6529_v3 = vpop.eup %6528  ;;  %v3932_v48 = vadd.f32 1.0, %v6527_v21 }
 0x855   :  { %6540 = vrcp.f32 %v3905_v8  ;;  %v6531_v14 = vpop.eup %6530  ;;  %v3931_v11 = vadd.f32 1.0, %v6529_v3  ;;  %v3973_v3 = vld [vmem:[%s7962_s5 + $0x10] sm:$0xff] }
 0x856   :  { %v6533_v16 = vpop.eup %6532  ;;  %v3934_v28 = vadd.f32 1.0, %v6531_v14  ;;  %6542 = vrcp.f32 %v3932_v48  ;;  %v3975_v14 = vld [vmem:[%s7962_s5 + $0x20] sm:$0xff]  ;;  %v3976_v48 = vld [vmem:[%s7962_s5 + $0x28] sm:$0xff] }
 0x857   :  { %v3933_v27 = vadd.f32 1.0, %v6533_v16  ;;  %6544 = vrcp.f32 %v3931_v11  ;;  %v3978_v16 = vld [vmem:[%s7962_s5 + $0x38] sm:$0xff]  ;;  %v3979_v11 = vld [vmem:[%s7962_s5 + $0x40] sm:$0xff] }
 0x858   :  { %6546 = vrcp.f32 %v3934_v28  ;;  %v3984_v28 = vld [vmem:[%s7962_s5 + $0x68] sm:$0xff] }
 0x85a   :  { %v6535_v42 = vpop.eup %6534 }
 0x85b   :  { %v3944_v33 = vmul.f32 %v6535_v42, %v3874_v24  ;;  %v6537_v15 = vpop.eup %6536  ;;  %v3981_v24 = vld [vmem:[%s7962_s5 + $0x50] sm:$0xff]  ;;  %v3983_v42 = vld [vmem:[%s7962_s5 + $0x60] sm:$0xff] }
 0x85c   :  { %v3943_v54 = vmul.f32 %v6537_v15, %v3869_v47  ;;  %v4181_v47 = vld [vmem:[%s7963_s6 + $0x8] sm:$0xff]  ;;  %v4182_v15 = vld [vmem:[%s7963_s6 + $0x10] sm:$0xff] }
 0x85d   :  { %v3948_v51 = vadd.f32 %v3944_v33, %v3617_v6  ;;  %v3986_v6 = vld [vmem:[%s7962_s5 + $0x78] sm:$0xff]  ;;  %v4180_v33 = vld [vmem:[%s7963_s6] sm:$0xff] }
 0x85e   :  { %v6539_v12 = vpop.eup %6538  ;;  %v3947_v55 = vadd.f32 %v3943_v54, %v3616_v39  ;;  %v6187_v35 = vpack.c.bf16 %v4181_v47, %v4180_v33  ;;  %v5015_v54 = vld [vmem:[%s7963_s6 + $0x40] sm:$0xff] }
 0x85f   :  { %6548 = vtanh.f32 %v3948_v51  ;;  %v3946_v25 = vmul.f32 %v6539_v12, %v3884_v60  ;;  %v6541_v34 = vpop.eup %6540  ;;  %v5016_v60 = vld [vmem:[%s7963_s6 + $0x48] sm:$0xff] }
 0x860   :  { %6550 = vrcp.f32 %v3933_v27  ;;  %v3945_v45 = vmul.f32 %v6541_v34, %v3879_v29  ;;  %v6543_v49 = vpop.eup %6542  ;;  %6188 = vmatprep.subr.bf16.mxu1 %v6187_v35  ;;  %v4183_v27 = vld [vmem:[%s7963_s6 + $0x18] sm:$0xff] }
 0x861   :  { %6552 = vtanh.f32 %v3947_v55  ;;  %v3950_v7 = vadd.f32 %v3946_v25, %v3619_v1  ;;  %v6545_v26 = vpop.eup %6544  ;;  %v3956_v44 = vsub.f32 1.0, %v6543_v49  ;;  %v3964_v57 = vmul.f32 %v6543_v49, %v7706_v17  ;;  %v5018_v55 = vld [vmem:[%s7963_s6 + $0x58] sm:$0xff]  ;;  %v5025_v49 = vld [vmem:[%s7963_s6 + $0x70] sm:$0xff] }
 0x862   :  { %v3949_v46 = vadd.f32 %v3945_v45, %v3618_v22  ;;  %v6547_v52 = vpop.eup %6546  ;;  %v3955_v63 = vsub.f32 1.0, %v6545_v26  ;;  %v3963_v19 = vmul.f32 %v6545_v26, %v7708_v0  ;;  %v6191_v51 = vpack.c.bf16 %v4183_v27, %v4182_v15  ;;  %v5026_v26 = vld [vmem:[%s7963_s6 + $0x78] sm:$0xff] }
 0x863   :  { %6554 = vtanh.f32 %v3950_v7  ;;  %v3958_v40 = vsub.f32 1.0, %v6547_v52  ;;  %v3966_v50 = vmul.f32 %v6547_v52, %v7716_v38  ;;  %v3972_v38 = vld [vmem:[%s7962_s5 + $0x8] sm:$0xff]  ;;  %v6195_v1 = vpack.c.bf16 %v5016_v60, %v5015_v54  ;;  %v5023_v7 = vld [vmem:[%s7963_s6 + $0x60] sm:$0xff] }
 0x864   :  { %6556 = vtanh.f32 %v3949_v46  ;;  %v6199_v29 = vpack.c.bf16 %v5018_v55, %v5017_v18  ;;  %v6203_v45 = vpack.c.bf16 %v5024_v31, %v5023_v7 }
 0x869   :  { %v6549_v13 = vpop.eup %6548 }
 0x86a   :  { %v6551_v56 = vpop.eup %6550  ;;  %v3960_v36 = vmul.f32 %v6549_v13, %v3956_v44  ;;  %v6207_v44 = vpack.c.bf16 %v5026_v26, %v5025_v49 }
 0x86b   :  { %v6553_v61 = vpop.eup %6552  ;;  %v3957_v58 = vsub.f32 1.0, %v6551_v56  ;;  %v3965_v17 = vmul.f32 %v6551_v56, %v7723_v9  ;;  %v3974_v9 = vld [vmem:[%s7962_s5 + $0x18] sm:$0xff]  ;;  %v5031_v56 = vld [vmem:[%s7963_s6 + $0x80] sm:$0xff] }
 0x86c   :  { %v3959_v37 = vmul.f32 %v6553_v61, %v3955_v63  ;;  %v7796_v2 = vadd.f32 %v3964_v57, %v3960_v36  ;;  %v5032_v63 = vld [vmem:[%s7963_s6 + $0x88] sm:$0xff] }
 0x86d   :  { %v6555_v4 = vpop.eup %6554  ;;  %v6211_v57 = vpack.c.bf16 %v5032_v63, %v5031_v56 }
 0x86e   :  { %v7798_v30 = vadd.f32 %v3963_v19, %v3959_v37  ;;  %v3962_v10 = vmul.f32 %v6555_v4, %v3958_v40  ;;  %v6557_v53 = vpop.eup %6556  ;;  %v5033_v37 = vld [vmem:[%s7963_s6 + $0x90] sm:$0xff]  ;;  %v5034_v19 = vld [vmem:[%s7963_s6 + $0x98] sm:$0xff] }
 0x86f   :  { %v3961_v62 = vmul.f32 %v6557_v53, %v3957_v58  ;;  %v6215_v40 = vpack.c.bf16 %v5034_v19, %v5033_v37 }
 0x870   :  { %v6171_v41 = vpack.c.bf16 %v7796_v2, %v7798_v30  ;;  %v7804_v21 = vadd.f32 %v3966_v50, %v3962_v10  ;;  %v5039_v10 = vld [vmem:[%s7964_s7] ss:$0 sm:$0xff] }
 0x871   :  { %v7806_v0 = vadd.f32 %v3965_v17, %v3961_v62 }
 0x872   :  { %6172 = vmatprep.subr.bf16.mxu0 %v6171_v41 }
 0x873   :  { %6174 = vmatpush3.bf16.msra.mxu0 %v6171_v41  ;;  %v6175_v8 = vpack.c.bf16 %v7804_v21, %v7806_v0 }
 0x875   :  { %6176 = vmatprep.subr.bf16.mxu0 %v6175_v8 }
 0x877   :  { %6178 = vmatpush3.bf16.msra.mxu0 %v6175_v8 }
 0x87a   :  { %5886 = vmatmul.mubr.msk.f32.vlgmr.msra.gmra.mrb[98].mxu0 %vm388_vm2, %v3972_v38 }
 0x87b   :  { %5888 = vmatprep.mubr.msk.f32.mxu0 %vm388_vm2, %v3973_v3 }
 0x87e   :  { %5889 = vmatmul.mubr.msk.f32.gmra.mrb[100].mxu0 %vm388_vm2, %v3974_v9 }
 0x87f   :  { %5891 = vmatprep.mubr.msk.f32.mxu0 %vm388_vm2, %v3975_v14 }
 0x882   :  { %5892 = vmatmul.mubr.msk.f32.gmra.mrb[102].mxu0 %vm388_vm2, %v3976_v48 }
 0x883   :  { %5894 = vmatprep.mubr.msk.f32.mxu0 %vm388_vm2, %v3977_v5 }
 0x886   :  { %5895 = vmatmul.mubr.msk.f32.gmra.mrb[104].mxu0 %vm388_vm2, %v3978_v16 }
 0x887   :  { %5897 = vmatprep.mubr.msk.f32.mxu0 %vm388_vm2, %v3979_v11 }
 0x88a   :  { %5898 = vmatmul.mubr.msk.f32.gmra.mrb[106].mxu0 %vm388_vm2, %v3980_v59 }
 0x88b   :  { %5900 = vmatprep.mubr.msk.f32.mxu0 %vm388_vm2, %v3981_v24 }
 0x88e   :  { %5901 = vmatmul.mubr.msk.f32.gmra.mrb[108].mxu0 %vm388_vm2, %v3982_v20 }
 0x88f   :  { %5903 = vmatprep.mubr.msk.f32.mxu0 %vm388_vm2, %v3983_v42 }
 0x892   :  { %5904 = vmatmul.mubr.msk.f32.gmra.mrb[110].mxu0 %vm388_vm2, %v3984_v28 }
 0x893   :  { %5906 = vmatprep.mubr.msk.f32.mxu0 %vm388_vm2, %v3985_v32 }
 0x896   :  { %5907 = vmatmul.mubr.msk.f32.gmra.mrb[112].mxu0 %vm388_vm2, %v3986_v6 }
 0x94d   :  { %v5887_v23 = vpop.f32.mrb[98].mxu0 }
 0x94e   :  { %v4101_v39 = vpop.f32.mrb[99].mxu0 }
 0x94f   :  { %5917 = vmatprep.mubr.msk.f32.mxu1 %vm388_vm2, %v4101_v39 }
 0x950   :  { %5918 = vmatmul.mubr.msk.f32.vlgmr.msra.gmra.mrb[94].mxu1 %vm388_vm2, %v5887_v23 }
 0x951   :  { %v5890_v12 = vpop.f32.mrb[100].mxu0  ;;  %6190 = vmatpush3.bf16.msra.mxu1 %v6187_v35 }
 0x952   :  { %v4111_v43 = vpop.f32.mrb[101].mxu0  ;;  %6192 = vmatprep.subr.bf16.mxu1 %v6191_v51 }
 0x953   :  { %5920 = vmatprep.mubr.msk.f32.mxu1 %vm388_vm2, %v4111_v43 }
 0x954   :  { %5921 = vmatmul.mubr.msk.f32.gmra.mrb[96].mxu1 %vm388_vm2, %v5890_v12 }
 0x955   :  { %6194 = vmatpush3.bf16.msra.mxu1 %v6191_v51  ;;  %5931 = vmatprep.mubr.msk.f32.mxu1 %vm388_vm2, %v7798_v30  ;;  %v5893_v25 = vpop.f32.mrb[102].mxu0 }
 0x956   :  { %6196 = vmatprep.subr.bf16.mxu1 %v6195_v1  ;;  %v4121_v34 = vpop.f32.mrb[103].mxu0 }
 0x958   :  { %5932 = vmatmul.mubr.msk.f32.vlgmr.msra.gmra.mrb[94].mxu1 %vm388_vm2, %v7796_v2 }
 0x959   :  { %5934 = vmatprep.mubr.msk.f32.mxu1 %vm388_vm2, %v7806_v0  ;;  %6198 = vmatpush3.bf16.msra.mxu1 %v6195_v1  ;;  %v5896_v22 = vpop.f32.mrb[104].mxu0 }
 0x95a   :  { %6200 = vmatprep.subr.bf16.mxu1 %v6199_v29  ;;  %v4131_v46 = vpop.f32.mrb[105].mxu0 }
 0x95c   :  { %5935 = vmatmul.mubr.msk.f32.gmra.mrb[96].mxu1 %vm388_vm2, %v7804_v21 }
 0x95d   :  { %6202 = vmatpush3.bf16.msra.mxu1 %v6199_v29  ;;  %5945 = vmatprep.mubr.msk.f32.mxu1 %vm388_vm2, %v4121_v34  ;;  %v5899_v52 = vpop.f32.mrb[106].mxu0 }
 0x95e   :  { %6204 = vmatprep.subr.bf16.mxu1 %v6203_v45  ;;  %v4141_v13 = vpop.f32.mrb[107].mxu0 }
 0x960   :  { %5946 = vmatmul.mubr.msk.f32.vlgmr.msra.gmra.mrb[94].mxu1 %vm388_vm2, %v5893_v25 }
 0x961   :  { %6206 = vmatpush3.bf16.msra.mxu1 %v6203_v45  ;;  %5948 = vmatprep.mubr.msk.f32.mxu1 %vm388_vm2, %v4131_v46  ;;  %v5902_v36 = vpop.f32.mrb[108].mxu0 }
 0x962   :  { %6208 = vmatprep.subr.bf16.mxu1 %v6207_v44  ;;  %v4151_v61 = vpop.f32.mrb[109].mxu0 }
 0x964   :  { %5949 = vmatmul.mubr.msk.f32.gmra.mrb[96].mxu1 %vm388_vm2, %v5896_v22 }
 0x965   :  { %6210 = vmatpush3.bf16.msra.mxu1 %v6207_v44  ;;  %5959 = vmatprep.mubr.msk.f32.mxu1 %vm388_vm2, %v4141_v13  ;;  %v5905_v2 = vpop.f32.mrb[110].mxu0 }
 0x966   :  { %6212 = vmatprep.subr.bf16.mxu1 %v6211_v57  ;;  %v4161_v4 = vpop.f32.mrb[111].mxu0 }
 0x968   :  { %5960 = vmatmul.mubr.msk.f32.vlgmr.msra.gmra.mrb[94].mxu1 %vm388_vm2, %v5899_v52 }
 0x969   :  { %6214 = vmatpush3.bf16.msra.mxu1 %v6211_v57  ;;  %5962 = vmatprep.mubr.msk.f32.mxu1 %vm388_vm2, %v4151_v61  ;;  %v5908_v30 = vpop.f32.mrb[112].mxu0 }
 0x96a   :  { %6216 = vmatprep.subr.bf16.mxu1 %v6215_v40  ;;  %v4171_v58 = vpop.f32.mrb[113].mxu0 }
 0x96c   :  { %5963 = vmatmul.mubr.msk.f32.gmra.mrb[96].mxu1 %vm388_vm2, %v5902_v36 }
 0x96d   :  { %6218 = vmatpush3.bf16.msra.mxu1 %v6215_v40  ;;  %5973 = vmatprep.mubr.msk.f32.mxu1 %vm388_vm2, %v4161_v4 }
 0x970   :  { %5974 = vmatmul.mubr.msk.f32.vlgmr.msra.gmra.mrb[94].mxu1 %vm388_vm2, %v5905_v2 }
 0x971   :  { %5976 = vmatprep.mubr.msk.f32.mxu1 %vm388_vm2, %v4171_v58 }
 0x974   :  { %5977 = vmatmul.mubr.msk.f32.gmra.mrb[96].mxu1 %vm388_vm2, %v5908_v30 }
 0xa43   :  { %v5975_v50 = vpop.f32.mrb[94].mxu1 }
 0xa44   :  { %v4709_v53 = vadd.f32 %v5975_v50, %v5039_v10  ;;  %v4678_v41 = vpop.f32.mrb[95].mxu1 }
 0xa45   :  { %v4708_v62 = vadd.f32 %v5039_v10, %v4678_v41 }
 0xa46   :  { %4714 = vst.msk [vmem:[%s7965_s8 + $0x8] sm:$0xff] %vm4712_vm3, %v4709_v53 }
 0xa47   :  { %4713 = vst.msk [vmem:[%s7965_s8] sm:$0xff] %vm4712_vm3, %v4708_v62  ;;  %v5978_v17 = vpop.f32.mrb[96].mxu1 }
 0xa48   :  { %v4711_v21 = vadd.f32 %v5978_v17, %v5039_v10  ;;  %v4688_v0 = vpop.f32.mrb[97].mxu1 }
 0xa49   :  { %v4710_v8 = vadd.f32 %v5039_v10, %v4688_v0 }
 0xa4a   :  { %4716 = vst.msk [vmem:[%s7965_s8 + $0x18] sm:$0xff] %vm4712_vm3, %v4711_v21 }
 0xa4b   :  { %4715 = vst.msk [vmem:[%s7965_s8 + $0x10] sm:$0xff] %vm4712_vm3, %v4710_v8 }

</bundles_post_ra>
